<compile_context>
chip_gen: v7x
topology: tpu7x:2x2x1
jax: 0.10.0
libtpu: 0.0.40
codegen_flags: <defaults>
</compile_context>

<pallas_src>
import jax
import jax.numpy as jnp
import numpy as np
from jax.experimental import pallas as pl
from jax.experimental.pallas import tpu as pltpu


# ----------------------------------------------------------------------------
# Helpers
# ----------------------------------------------------------------------------
def _row_block(n, block_rows):
    return block_rows if (block_rows and n % block_rows == 0) else n


def _pick_time_chunk(t, target):
    if t <= target:
        return t
    for c in range(target, 0, -1):
        if t % c == 0:
            return c
    return t


# ----------------------------------------------------------------------------
# Hoisted input-projection kernels (row-tiled GEMM + bias)
# ----------------------------------------------------------------------------
def _proj_single_kernel(x_ref, wf_ref, wb_ref, bf_ref, bb_ref, of_ref, ob_ref):
    """Layer 0: x (bm, D) -> fwd/bwd gate pre-activations, each (bm, 4H)."""
    x = x_ref[...]
    of_ref[...] = (jnp.dot(x, wf_ref[...], preferred_element_type=jnp.float32)
                   + bf_ref[...]).astype(of_ref.dtype)
    ob_ref[...] = (jnp.dot(x, wb_ref[...], preferred_element_type=jnp.float32)
                   + bb_ref[...]).astype(ob_ref.dtype)


def _proj_dual_kernel(xf_ref, xb_ref, wff_ref, wbf_ref, wfb_ref, wbb_ref,
                      bf_ref, bb_ref, of_ref, ob_ref):
    """Layers > 0: inputs are separate fwd/bwd hidden slabs (bm, H); avoids any concat."""
    xf = xf_ref[...]
    xb = xb_ref[...]
    of_ref[...] = (jnp.dot(xf, wff_ref[...], preferred_element_type=jnp.float32)
                   + jnp.dot(xb, wbf_ref[...], preferred_element_type=jnp.float32)
                   + bf_ref[...]).astype(of_ref.dtype)
    ob_ref[...] = (jnp.dot(xf, wfb_ref[...], preferred_element_type=jnp.float32)
                   + jnp.dot(xb, wbb_ref[...], preferred_element_type=jnp.float32)
                   + bb_ref[...]).astype(ob_ref.dtype)


def _fc_dual_kernel(xf_ref, xb_ref, wf_ref, wb_ref, b_ref, o_ref):
    """Final linear layer on split fwd/bwd hidden slabs."""
    o_ref[...] = (jnp.dot(xf_ref[...], wf_ref[...], preferred_element_type=jnp.float32)
                  + jnp.dot(xb_ref[...], wb_ref[...], preferred_element_type=jnp.float32)
                  + b_ref[...]).astype(o_ref.dtype)


def proj_single_pallas(x, w_f, w_b, b_f, b_b, *, block_rows=512, mxu_dtype=None):
    n, d = x.shape
    g = w_f.shape[1]
    if mxu_dtype is not None:
        x = x.astype(mxu_dtype)
        w_f = w_f.astype(mxu_dtype)
        w_b = w_b.astype(mxu_dtype)
    bm = _row_block(n, block_rows)
    return pl.pallas_call(
        _proj_single_kernel,
        out_shape=(jax.ShapeDtypeStruct((n, g), jnp.float32),
                   jax.ShapeDtypeStruct((n, g), jnp.float32)),
        grid=(n // bm,),
        in_specs=[
            pl.BlockSpec((bm, d), lambda i: (i, 0)),
            pl.BlockSpec((d, g), lambda i: (0, 0)),
            pl.BlockSpec((d, g), lambda i: (0, 0)),
            pl.BlockSpec((1, g), lambda i: (0, 0)),
            pl.BlockSpec((1, g), lambda i: (0, 0)),
        ],
        out_specs=(pl.BlockSpec((bm, g), lambda i: (i, 0)),
                   pl.BlockSpec((bm, g), lambda i: (i, 0))),
        compiler_params=pltpu.CompilerParams(dimension_semantics=("parallel",)),
    )(x, w_f, w_b,
      b_f.astype(jnp.float32).reshape(1, g),
      b_b.astype(jnp.float32).reshape(1, g))


def proj_dual_pallas(x_f, x_b, w_ih_f, w_ih_b, b_f, b_b, *,
                     block_rows=512, mxu_dtype=None):
    n, h = x_f.shape
    g = w_ih_f.shape[1]
    # Rows [:H] multiply the fwd hidden slab, rows [H:] the bwd hidden slab.
    w_ff, w_bf = w_ih_f[:h], w_ih_f[h:]      # -> forward-direction gates
    w_fb, w_bb = w_ih_b[:h], w_ih_b[h:]      # -> backward-direction gates
    if mxu_dtype is not None:
        x_f = x_f.astype(mxu_dtype)
        x_b = x_b.astype(mxu_dtype)
        w_ff = w_ff.astype(mxu_dtype)
        w_bf = w_bf.astype(mxu_dtype)
        w_fb = w_fb.astype(mxu_dtype)
        w_bb = w_bb.astype(mxu_dtype)
    bm = _row_block(n, block_rows)
    return pl.pallas_call(
        _proj_dual_kernel,
        out_shape=(jax.ShapeDtypeStruct((n, g), jnp.float32),
                   jax.ShapeDtypeStruct((n, g), jnp.float32)),
        grid=(n // bm,),
        in_specs=[
            pl.BlockSpec((bm, h), lambda i: (i, 0)),
            pl.BlockSpec((bm, h), lambda i: (i, 0)),
            pl.BlockSpec((h, g), lambda i: (0, 0)),
            pl.BlockSpec((h, g), lambda i: (0, 0)),
            pl.BlockSpec((h, g), lambda i: (0, 0)),
            pl.BlockSpec((h, g), lambda i: (0, 0)),
            pl.BlockSpec((1, g), lambda i: (0, 0)),
            pl.BlockSpec((1, g), lambda i: (0, 0)),
        ],
        out_specs=(pl.BlockSpec((bm, g), lambda i: (i, 0)),
                   pl.BlockSpec((bm, g), lambda i: (i, 0))),
        compiler_params=pltpu.CompilerParams(dimension_semantics=("parallel",)),
    )(x_f, x_b, w_ff, w_bf, w_fb, w_bb,
      b_f.astype(jnp.float32).reshape(1, g),
      b_b.astype(jnp.float32).reshape(1, g))


def fc_dual_pallas(x_f, x_b, w_fc, b_fc, *, block_rows=512, mxu_dtype=None):
    n, h = x_f.shape
    c = w_fc.shape[1]
    w_f, w_b = w_fc[:h], w_fc[h:]
    if mxu_dtype is not None:
        x_f = x_f.astype(mxu_dtype)
        x_b = x_b.astype(mxu_dtype)
        w_f = w_f.astype(mxu_dtype)
        w_b = w_b.astype(mxu_dtype)
    bm = _row_block(n, block_rows)
    return pl.pallas_call(
        _fc_dual_kernel,
        out_shape=jax.ShapeDtypeStruct((n, c), jnp.float32),
        grid=(n // bm,),
        in_specs=[
            pl.BlockSpec((bm, h), lambda i: (i, 0)),
            pl.BlockSpec((bm, h), lambda i: (i, 0)),
            pl.BlockSpec((h, c), lambda i: (0, 0)),
            pl.BlockSpec((h, c), lambda i: (0, 0)),
            pl.BlockSpec((1, c), lambda i: (0, 0)),
        ],
        out_specs=pl.BlockSpec((bm, c), lambda i: (i, 0)),
        compiler_params=pltpu.CompilerParams(dimension_semantics=("parallel",)),
    )(x_f, x_b, w_f, w_b, b_fc.astype(jnp.float32).reshape(1, c))


# ----------------------------------------------------------------------------
# Fused bidirectional recurrence: grid over time chunks, state in VMEM scratch
# ----------------------------------------------------------------------------
def _bilstm_rec_kernel(gxf_ref, gxb_ref, whh_f_ref, whh_b_ref,
                       out_f_ref, out_b_ref,
                       h_f_sc, c_f_sc, h_b_sc, c_b_sc):
    """gxf_ref/gxb_ref: (tc, B, 4H) gate pre-activations.  Fwd chunk i, bwd chunk nc-1-i.
    out_f_ref/out_b_ref: (tc, B, H).  h/c scratch persists across grid steps."""
    tc = gxf_ref.shape[0]
    H = whh_f_ref.shape[0]

    @pl.when(pl.program_id(0) == 0)
    def _():
        h_f_sc[...] = jnp.zeros_like(h_f_sc)
        c_f_sc[...] = jnp.zeros_like(c_f_sc)
        h_b_sc[...] = jnp.zeros_like(h_b_sc)
        c_b_sc[...] = jnp.zeros_like(c_b_sc)

    # Recurrent weights hoisted out of the time loop (VMEM-resident across the grid).
    whh_f = whh_f_ref[...]
    whh_b = whh_b_ref[...]

    def _cell(gates, c_prev):
        # NOTE: H=32 slices cut inside a 128-lane vreg; for production pick H a
        # multiple of 128 so each gate is a whole vreg.
        i = jax.nn.sigmoid(gates[:, 0 * H:1 * H])
        f = jax.nn.sigmoid(gates[:, 1 * H:2 * H])
        g = jnp.tanh(gates[:, 2 * H:3 * H])
        o = jax.nn.sigmoid(gates[:, 3 * H:4 * H])
        c_new = f * c_prev + i * g
        h_new = o * jnp.tanh(c_new)
        return h_new, c_new

    def body(t, carry):
        tb = tc - 1 - t
        # ---- forward direction: local time t (global i*tc + t) ----
        gates_f = gxf_ref[t] + jnp.dot(
            h_f_sc[...].astype(whh_f.dtype), whh_f,
            preferred_element_type=jnp.float32)
        h_new_f, c_new_f = _cell(gates_f, c_f_sc[...])
        h_f_sc[...] = h_new_f
        c_f_sc[...] = c_new_f
        out_f_ref[t] = h_new_f.astype(out_f_ref.dtype)
        # ---- backward direction: local time tc-1-t of the reversed chunk ----
        gates_b = gxb_ref[tb] + jnp.dot(
            h_b_sc[...].astype(whh_b.dtype), whh_b,
            preferred_element_type=jnp.float32)
        h_new_b, c_new_b = _cell(gates_b, c_b_sc[...])
        h_b_sc[...] = h_new_b
        c_b_sc[...] = c_new_b
        out_b_ref[tb] = h_new_b.astype(out_b_ref.dtype)
        return carry

    jax.lax.fori_loop(0, tc, body, 0, unroll=True)


def bilstm_layer_pallas(gx_f, gx_b, w_hh_f, w_hh_b, *, time_chunk=32, mxu_dtype=None):
    """gx_f, gx_b: (T, B, 4H) -> (h_f, h_b), each (T, B, H)."""
    T, B, G = gx_f.shape
    H = w_hh_f.shape[0]
    assert G == 4 * H
    if mxu_dtype is not None:
        w_hh_f = w_hh_f.astype(mxu_dtype)
        w_hh_b = w_hh_b.astype(mxu_dtype)
    tc = _pick_time_chunk(T, time_chunk)
    nc = T // tc
    return pl.pallas_call(
        _bilstm_rec_kernel,
        out_shape=(jax.ShapeDtypeStruct((T, B, H), jnp.float32),
                   jax.ShapeDtypeStruct((T, B, H), jnp.float32)),
        grid=(nc,),
        in_specs=[
            pl.BlockSpec((tc, B, G), lambda i: (i, 0, 0)),            # fwd gate chunk
            pl.BlockSpec((tc, B, G), lambda i: (nc - 1 - i, 0, 0)),   # bwd gate chunk
            pl.BlockSpec((H, G), lambda i: (0, 0)),                   # resident weights
            pl.BlockSpec((H, G), lambda i: (0, 0)),
        ],
        out_specs=(
            pl.BlockSpec((tc, B, H), lambda i: (i, 0, 0)),
            pl.BlockSpec((tc, B, H), lambda i: (nc - 1 - i, 0, 0)),
        ),
        scratch_shapes=[
            pltpu.VMEM((B, H), jnp.float32),   # h forward
            pltpu.VMEM((B, H), jnp.float32),   # c forward
            pltpu.VMEM((B, H), jnp.float32),   # h backward
            pltpu.VMEM((B, H), jnp.float32),   # c backward
        ],
        compiler_params=pltpu.CompilerParams(
            dimension_semantics=("arbitrary",)),   # sequential recurrence
    )(gx_f, gx_b, w_hh_f, w_hh_b)


# ----------------------------------------------------------------------------
# Pure-JAX reference (PyTorch semantics) for correctness checking
# ----------------------------------------------------------------------------
def _lstm_direction_ref(x_tm, w_ih, w_hh, b):
    H = w_hh.shape[0]
    B = x_tm.shape[1]

    def step(carry, x_t):
        h, c = carry
        gates = x_t @ w_ih + h @ w_hh + b
        i = jax.nn.sigmoid(gates[:, 0 * H:1 * H])
        f = jax.nn.sigmoid(gates[:, 1 * H:2 * H])
        g = jnp.tanh(gates[:, 2 * H:3 * H])
        o = jax.nn.sigmoid(gates[:, 3 * H:4 * H])
        c = f * c + i * g
        h = o * jnp.tanh(c)
        return (h, c), h

    h0 = jnp.zeros((B, H), x_tm.dtype)
    _, hs = jax.lax.scan(step, (h0, h0), x_tm)
    return hs


def lstm_backend_forward_ref(x, params):
    h = jnp.transpose(x, (1, 0, 2))                       # (T, B, D)
    for (w_if, w_hf, b_f), (w_ib, w_hb, b_b) in params["lstm"]:
        h_f = _lstm_direction_ref(h, w_if, w_hf, b_f)
        h_b = _lstm_direction_ref(h[::-1], w_ib, w_hb, b_b)[::-1]
        h = jnp.concatenate([h_f, h_b], axis=-1)
    out = jnp.transpose(h, (1, 0, 2))                     # (B, T, 2H)
    w_fc, b_fc = params["fc"]
    return out @ w_fc + b_fc


# ----------------------------------------------------------------------------
# Model wrapper: LSTMBackend.forward(x) == fc(bi_lstm(x)[0])
# ----------------------------------------------------------------------------
def lstm_backend_forward(x, params, *, mxu_dtype=None, time_chunk=32, block_rows=512):
    """x: (B, T, input_dim) batch-first -> (B, T, num_class)."""
    B, T, d_in = x.shape
    x_tm = jnp.transpose(x, (1, 0, 2))                    # single small boundary transpose

    h_f = h_b = None
    H = params["lstm"][0][0][1].shape[0]
    for li, ((w_ih_f, w_hh_f, b_f), (w_ih_b, w_hh_b, b_b)) in enumerate(params["lstm"]):
        H = w_hh_f.shape[0]
        if li == 0:
            gx_f, gx_b = proj_single_pallas(
                x_tm.reshape(T * B, d_in), w_ih_f, w_ih_b, b_f, b_b,
                block_rows=block_rows, mxu_dtype=mxu_dtype)
        else:
            gx_f, gx_b = proj_dual_pallas(
                h_f.reshape(T * B, H), h_b.reshape(T * B, H),
                w_ih_f, w_ih_b, b_f, b_b,
                block_rows=block_rows, mxu_dtype=mxu_dtype)
        gx_f = gx_f.reshape(T, B, 4 * H)
        gx_b = gx_b.reshape(T, B, 4 * H)
        h_f, h_b = bilstm_layer_pallas(gx_f, gx_b, w_hh_f, w_hh_b,
                                       time_chunk=time_chunk, mxu_dtype=mxu_dtype)

    w_fc, b_fc = params["fc"]
    C = w_fc.shape[1]
    y = fc_dual_pallas(h_f.reshape(T * B, H), h_b.reshape(T * B, H), w_fc, b_fc,
                       block_rows=block_rows, mxu_dtype=mxu_dtype)
    return jnp.transpose(y.reshape(T, B, C), (1, 0, 2)).astype(x.dtype)   # (B, T, C)


def init_params(key, input_dim, hidden_dim, num_layers, num_class):
    """Deterministic uniform init matching PyTorch's LSTM/Linear init ranges."""
    params = {"lstm": []}
    k_lstm = 1.0 / float(np.sqrt(hidden_dim))
    for layer in range(num_layers):
        d_in = input_dim if layer == 0 else 2 * hidden_dim
        dirs = []
        for _ in range(2):  # forward, backward
            key, k1, k2, k3, k4 = jax.random.split(key, 5)
            w_ih = jax.random.uniform(k1, (d_in, 4 * hidden_dim),
                                      jnp.float32, -k_lstm, k_lstm)
            w_hh = jax.random.uniform(k2, (hidden_dim, 4 * hidden_dim),
                                      jnp.float32, -k_lstm, k_lstm)
            b_ih = jax.random.uniform(k3, (4 * hidden_dim,),
                                      jnp.float32, -k_lstm, k_lstm)
            b_hh = jax.random.uniform(k4, (4 * hidden_dim,),
                                      jnp.float32, -k_lstm, k_lstm)
            dirs.append((w_ih, w_hh, b_ih + b_hh))
        params["lstm"].append(tuple(dirs))
    k_fc = 1.0 / float(np.sqrt(2 * hidden_dim))
    key, k1, k2 = jax.random.split(key, 3)
    w_fc = jax.random.uniform(k1, (2 * hidden_dim, num_class),
                              jnp.float32, -k_fc, k_fc)
    b_fc = jax.random.uniform(k2, (num_class,), jnp.float32, -k_fc, k_fc)
    params["fc"] = (w_fc, b_fc)
    return params


if __name__ == "__main__":
    # Small shapes consistent with the module's forward:
    # x: (batch, seq, input_dim); bi-LSTM(hidden_dim, num_lstm layers) -> Linear(2H, num_class)
    options = {"model": {"input_dim": 32, "hidden_dim": 32,
                         "num_lstm": 2, "num_class": 16}}
    B, T = 2, 8

    key = jax.random.PRNGKey(0)
    key, kx = jax.random.split(key)
    x = jax.random.normal(kx, (B, T, options["model"]["input_dim"]), jnp.float32)

    params = init_params(key,
                         options["model"]["input_dim"],
                         options["model"]["hidden_dim"],
                         options["model"]["num_lstm"],
                         options["model"]["num_class"])

    # mxu_dtype=jnp.bfloat16 is the recommended setting on v6e/v7x at production sizes;
    # kept at f32 here so the 1e-4 check against the f32 reference holds.
    forward = jax.jit(lstm_backend_forward)
    y = forward(x, params)
    y = jax.block_until_ready(y)

    y_ref = jax.block_until_ready(lstm_backend_forward_ref(x, params))

    assert y.shape == (B, T, options["model"]["num_class"])
    np.testing.assert_allclose(np.asarray(y), np.asarray(y_ref),
                               rtol=1e-4, atol=1e-4)
    print("KERNEL_OK")
</pallas_src>

<mosaic_0001>
module attributes {stable_mosaic.version = 11 : i64} {
  func.func @_proj_single_kernel(%arg0: i32, %arg1: memref<16x32xf32, #tpu.memory_space<vmem>>, %arg2: memref<32x128xf32, #tpu.memory_space<vmem>>, %arg3: memref<32x128xf32, #tpu.memory_space<vmem>>, %arg4: memref<1x128xf32, #tpu.memory_space<vmem>>, %arg5: memref<1x128xf32, #tpu.memory_space<vmem>>, %arg6: memref<16x128xf32, #tpu.memory_space<vmem>>, %arg7: memref<16x128xf32, #tpu.memory_space<vmem>>) attributes {dimension_semantics = [#tpu.dimension_semantics<parallel>], iteration_bounds = array<i64: 1>, scalar_prefetch = 0 : i64, scratch_operands = 0 : i64, tpu.core_type = #tpu.core_type<tc>, window_params = [{transform_indices = @transform_0, window_bounds = array<i64: 16, 32>}, {pipeline_mode = #tpu.pipeline_mode<synchronous>, transform_indices = @transform_1, window_bounds = array<i64: 32, 128>}, {pipeline_mode = #tpu.pipeline_mode<synchronous>, transform_indices = @transform_2, window_bounds = array<i64: 32, 128>}, {pipeline_mode = #tpu.pipeline_mode<synchronous>, transform_indices = @transform_3, window_bounds = array<i64: 1, 128>}, {pipeline_mode = #tpu.pipeline_mode<synchronous>, transform_indices = @transform_4, window_bounds = array<i64: 1, 128>}, {transform_indices = @transform_5, window_bounds = array<i64: 16, 128>}, {transform_indices = @transform_6, window_bounds = array<i64: 16, 128>}]} {
    %c0 = arith.constant 0 : index
    %c0_0 = arith.constant 0 : index
    %0 = vector.load %arg1[%c0, %c0_0] : memref<16x32xf32, #tpu.memory_space<vmem>>, vector<16x32xf32>
    %c0_1 = arith.constant 0 : index
    %c0_2 = arith.constant 0 : index
    %1 = vector.load %arg2[%c0_1, %c0_2] : memref<32x128xf32, #tpu.memory_space<vmem>>, vector<32x128xf32>
    %cst = arith.constant dense<0.000000e+00> : vector<16x128xf32>
    %2 = tpu.matmul %0, %1, %cst {dimension_numbers = #tpu.dot_dimension_numbers<[1], [0], [0], [1], [0, 0, 1, 1], [], []>} : vector<16x32xf32>, vector<32x128xf32>, vector<16x128xf32> -> vector<16x128xf32>
    %c0_3 = arith.constant 0 : index
    %c0_4 = arith.constant 0 : index
    %3 = vector.load %arg4[%c0_3, %c0_4] : memref<1x128xf32, #tpu.memory_space<vmem>>, vector<1x128xf32>
    %4 = vector.broadcast %3 : vector<1x128xf32> to vector<16x128xf32>
    %5 = arith.addf %2, %4 : vector<16x128xf32>
    %c0_5 = arith.constant 0 : index
    %c0_6 = arith.constant 0 : index
    %6 = vector.load %arg6[%c0_5, %c0_6] : memref<16x128xf32, #tpu.memory_space<vmem>>, vector<16x128xf32>
    tpu.vector_store %arg6[%c0_5, %c0_6], %5 {strides = array<i32>} : memref<16x128xf32, #tpu.memory_space<vmem>>, vector<16x128xf32>,
    %c0_7 = arith.constant 0 : index
    %c0_8 = arith.constant 0 : index
    %7 = vector.load %arg3[%c0_7, %c0_8] : memref<32x128xf32, #tpu.memory_space<vmem>>, vector<32x128xf32>
    %cst_9 = arith.constant dense<0.000000e+00> : vector<16x128xf32>
    %8 = tpu.matmul %0, %7, %cst_9 {dimension_numbers = #tpu.dot_dimension_numbers<[1], [0], [0], [1], [0, 0, 1, 1], [], []>} : vector<16x32xf32>, vector<32x128xf32>, vector<16x128xf32> -> vector<16x128xf32>
    %c0_10 = arith.constant 0 : index
    %c0_11 = arith.constant 0 : index
    %9 = vector.load %arg5[%c0_10, %c0_11] : memref<1x128xf32, #tpu.memory_space<vmem>>, vector<1x128xf32>
    %10 = vector.broadcast %9 : vector<1x128xf32> to vector<16x128xf32>
    %11 = arith.addf %8, %10 : vector<16x128xf32>
    %c0_12 = arith.constant 0 : index
    %c0_13 = arith.constant 0 : index
    %12 = vector.load %arg7[%c0_12, %c0_13] : memref<16x128xf32, #tpu.memory_space<vmem>>, vector<16x128xf32>
    tpu.vector_store %arg7[%c0_12, %c0_13], %11 {strides = array<i32>} : memref<16x128xf32, #tpu.memory_space<vmem>>, vector<16x128xf32>,
    return
  }
  func.func @transform_0(%arg0: i32) -> (i32, i32) {
    %c0_i32 = arith.constant 0 : i32
    %c0_i32_0 = arith.constant 0 : i32
    return %arg0, %c0_i32 : i32, i32
  }
  func.func @transform_1(%arg0: i32) -> (i32, i32) {
    %c0_i32 = arith.constant 0 : i32
    %c0_i32_0 = arith.constant 0 : i32
    %c0_i32_1 = arith.constant 0 : i32
    return %c0_i32, %c0_i32_0 : i32, i32
  }
  func.func @transform_2(%arg0: i32) -> (i32, i32) {
    %c0_i32 = arith.constant 0 : i32
    %c0_i32_0 = arith.constant 0 : i32
    %c0_i32_1 = arith.constant 0 : i32
    return %c0_i32, %c0_i32_0 : i32, i32
  }
  func.func @transform_3(%arg0: i32) -> (i32, i32) {
    %c0_i32 = arith.constant 0 : i32
    %c0_i32_0 = arith.constant 0 : i32
    %c0_i32_1 = arith.constant 0 : i32
    return %c0_i32, %c0_i32_0 : i32, i32
  }
  func.func @transform_4(%arg0: i32) -> (i32, i32) {
    %c0_i32 = arith.constant 0 : i32
    %c0_i32_0 = arith.constant 0 : i32
    %c0_i32_1 = arith.constant 0 : i32
    return %c0_i32, %c0_i32_0 : i32, i32
  }
  func.func @transform_5(%arg0: i32) -> (i32, i32) {
    %c0_i32 = arith.constant 0 : i32
    %c0_i32_0 = arith.constant 0 : i32
    return %arg0, %c0_i32 : i32, i32
  }
  func.func @transform_6(%arg0: i32) -> (i32, i32) {
    %c0_i32 = arith.constant 0 : i32
    %c0_i32_0 = arith.constant 0 : i32
    return %arg0, %c0_i32 : i32, i32
  }
}

module attributes {stable_mosaic.version = 11 : i64} {
  func.func @_bilstm_rec_kernel(%arg0: i32, %arg1: memref<8x2x128xf32, #tpu.memory_space<vmem>>, %arg2: memref<8x2x128xf32, #tpu.memory_space<vmem>>, %arg3: memref<32x128xf32, #tpu.memory_space<vmem>>, %arg4: memref<32x128xf32, #tpu.memory_space<vmem>>, %arg5: memref<8x2x32xf32, #tpu.memory_space<vmem>>, %arg6: memref<8x2x32xf32, #tpu.memory_space<vmem>>, %arg7: memref<2x32xf32, #tpu.memory_space<vmem>>, %arg8: memref<2x32xf32, #tpu.memory_space<vmem>>, %arg9: memref<2x32xf32, #tpu.memory_space<vmem>>, %arg10: memref<2x32xf32, #tpu.memory_space<vmem>>) attributes {dimension_semantics = [#tpu.dimension_semantics<arbitrary>], iteration_bounds = array<i64: 1>, scalar_prefetch = 0 : i64, scratch_operands = 4 : i64, tpu.core_type = #tpu.core_type<tc>, window_params = [{transform_indices = @transform_0, window_bounds = array<i64: 8, 2, 128>}, {transform_indices = @transform_1, window_bounds = array<i64: 8, 2, 128>}, {pipeline_mode = #tpu.pipeline_mode<synchronous>, transform_indices = @transform_2, window_bounds = array<i64: 32, 128>}, {pipeline_mode = #tpu.pipeline_mode<synchronous>, transform_indices = @transform_3, window_bounds = array<i64: 32, 128>}, {transform_indices = @transform_4, window_bounds = array<i64: 8, 2, 32>}, {transform_indices = @transform_5, window_bounds = array<i64: 8, 2, 32>}]} {
    %c0_i32 = arith.constant 0 : i32
    %0 = arith.cmpi eq, %arg0, %c0_i32 : i32
    %1 = arith.extui %0 : i1 to i32
    %c0_i32_0 = arith.constant 0 : i32
    %2 = arith.cmpi ne, %1, %c0_i32_0 : i32
    scf.if %2 {
      %cst_268 = arith.constant 0.000000e+00 : f32
      %621 = vector.broadcast %cst_268 : f32 to vector<2x32xf32>
      %c0_269 = arith.constant 0 : index
      %c0_270 = arith.constant 0 : index
      %622 = vector.load %arg7[%c0_269, %c0_270] : memref<2x32xf32, #tpu.memory_space<vmem>>, vector<2x32xf32>
      tpu.vector_store %arg7[%c0_269, %c0_270], %621 {strides = array<i32>} : memref<2x32xf32, #tpu.memory_space<vmem>>, vector<2x32xf32>,
      %cst_271 = arith.constant 0.000000e+00 : f32
      %623 = vector.broadcast %cst_271 : f32 to vector<2x32xf32>
      %c0_272 = arith.constant 0 : index
      %c0_273 = arith.constant 0 : index
      %624 = vector.load %arg8[%c0_272, %c0_273] : memref<2x32xf32, #tpu.memory_space<vmem>>, vector<2x32xf32>
      tpu.vector_store %arg8[%c0_272, %c0_273], %623 {strides = array<i32>} : memref<2x32xf32, #tpu.memory_space<vmem>>, vector<2x32xf32>,
      %cst_274 = arith.constant 0.000000e+00 : f32
      %625 = vector.broadcast %cst_274 : f32 to vector<2x32xf32>
      %c0_275 = arith.constant 0 : index
      %c0_276 = arith.constant 0 : index
      %626 = vector.load %arg9[%c0_275, %c0_276] : memref<2x32xf32, #tpu.memory_space<vmem>>, vector<2x32xf32>
      tpu.vector_store %arg9[%c0_275, %c0_276], %625 {strides = array<i32>} : memref<2x32xf32, #tpu.memory_space<vmem>>, vector<2x32xf32>,
      %cst_277 = arith.constant 0.000000e+00 : f32
      %627 = vector.broadcast %cst_277 : f32 to vector<2x32xf32>
      %c0_278 = arith.constant 0 : index
      %c0_279 = arith.constant 0 : index
      %628 = vector.load %arg10[%c0_278, %c0_279] : memref<2x32xf32, #tpu.memory_space<vmem>>, vector<2x32xf32>
      tpu.vector_store %arg10[%c0_278, %c0_279], %627 {strides = array<i32>} : memref<2x32xf32, #tpu.memory_space<vmem>>, vector<2x32xf32>,
    } else {
    }
    %c0 = arith.constant 0 : index
    %c0_1 = arith.constant 0 : index
    %3 = vector.load %arg3[%c0, %c0_1] : memref<32x128xf32, #tpu.memory_space<vmem>>, vector<32x128xf32>
    %c0_2 = arith.constant 0 : index
    %c0_3 = arith.constant 0 : index
    %4 = vector.load %arg4[%c0_2, %c0_3] : memref<32x128xf32, #tpu.memory_space<vmem>>, vector<32x128xf32>
    %c0_i32_4 = arith.constant 0 : i32
    %c7_i32 = arith.constant 7 : i32
    %5 = arith.subi %c7_i32, %c0_i32_4 : i32
    %6 = arith.index_cast %c0_i32_4 : i32 to index
    %c0_5 = arith.constant 0 : index
    %c0_6 = arith.constant 0 : index
    %7 = vector.load %arg1[%6, %c0_5, %c0_6] : memref<8x2x128xf32, #tpu.memory_space<vmem>>, vector<1x2x128xf32>
    %8 = vector.shape_cast %7 : vector<1x2x128xf32> to vector<2x128xf32>
    %c0_7 = arith.constant 0 : index
    %c0_8 = arith.constant 0 : index
    %9 = vector.load %arg7[%c0_7, %c0_8] : memref<2x32xf32, #tpu.memory_space<vmem>>, vector<2x32xf32>
    %cst = arith.constant dense<0.000000e+00> : vector<2x128xf32>
    %10 = tpu.matmul %9, %3, %cst {dimension_numbers = #tpu.dot_dimension_numbers<[1], [0], [0], [1], [0, 0, 1, 1], [], []>} : vector<2x32xf32>, vector<32x128xf32>, vector<2x128xf32> -> vector<2x128xf32>
    %11 = arith.addf %8, %10 : vector<2x128xf32>
    %c0_9 = arith.constant 0 : index
    %c0_10 = arith.constant 0 : index
    %12 = vector.load %arg8[%c0_9, %c0_10] : memref<2x32xf32, #tpu.memory_space<vmem>>, vector<2x32xf32>
    %13 = vector.extract_strided_slice %11 {offsets = [0, 0], sizes = [2, 32], strides = [1, 1]} : vector<2x128xf32> to vector<2x32xf32>
    %14 = arith.negf %13 : vector<2x32xf32>
    %15 = math.exp %14 : vector<2x32xf32>
    %cst_11 = arith.constant 1.000000e+00 : f32
    %16 = vector.broadcast %cst_11 : f32 to vector<2x32xf32>
    %17 = arith.addf %16, %15 : vector<2x32xf32>
    %18 = arith.divf %16, %17 : vector<2x32xf32>
    %19 = vector.extract_strided_slice %11 {offsets = [0, 32], sizes = [2, 32], strides = [1, 1]} : vector<2x128xf32> to vector<2x32xf32>
    %20 = arith.negf %19 : vector<2x32xf32>
    %21 = math.exp %20 : vector<2x32xf32>
    %cst_12 = arith.constant 1.000000e+00 : f32
    %22 = vector.broadcast %cst_12 : f32 to vector<2x32xf32>
    %23 = arith.addf %22, %21 : vector<2x32xf32>
    %24 = arith.divf %22, %23 : vector<2x32xf32>
    %25 = vector.extract_strided_slice %11 {offsets = [0, 64], sizes = [2, 32], strides = [1, 1]} : vector<2x128xf32> to vector<2x32xf32>
    %26 = math.tanh %25 : vector<2x32xf32>
    %27 = vector.extract_strided_slice %11 {offsets = [0, 96], sizes = [2, 32], strides = [1, 1]} : vector<2x128xf32> to vector<2x32xf32>
    %28 = arith.negf %27 : vector<2x32xf32>
    %29 = math.exp %28 : vector<2x32xf32>
    %cst_13 = arith.constant 1.000000e+00 : f32
    %30 = vector.broadcast %cst_13 : f32 to vector<2x32xf32>
    %31 = arith.addf %30, %29 : vector<2x32xf32>
    %32 = arith.divf %30, %31 : vector<2x32xf32>
    %33 = arith.mulf %24, %12 : vector<2x32xf32>
    %34 = arith.mulf %18, %26 : vector<2x32xf32>
    %35 = arith.addf %33, %34 : vector<2x32xf32>
    %36 = math.tanh %35 : vector<2x32xf32>
    %37 = arith.mulf %32, %36 : vector<2x32xf32>
    %c0_14 = arith.constant 0 : index
    %c0_15 = arith.constant 0 : index
    %38 = vector.load %arg7[%c0_14, %c0_15] : memref<2x32xf32, #tpu.memory_space<vmem>>, vector<2x32xf32>
    tpu.vector_store %arg7[%c0_14, %c0_15], %37 {strides = array<i32>} : memref<2x32xf32, #tpu.memory_space<vmem>>, vector<2x32xf32>,
    %c0_16 = arith.constant 0 : index
    %c0_17 = arith.constant 0 : index
    %39 = vector.load %arg8[%c0_16, %c0_17] : memref<2x32xf32, #tpu.memory_space<vmem>>, vector<2x32xf32>
    tpu.vector_store %arg8[%c0_16, %c0_17], %35 {strides = array<i32>} : memref<2x32xf32, #tpu.memory_space<vmem>>, vector<2x32xf32>,
    %40 = arith.index_cast %c0_i32_4 : i32 to index
    %c0_18 = arith.constant 0 : index
    %c0_19 = arith.constant 0 : index
    %41 = vector.load %arg5[%40, %c0_18, %c0_19] : memref<8x2x32xf32, #tpu.memory_space<vmem>>, vector<1x2x32xf32>
    %42 = vector.shape_cast %41 : vector<1x2x32xf32> to vector<2x32xf32>
    %43 = vector.shape_cast %37 : vector<2x32xf32> to vector<1x2x32xf32>
    tpu.vector_store %arg5[%40, %c0_18, %c0_19], %43 {strides = array<i32>} : memref<8x2x32xf32, #tpu.memory_space<vmem>>, vector<1x2x32xf32>,
    %44 = arith.index_cast %5 : i32 to index
    %c0_20 = arith.constant 0 : index
    %c0_21 = arith.constant 0 : index
    %45 = vector.load %arg2[%44, %c0_20, %c0_21] : memref<8x2x128xf32, #tpu.memory_space<vmem>>, vector<1x2x128xf32>
    %46 = vector.shape_cast %45 : vector<1x2x128xf32> to vector<2x128xf32>
    %c0_22 = arith.constant 0 : index
    %c0_23 = arith.constant 0 : index
    %47 = vector.load %arg9[%c0_22, %c0_23] : memref<2x32xf32, #tpu.memory_space<vmem>>, vector<2x32xf32>
    %cst_24 = arith.constant dense<0.000000e+00> : vector<2x128xf32>
    %48 = tpu.matmul %47, %4, %cst_24 {dimension_numbers = #tpu.dot_dimension_numbers<[1], [0], [0], [1], [0, 0, 1, 1], [], []>} : vector<2x32xf32>, vector<32x128xf32>, vector<2x128xf32> -> vector<2x128xf32>
    %49 = arith.addf %46, %48 : vector<2x128xf32>
    %c0_25 = arith.constant 0 : index
    %c0_26 = arith.constant 0 : index
    %50 = vector.load %arg10[%c0_25, %c0_26] : memref<2x32xf32, #tpu.memory_space<vmem>>, vector<2x32xf32>
    %51 = vector.extract_strided_slice %49 {offsets = [0, 0], sizes = [2, 32], strides = [1, 1]} : vector<2x128xf32> to vector<2x32xf32>
    %52 = arith.negf %51 : vector<2x32xf32>
    %53 = math.exp %52 : vector<2x32xf32>
    %cst_27 = arith.constant 1.000000e+00 : f32
    %54 = vector.broadcast %cst_27 : f32 to vector<2x32xf32>
    %55 = arith.addf %54, %53 : vector<2x32xf32>
    %56 = arith.divf %54, %55 : vector<2x32xf32>
    %57 = vector.extract_strided_slice %49 {offsets = [0, 32], sizes = [2, 32], strides = [1, 1]} : vector<2x128xf32> to vector<2x32xf32>
    %58 = arith.negf %57 : vector<2x32xf32>
    %59 = math.exp %58 : vector<2x32xf32>
    %cst_28 = arith.constant 1.000000e+00 : f32
    %60 = vector.broadcast %cst_28 : f32 to vector<2x32xf32>
    %61 = arith.addf %60, %59 : vector<2x32xf32>
    %62 = arith.divf %60, %61 : vector<2x32xf32>
    %63 = vector.extract_strided_slice %49 {offsets = [0, 64], sizes = [2, 32], strides = [1, 1]} : vector<2x128xf32> to vector<2x32xf32>
    %64 = math.tanh %63 : vector<2x32xf32>
    %65 = vector.extract_strided_slice %49 {offsets = [0, 96], sizes = [2, 32], strides = [1, 1]} : vector<2x128xf32> to vector<2x32xf32>
    %66 = arith.negf %65 : vector<2x32xf32>
    %67 = math.exp %66 : vector<2x32xf32>
    %cst_29 = arith.constant 1.000000e+00 : f32
    %68 = vector.broadcast %cst_29 : f32 to vector<2x32xf32>
    %69 = arith.addf %68, %67 : vector<2x32xf32>
    %70 = arith.divf %68, %69 : vector<2x32xf32>
    %71 = arith.mulf %62, %50 : vector<2x32xf32>
    %72 = arith.mulf %56, %64 : vector<2x32xf32>
    %73 = arith.addf %71, %72 : vector<2x32xf32>
    %74 = math.tanh %73 : vector<2x32xf32>
    %75 = arith.mulf %70, %74 : vector<2x32xf32>
    %c0_30 = arith.constant 0 : index
    %c0_31 = arith.constant 0 : index
    %76 = vector.load %arg9[%c0_30, %c0_31] : memref<2x32xf32, #tpu.memory_space<vmem>>, vector<2x32xf32>
    tpu.vector_store %arg9[%c0_30, %c0_31], %75 {strides = array<i32>} : memref<2x32xf32, #tpu.memory_space<vmem>>, vector<2x32xf32>,
    %c0_32 = arith.constant 0 : index
    %c0_33 = arith.constant 0 : index
    %77 = vector.load %arg10[%c0_32, %c0_33] : memref<2x32xf32, #tpu.memory_space<vmem>>, vector<2x32xf32>
    tpu.vector_store %arg10[%c0_32, %c0_33], %73 {strides = array<i32>} : memref<2x32xf32, #tpu.memory_space<vmem>>, vector<2x32xf32>,
    %78 = arith.index_cast %5 : i32 to index
    %c0_34 = arith.constant 0 : index
    %c0_35 = arith.constant 0 : index
    %79 = vector.load %arg6[%78, %c0_34, %c0_35] : memref<8x2x32xf32, #tpu.memory_space<vmem>>, vector<1x2x32xf32>
    %80 = vector.shape_cast %79 : vector<1x2x32xf32> to vector<2x32xf32>
    %81 = vector.shape_cast %75 : vector<2x32xf32> to vector<1x2x32xf32>
    tpu.vector_store %arg6[%78, %c0_34, %c0_35], %81 {strides = array<i32>} : memref<8x2x32xf32, #tpu.memory_space<vmem>>, vector<1x2x32xf32>,
    %c1_i32 = arith.constant 1 : i32
    %c7_i32_36 = arith.constant 7 : i32
    %82 = arith.subi %c7_i32_36, %c1_i32 : i32
    %83 = arith.index_cast %c1_i32 : i32 to index
    %c0_37 = arith.constant 0 : index
    %c0_38 = arith.constant 0 : index
    %84 = vector.load %arg1[%83, %c0_37, %c0_38] : memref<8x2x128xf32, #tpu.memory_space<vmem>>, vector<1x2x128xf32>
    %85 = vector.shape_cast %84 : vector<1x2x128xf32> to vector<2x128xf32>
    %c0_39 = arith.constant 0 : index
    %c0_40 = arith.constant 0 : index
    %86 = vector.load %arg7[%c0_39, %c0_40] : memref<2x32xf32, #tpu.memory_space<vmem>>, vector<2x32xf32>
    %cst_41 = arith.constant dense<0.000000e+00> : vector<2x128xf32>
    %87 = tpu.matmul %86, %3, %cst_41 {dimension_numbers = #tpu.dot_dimension_numbers<[1], [0], [0], [1], [0, 0, 1, 1], [], []>} : vector<2x32xf32>, vector<32x128xf32>, vector<2x128xf32> -> vector<2x128xf32>
    %88 = arith.addf %85, %87 : vector<2x128xf32>
    %c0_42 = arith.constant 0 : index
    %c0_43 = arith.constant 0 : index
    %89 = vector.load %arg8[%c0_42, %c0_43] : memref<2x32xf32, #tpu.memory_space<vmem>>, vector<2x32xf32>
    %90 = vector.extract_strided_slice %88 {offsets = [0, 0], sizes = [2, 32], strides = [1, 1]} : vector<2x128xf32> to vector<2x32xf32>
    %91 = arith.negf %90 : vector<2x32xf32>
    %92 = math.exp %91 : vector<2x32xf32>
    %cst_44 = arith.constant 1.000000e+00 : f32
    %93 = vector.broadcast %cst_44 : f32 to vector<2x32xf32>
    %94 = arith.addf %93, %92 : vector<2x32xf32>
    %95 = arith.divf %93, %94 : vector<2x32xf32>
    %96 = vector.extract_strided_slice %88 {offsets = [0, 32], sizes = [2, 32], strides = [1, 1]} : vector<2x128xf32> to vector<2x32xf32>
    %97 = arith.negf %96 : vector<2x32xf32>
    %98 = math.exp %97 : vector<2x32xf32>
    %cst_45 = arith.constant 1.000000e+00 : f32
    %99 = vector.broadcast %cst_45 : f32 to vector<2x32xf32>
    %100 = arith.addf %99, %98 : vector<2x32xf32>
    %101 = arith.divf %99, %100 : vector<2x32xf32>
    %102 = vector.extract_strided_slice %88 {offsets = [0, 64], sizes = [2, 32], strides = [1, 1]} : vector<2x128xf32> to vector<2x32xf32>
    %103 = math.tanh %102 : vector<2x32xf32>
    %104 = vector.extract_strided_slice %88 {offsets = [0, 96], sizes = [2, 32], strides = [1, 1]} : vector<2x128xf32> to vector<2x32xf32>
    %105 = arith.negf %104 : vector<2x32xf32>
    %106 = math.exp %105 : vector<2x32xf32>
    %cst_46 = arith.constant 1.000000e+00 : f32
    %107 = vector.broadcast %cst_46 : f32 to vector<2x32xf32>
    %108 = arith.addf %107, %106 : vector<2x32xf32>
    %109 = arith.divf %107, %108 : vector<2x32xf32>
    %110 = arith.mulf %101, %89 : vector<2x32xf32>
    %111 = arith.mulf %95, %103 : vector<2x32xf32>
    %112 = arith.addf %110, %111 : vector<2x32xf32>
    %113 = math.tanh %112 : vector<2x32xf32>
    %114 = arith.mulf %109, %113 : vector<2x32xf32>
    %c0_47 = arith.constant 0 : index
    %c0_48 = arith.constant 0 : index
    %115 = vector.load %arg7[%c0_47, %c0_48] : memref<2x32xf32, #tpu.memory_space<vmem>>, vector<2x32xf32>
    tpu.vector_store %arg7[%c0_47, %c0_48], %114 {strides = array<i32>} : memref<2x32xf32, #tpu.memory_space<vmem>>, vector<2x32xf32>,
    %c0_49 = arith.constant 0 : index
    %c0_50 = arith.constant 0 : index
    %116 = vector.load %arg8[%c0_49, %c0_50] : memref<2x32xf32, #tpu.memory_space<vmem>>, vector<2x32xf32>
    tpu.vector_store %arg8[%c0_49, %c0_50], %112 {strides = array<i32>} : memref<2x32xf32, #tpu.memory_space<vmem>>, vector<2x32xf32>,
    %117 = arith.index_cast %c1_i32 : i32 to index
    %c0_51 = arith.constant 0 : index
    %c0_52 = arith.constant 0 : index
    %118 = vector.load %arg5[%117, %c0_51, %c0_52] : memref<8x2x32xf32, #tpu.memory_space<vmem>>, vector<1x2x32xf32>
    %119 = vector.shape_cast %118 : vector<1x2x32xf32> to vector<2x32xf32>
    %120 = vector.shape_cast %114 : vector<2x32xf32> to vector<1x2x32xf32>
    tpu.vector_store %arg5[%117, %c0_51, %c0_52], %120 {strides = array<i32>} : memref<8x2x32xf32, #tpu.memory_space<vmem>>, vector<1x2x32xf32>,
    %121 = arith.index_cast %82 : i32 to index
    %c0_53 = arith.constant 0 : index
    %c0_54 = arith.constant 0 : index
    %122 = vector.load %arg2[%121, %c0_53, %c0_54] : memref<8x2x128xf32, #tpu.memory_space<vmem>>, vector<1x2x128xf32>
    %123 = vector.shape_cast %122 : vector<1x2x128xf32> to vector<2x128xf32>
    %c0_55 = arith.constant 0 : index
    %c0_56 = arith.constant 0 : index
    %124 = vector.load %arg9[%c0_55, %c0_56] : memref<2x32xf32, #tpu.memory_space<vmem>>, vector<2x32xf32>
    %cst_57 = arith.constant dense<0.000000e+00> : vector<2x128xf32>
    %125 = tpu.matmul %124, %4, %cst_57 {dimension_numbers = #tpu.dot_dimension_numbers<[1], [0], [0], [1], [0, 0, 1, 1], [], []>} : vector<2x32xf32>, vector<32x128xf32>, vector<2x128xf32> -> vector<2x128xf32>
    %126 = arith.addf %123, %125 : vector<2x128xf32>
    %c0_58 = arith.constant 0 : index
    %c0_59 = arith.constant 0 : index
    %127 = vector.load %arg10[%c0_58, %c0_59] : memref<2x32xf32, #tpu.memory_space<vmem>>, vector<2x32xf32>
    %128 = vector.extract_strided_slice %126 {offsets = [0, 0], sizes = [2, 32], strides = [1, 1]} : vector<2x128xf32> to vector<2x32xf32>
    %129 = arith.negf %128 : vector<2x32xf32>
    %130 = math.exp %129 : vector<2x32xf32>
    %cst_60 = arith.constant 1.000000e+00 : f32
    %131 = vector.broadcast %cst_60 : f32 to vector<2x32xf32>
    %132 = arith.addf %131, %130 : vector<2x32xf32>
    %133 = arith.divf %131, %132 : vector<2x32xf32>
    %134 = vector.extract_strided_slice %126 {offsets = [0, 32], sizes = [2, 32], strides = [1, 1]} : vector<2x128xf32> to vector<2x32xf32>
    %135 = arith.negf %134 : vector<2x32xf32>
    %136 = math.exp %135 : vector<2x32xf32>
    %cst_61 = arith.constant 1.000000e+00 : f32
    %137 = vector.broadcast %cst_61 : f32 to vector<2x32xf32>
    %138 = arith.addf %137, %136 : vector<2x32xf32>
    %139 = arith.divf %137, %138 : vector<2x32xf32>
    %140 = vector.extract_strided_slice %126 {offsets = [0, 64], sizes = [2, 32], strides = [1, 1]} : vector<2x128xf32> to vector<2x32xf32>
    %141 = math.tanh %140 : vector<2x32xf32>
    %142 = vector.extract_strided_slice %126 {offsets = [0, 96], sizes = [2, 32], strides = [1, 1]} : vector<2x128xf32> to vector<2x32xf32>
    %143 = arith.negf %142 : vector<2x32xf32>
    %144 = math.exp %143 : vector<2x32xf32>
    %cst_62 = arith.constant 1.000000e+00 : f32
    %145 = vector.broadcast %cst_62 : f32 to vector<2x32xf32>
    %146 = arith.addf %145, %144 : vector<2x32xf32>
    %147 = arith.divf %145, %146 : vector<2x32xf32>
    %148 = arith.mulf %139, %127 : vector<2x32xf32>
    %149 = arith.mulf %133, %141 : vector<2x32xf32>
    %150 = arith.addf %148, %149 : vector<2x32xf32>
    %151 = math.tanh %150 : vector<2x32xf32>
    %152 = arith.mulf %147, %151 : vector<2x32xf32>
    %c0_63 = arith.constant 0 : index
    %c0_64 = arith.constant 0 : index
    %153 = vector.load %arg9[%c0_63, %c0_64] : memref<2x32xf32, #tpu.memory_space<vmem>>, vector<2x32xf32>
    tpu.vector_store %arg9[%c0_63, %c0_64], %152 {strides = array<i32>} : memref<2x32xf32, #tpu.memory_space<vmem>>, vector<2x32xf32>,
    %c0_65 = arith.constant 0 : index
    %c0_66 = arith.constant 0 : index
    %154 = vector.load %arg10[%c0_65, %c0_66] : memref<2x32xf32, #tpu.memory_space<vmem>>, vector<2x32xf32>
    tpu.vector_store %arg10[%c0_65, %c0_66], %150 {strides = array<i32>} : memref<2x32xf32, #tpu.memory_space<vmem>>, vector<2x32xf32>,
    %155 = arith.index_cast %82 : i32 to index
    %c0_67 = arith.constant 0 : index
    %c0_68 = arith.constant 0 : index
    %156 = vector.load %arg6[%155, %c0_67, %c0_68] : memref<8x2x32xf32, #tpu.memory_space<vmem>>, vector<1x2x32xf32>
    %157 = vector.shape_cast %156 : vector<1x2x32xf32> to vector<2x32xf32>
    %158 = vector.shape_cast %152 : vector<2x32xf32> to vector<1x2x32xf32>
    tpu.vector_store %arg6[%155, %c0_67, %c0_68], %158 {strides = array<i32>} : memref<8x2x32xf32, #tpu.memory_space<vmem>>, vector<1x2x32xf32>,
    %c2_i32 = arith.constant 2 : i32
    %c7_i32_69 = arith.constant 7 : i32
    %159 = arith.subi %c7_i32_69, %c2_i32 : i32
    %160 = arith.index_cast %c2_i32 : i32 to index
    %c0_70 = arith.constant 0 : index
    %c0_71 = arith.constant 0 : index
    %161 = vector.load %arg1[%160, %c0_70, %c0_71] : memref<8x2x128xf32, #tpu.memory_space<vmem>>, vector<1x2x128xf32>
    %162 = vector.shape_cast %161 : vector<1x2x128xf32> to vector<2x128xf32>
    %c0_72 = arith.constant 0 : index
    %c0_73 = arith.constant 0 : index
    %163 = vector.load %arg7[%c0_72, %c0_73] : memref<2x32xf32, #tpu.memory_space<vmem>>, vector<2x32xf32>
    %cst_74 = arith.constant dense<0.000000e+00> : vector<2x128xf32>
    %164 = tpu.matmul %163, %3, %cst_74 {dimension_numbers = #tpu.dot_dimension_numbers<[1], [0], [0], [1], [0, 0, 1, 1], [], []>} : vector<2x32xf32>, vector<32x128xf32>, vector<2x128xf32> -> vector<2x128xf32>
    %165 = arith.addf %162, %164 : vector<2x128xf32>
    %c0_75 = arith.constant 0 : index
    %c0_76 = arith.constant 0 : index
    %166 = vector.load %arg8[%c0_75, %c0_76] : memref<2x32xf32, #tpu.memory_space<vmem>>, vector<2x32xf32>
    %167 = vector.extract_strided_slice %165 {offsets = [0, 0], sizes = [2, 32], strides = [1, 1]} : vector<2x128xf32> to vector<2x32xf32>
    %168 = arith.negf %167 : vector<2x32xf32>
    %169 = math.exp %168 : vector<2x32xf32>
    %cst_77 = arith.constant 1.000000e+00 : f32
    %170 = vector.broadcast %cst_77 : f32 to vector<2x32xf32>
    %171 = arith.addf %170, %169 : vector<2x32xf32>
    %172 = arith.divf %170, %171 : vector<2x32xf32>
    %173 = vector.extract_strided_slice %165 {offsets = [0, 32], sizes = [2, 32], strides = [1, 1]} : vector<2x128xf32> to vector<2x32xf32>
    %174 = arith.negf %173 : vector<2x32xf32>
    %175 = math.exp %174 : vector<2x32xf32>
    %cst_78 = arith.constant 1.000000e+00 : f32
    %176 = vector.broadcast %cst_78 : f32 to vector<2x32xf32>
    %177 = arith.addf %176, %175 : vector<2x32xf32>
    %178 = arith.divf %176, %177 : vector<2x32xf32>
    %179 = vector.extract_strided_slice %165 {offsets = [0, 64], sizes = [2, 32], strides = [1, 1]} : vector<2x128xf32> to vector<2x32xf32>
    %180 = math.tanh %179 : vector<2x32xf32>
    %181 = vector.extract_strided_slice %165 {offsets = [0, 96], sizes = [2, 32], strides = [1, 1]} : vector<2x128xf32> to vector<2x32xf32>
    %182 = arith.negf %181 : vector<2x32xf32>
    %183 = math.exp %182 : vector<2x32xf32>
    %cst_79 = arith.constant 1.000000e+00 : f32
    %184 = vector.broadcast %cst_79 : f32 to vector<2x32xf32>
    %185 = arith.addf %184, %183 : vector<2x32xf32>
    %186 = arith.divf %184, %185 : vector<2x32xf32>
    %187 = arith.mulf %178, %166 : vector<2x32xf32>
    %188 = arith.mulf %172, %180 : vector<2x32xf32>
    %189 = arith.addf %187, %188 : vector<2x32xf32>
    %190 = math.tanh %189 : vector<2x32xf32>
    %191 = arith.mulf %186, %190 : vector<2x32xf32>
    %c0_80 = arith.constant 0 : index
    %c0_81 = arith.constant 0 : index
    %192 = vector.load %arg7[%c0_80, %c0_81] : memref<2x32xf32, #tpu.memory_space<vmem>>, vector<2x32xf32>
    tpu.vector_store %arg7[%c0_80, %c0_81], %191 {strides = array<i32>} : memref<2x32xf32, #tpu.memory_space<vmem>>, vector<2x32xf32>,
    %c0_82 = arith.constant 0 : index
    %c0_83 = arith.constant 0 : index
    %193 = vector.load %arg8[%c0_82, %c0_83] : memref<2x32xf32, #tpu.memory_space<vmem>>, vector<2x32xf32>
    tpu.vector_store %arg8[%c0_82, %c0_83], %189 {strides = array<i32>} : memref<2x32xf32, #tpu.memory_space<vmem>>, vector<2x32xf32>,
    %194 = arith.index_cast %c2_i32 : i32 to index
    %c0_84 = arith.constant 0 : index
    %c0_85 = arith.constant 0 : index
    %195 = vector.load %arg5[%194, %c0_84, %c0_85] : memref<8x2x32xf32, #tpu.memory_space<vmem>>, vector<1x2x32xf32>
    %196 = vector.shape_cast %195 : vector<1x2x32xf32> to vector<2x32xf32>
    %197 = vector.shape_cast %191 : vector<2x32xf32> to vector<1x2x32xf32>
    tpu.vector_store %arg5[%194, %c0_84, %c0_85], %197 {strides = array<i32>} : memref<8x2x32xf32, #tpu.memory_space<vmem>>, vector<1x2x32xf32>,
    %198 = arith.index_cast %159 : i32 to index
    %c0_86 = arith.constant 0 : index
    %c0_87 = arith.constant 0 : index
    %199 = vector.load %arg2[%198, %c0_86, %c0_87] : memref<8x2x128xf32, #tpu.memory_space<vmem>>, vector<1x2x128xf32>
    %200 = vector.shape_cast %199 : vector<1x2x128xf32> to vector<2x128xf32>
    %c0_88 = arith.constant 0 : index
    %c0_89 = arith.constant 0 : index
    %201 = vector.load %arg9[%c0_88, %c0_89] : memref<2x32xf32, #tpu.memory_space<vmem>>, vector<2x32xf32>
    %cst_90 = arith.constant dense<0.000000e+00> : vector<2x128xf32>
    %202 = tpu.matmul %201, %4, %cst_90 {dimension_numbers = #tpu.dot_dimension_numbers<[1], [0], [0], [1], [0, 0, 1, 1], [], []>} : vector<2x32xf32>, vector<32x128xf32>, vector<2x128xf32> -> vector<2x128xf32>
    %203 = arith.addf %200, %202 : vector<2x128xf32>
    %c0_91 = arith.constant 0 : index
    %c0_92 = arith.constant 0 : index
    %204 = vector.load %arg10[%c0_91, %c0_92] : memref<2x32xf32, #tpu.memory_space<vmem>>, vector<2x32xf32>
    %205 = vector.extract_strided_slice %203 {offsets = [0, 0], sizes = [2, 32], strides = [1, 1]} : vector<2x128xf32> to vector<2x32xf32>
    %206 = arith.negf %205 : vector<2x32xf32>
    %207 = math.exp %206 : vector<2x32xf32>
    %cst_93 = arith.constant 1.000000e+00 : f32
    %208 = vector.broadcast %cst_93 : f32 to vector<2x32xf32>
    %209 = arith.addf %208, %207 : vector<2x32xf32>
    %210 = arith.divf %208, %209 : vector<2x32xf32>
    %211 = vector.extract_strided_slice %203 {offsets = [0, 32], sizes = [2, 32], strides = [1, 1]} : vector<2x128xf32> to vector<2x32xf32>
    %212 = arith.negf %211 : vector<2x32xf32>
    %213 = math.exp %212 : vector<2x32xf32>
    %cst_94 = arith.constant 1.000000e+00 : f32
    %214 = vector.broadcast %cst_94 : f32 to vector<2x32xf32>
    %215 = arith.addf %214, %213 : vector<2x32xf32>
    %216 = arith.divf %214, %215 : vector<2x32xf32>
    %217 = vector.extract_strided_slice %203 {offsets = [0, 64], sizes = [2, 32], strides = [1, 1]} : vector<2x128xf32> to vector<2x32xf32>
    %218 = math.tanh %217 : vector<2x32xf32>
    %219 = vector.extract_strided_slice %203 {offsets = [0, 96], sizes = [2, 32], strides = [1, 1]} : vector<2x128xf32> to vector<2x32xf32>
    %220 = arith.negf %219 : vector<2x32xf32>
    %221 = math.exp %220 : vector<2x32xf32>
    %cst_95 = arith.constant 1.000000e+00 : f32
    %222 = vector.broadcast %cst_95 : f32 to vector<2x32xf32>
    %223 = arith.addf %222, %221 : vector<2x32xf32>
    %224 = arith.divf %222, %223 : vector<2x32xf32>
    %225 = arith.mulf %216, %204 : vector<2x32xf32>
    %226 = arith.mulf %210, %218 : vector<2x32xf32>
    %227 = arith.addf %225, %226 : vector<2x32xf32>
    %228 = math.tanh %227 : vector<2x32xf32>
    %229 = arith.mulf %224, %228 : vector<2x32xf32>
    %c0_96 = arith.constant 0 : index
    %c0_97 = arith.constant 0 : index
    %230 = vector.load %arg9[%c0_96, %c0_97] : memref<2x32xf32, #tpu.memory_space<vmem>>, vector<2x32xf32>
    tpu.vector_store %arg9[%c0_96, %c0_97], %229 {strides = array<i32>} : memref<2x32xf32, #tpu.memory_space<vmem>>, vector<2x32xf32>,
    %c0_98 = arith.constant 0 : index
    %c0_99 = arith.constant 0 : index
    %231 = vector.load %arg10[%c0_98, %c0_99] : memref<2x32xf32, #tpu.memory_space<vmem>>, vector<2x32xf32>
    tpu.vector_store %arg10[%c0_98, %c0_99], %227 {strides = array<i32>} : memref<2x32xf32, #tpu.memory_space<vmem>>, vector<2x32xf32>,
    %232 = arith.index_cast %159 : i32 to index
    %c0_100 = arith.constant 0 : index
    %c0_101 = arith.constant 0 : index
    %233 = vector.load %arg6[%232, %c0_100, %c0_101] : memref<8x2x32xf32, #tpu.memory_space<vmem>>, vector<1x2x32xf32>
    %234 = vector.shape_cast %233 : vector<1x2x32xf32> to vector<2x32xf32>
    %235 = vector.shape_cast %229 : vector<2x32xf32> to vector<1x2x32xf32>
    tpu.vector_store %arg6[%232, %c0_100, %c0_101], %235 {strides = array<i32>} : memref<8x2x32xf32, #tpu.memory_space<vmem>>, vector<1x2x32xf32>,
    %c3_i32 = arith.constant 3 : i32
    %c7_i32_102 = arith.constant 7 : i32
    %236 = arith.subi %c7_i32_102, %c3_i32 : i32
    %237 = arith.index_cast %c3_i32 : i32 to index
    %c0_103 = arith.constant 0 : index
    %c0_104 = arith.constant 0 : index
    %238 = vector.load %arg1[%237, %c0_103, %c0_104] : memref<8x2x128xf32, #tpu.memory_space<vmem>>, vector<1x2x128xf32>
    %239 = vector.shape_cast %238 : vector<1x2x128xf32> to vector<2x128xf32>
    %c0_105 = arith.constant 0 : index
    %c0_106 = arith.constant 0 : index
    %240 = vector.load %arg7[%c0_105, %c0_106] : memref<2x32xf32, #tpu.memory_space<vmem>>, vector<2x32xf32>
    %cst_107 = arith.constant dense<0.000000e+00> : vector<2x128xf32>
    %241 = tpu.matmul %240, %3, %cst_107 {dimension_numbers = #tpu.dot_dimension_numbers<[1], [0], [0], [1], [0, 0, 1, 1], [], []>} : vector<2x32xf32>, vector<32x128xf32>, vector<2x128xf32> -> vector<2x128xf32>
    %242 = arith.addf %239, %241 : vector<2x128xf32>
    %c0_108 = arith.constant 0 : index
    %c0_109 = arith.constant 0 : index
    %243 = vector.load %arg8[%c0_108, %c0_109] : memref<2x32xf32, #tpu.memory_space<vmem>>, vector<2x32xf32>
    %244 = vector.extract_strided_slice %242 {offsets = [0, 0], sizes = [2, 32], strides = [1, 1]} : vector<2x128xf32> to vector<2x32xf32>
    %245 = arith.negf %244 : vector<2x32xf32>
    %246 = math.exp %245 : vector<2x32xf32>
    %cst_110 = arith.constant 1.000000e+00 : f32
    %247 = vector.broadcast %cst_110 : f32 to vector<2x32xf32>
    %248 = arith.addf %247, %246 : vector<2x32xf32>
    %249 = arith.divf %247, %248 : vector<2x32xf32>
    %250 = vector.extract_strided_slice %242 {offsets = [0, 32], sizes = [2, 32], strides = [1, 1]} : vector<2x128xf32> to vector<2x32xf32>
    %251 = arith.negf %250 : vector<2x32xf32>
    %252 = math.exp %251 : vector<2x32xf32>
    %cst_111 = arith.constant 1.000000e+00 : f32
    %253 = vector.broadcast %cst_111 : f32 to vector<2x32xf32>
    %254 = arith.addf %253, %252 : vector<2x32xf32>
    %255 = arith.divf %253, %254 : vector<2x32xf32>
    %256 = vector.extract_strided_slice %242 {offsets = [0, 64], sizes = [2, 32], strides = [1, 1]} : vector<2x128xf32> to vector<2x32xf32>
    %257 = math.tanh %256 : vector<2x32xf32>
    %258 = vector.extract_strided_slice %242 {offsets = [0, 96], sizes = [2, 32], strides = [1, 1]} : vector<2x128xf32> to vector<2x32xf32>
    %259 = arith.negf %258 : vector<2x32xf32>
    %260 = math.exp %259 : vector<2x32xf32>
    %cst_112 = arith.constant 1.000000e+00 : f32
    %261 = vector.broadcast %cst_112 : f32 to vector<2x32xf32>
    %262 = arith.addf %261, %260 : vector<2x32xf32>
    %263 = arith.divf %261, %262 : vector<2x32xf32>
    %264 = arith.mulf %255, %243 : vector<2x32xf32>
    %265 = arith.mulf %249, %257 : vector<2x32xf32>
    %266 = arith.addf %264, %265 : vector<2x32xf32>
    %267 = math.tanh %266 : vector<2x32xf32>
    %268 = arith.mulf %263, %267 : vector<2x32xf32>
    %c0_113 = arith.constant 0 : index
    %c0_114 = arith.constant 0 : index
    %269 = vector.load %arg7[%c0_113, %c0_114] : memref<2x32xf32, #tpu.memory_space<vmem>>, vector<2x32xf32>
    tpu.vector_store %arg7[%c0_113, %c0_114], %268 {strides = array<i32>} : memref<2x32xf32, #tpu.memory_space<vmem>>, vector<2x32xf32>,
    %c0_115 = arith.constant 0 : index
    %c0_116 = arith.constant 0 : index
    %270 = vector.load %arg8[%c0_115, %c0_116] : memref<2x32xf32, #tpu.memory_space<vmem>>, vector<2x32xf32>
    tpu.vector_store %arg8[%c0_115, %c0_116], %266 {strides = array<i32>} : memref<2x32xf32, #tpu.memory_space<vmem>>, vector<2x32xf32>,
    %271 = arith.index_cast %c3_i32 : i32 to index
    %c0_117 = arith.constant 0 : index
    %c0_118 = arith.constant 0 : index
    %272 = vector.load %arg5[%271, %c0_117, %c0_118] : memref<8x2x32xf32, #tpu.memory_space<vmem>>, vector<1x2x32xf32>
    %273 = vector.shape_cast %272 : vector<1x2x32xf32> to vector<2x32xf32>
    %274 = vector.shape_cast %268 : vector<2x32xf32> to vector<1x2x32xf32>
    tpu.vector_store %arg5[%271, %c0_117, %c0_118], %274 {strides = array<i32>} : memref<8x2x32xf32, #tpu.memory_space<vmem>>, vector<1x2x32xf32>,
    %275 = arith.index_cast %236 : i32 to index
    %c0_119 = arith.constant 0 : index
    %c0_120 = arith.constant 0 : index
    %276 = vector.load %arg2[%275, %c0_119, %c0_120] : memref<8x2x128xf32, #tpu.memory_space<vmem>>, vector<1x2x128xf32>
    %277 = vector.shape_cast %276 : vector<1x2x128xf32> to vector<2x128xf32>
    %c0_121 = arith.constant 0 : index
    %c0_122 = arith.constant 0 : index
    %278 = vector.load %arg9[%c0_121, %c0_122] : memref<2x32xf32, #tpu.memory_space<vmem>>, vector<2x32xf32>
    %cst_123 = arith.constant dense<0.000000e+00> : vector<2x128xf32>
    %279 = tpu.matmul %278, %4, %cst_123 {dimension_numbers = #tpu.dot_dimension_numbers<[1], [0], [0], [1], [0, 0, 1, 1], [], []>} : vector<2x32xf32>, vector<32x128xf32>, vector<2x128xf32> -> vector<2x128xf32>
    %280 = arith.addf %277, %279 : vector<2x128xf32>
    %c0_124 = arith.constant 0 : index
    %c0_125 = arith.constant 0 : index
    %281 = vector.load %arg10[%c0_124, %c0_125] : memref<2x32xf32, #tpu.memory_space<vmem>>, vector<2x32xf32>
    %282 = vector.extract_strided_slice %280 {offsets = [0, 0], sizes = [2, 32], strides = [1, 1]} : vector<2x128xf32> to vector<2x32xf32>
    %283 = arith.negf %282 : vector<2x32xf32>
    %284 = math.exp %283 : vector<2x32xf32>
    %cst_126 = arith.constant 1.000000e+00 : f32
    %285 = vector.broadcast %cst_126 : f32 to vector<2x32xf32>
    %286 = arith.addf %285, %284 : vector<2x32xf32>
    %287 = arith.divf %285, %286 : vector<2x32xf32>
    %288 = vector.extract_strided_slice %280 {offsets = [0, 32], sizes = [2, 32], strides = [1, 1]} : vector<2x128xf32> to vector<2x32xf32>
    %289 = arith.negf %288 : vector<2x32xf32>
    %290 = math.exp %289 : vector<2x32xf32>
    %cst_127 = arith.constant 1.000000e+00 : f32
    %291 = vector.broadcast %cst_127 : f32 to vector<2x32xf32>
    %292 = arith.addf %291, %290 : vector<2x32xf32>
    %293 = arith.divf %291, %292 : vector<2x32xf32>
    %294 = vector.extract_strided_slice %280 {offsets = [0, 64], sizes = [2, 32], strides = [1, 1]} : vector<2x128xf32> to vector<2x32xf32>
    %295 = math.tanh %294 : vector<2x32xf32>
    %296 = vector.extract_strided_slice %280 {offsets = [0, 96], sizes = [2, 32], strides = [1, 1]} : vector<2x128xf32> to vector<2x32xf32>
    %297 = arith.negf %296 : vector<2x32xf32>
    %298 = math.exp %297 : vector<2x32xf32>
    %cst_128 = arith.constant 1.000000e+00 : f32
    %299 = vector.broadcast %cst_128 : f32 to vector<2x32xf32>
    %300 = arith.addf %299, %298 : vector<2x32xf32>
    %301 = arith.divf %299, %300 : vector<2x32xf32>
    %302 = arith.mulf %293, %281 : vector<2x32xf32>
    %303 = arith.mulf %287, %295 : vector<2x32xf32>
    %304 = arith.addf %302, %303 : vector<2x32xf32>
    %305 = math.tanh %304 : vector<2x32xf32>
    %306 = arith.mulf %301, %305 : vector<2x32xf32>
    %c0_129 = arith.constant 0 : index
    %c0_130 = arith.constant 0 : index
    %307 = vector.load %arg9[%c0_129, %c0_130] : memref<2x32xf32, #tpu.memory_space<vmem>>, vector<2x32xf32>
    tpu.vector_store %arg9[%c0_129, %c0_130], %306 {strides = array<i32>} : memref<2x32xf32, #tpu.memory_space<vmem>>, vector<2x32xf32>,
    %c0_131 = arith.constant 0 : index
    %c0_132 = arith.constant 0 : index
    %308 = vector.load %arg10[%c0_131, %c0_132] : memref<2x32xf32, #tpu.memory_space<vmem>>, vector<2x32xf32>
    tpu.vector_store %arg10[%c0_131, %c0_132], %304 {strides = array<i32>} : memref<2x32xf32, #tpu.memory_space<vmem>>, vector<2x32xf32>,
    %309 = arith.index_cast %236 : i32 to index
    %c0_133 = arith.constant 0 : index
    %c0_134 = arith.constant 0 : index
    %310 = vector.load %arg6[%309, %c0_133, %c0_134] : memref<8x2x32xf32, #tpu.memory_space<vmem>>, vector<1x2x32xf32>
    %311 = vector.shape_cast %310 : vector<1x2x32xf32> to vector<2x32xf32>
    %312 = vector.shape_cast %306 : vector<2x32xf32> to vector<1x2x32xf32>
    tpu.vector_store %arg6[%309, %c0_133, %c0_134], %312 {strides = array<i32>} : memref<8x2x32xf32, #tpu.memory_space<vmem>>, vector<1x2x32xf32>,
    %c4_i32 = arith.constant 4 : i32
    %c7_i32_135 = arith.constant 7 : i32
    %313 = arith.subi %c7_i32_135, %c4_i32 : i32
    %314 = arith.index_cast %c4_i32 : i32 to index
    %c0_136 = arith.constant 0 : index
    %c0_137 = arith.constant 0 : index
    %315 = vector.load %arg1[%314, %c0_136, %c0_137] : memref<8x2x128xf32, #tpu.memory_space<vmem>>, vector<1x2x128xf32>
    %316 = vector.shape_cast %315 : vector<1x2x128xf32> to vector<2x128xf32>
    %c0_138 = arith.constant 0 : index
    %c0_139 = arith.constant 0 : index
    %317 = vector.load %arg7[%c0_138, %c0_139] : memref<2x32xf32, #tpu.memory_space<vmem>>, vector<2x32xf32>
    %cst_140 = arith.constant dense<0.000000e+00> : vector<2x128xf32>
    %318 = tpu.matmul %317, %3, %cst_140 {dimension_numbers = #tpu.dot_dimension_numbers<[1], [0], [0], [1], [0, 0, 1, 1], [], []>} : vector<2x32xf32>, vector<32x128xf32>, vector<2x128xf32> -> vector<2x128xf32>
    %319 = arith.addf %316, %318 : vector<2x128xf32>
    %c0_141 = arith.constant 0 : index
    %c0_142 = arith.constant 0 : index
    %320 = vector.load %arg8[%c0_141, %c0_142] : memref<2x32xf32, #tpu.memory_space<vmem>>, vector<2x32xf32>
    %321 = vector.extract_strided_slice %319 {offsets = [0, 0], sizes = [2, 32], strides = [1, 1]} : vector<2x128xf32> to vector<2x32xf32>
    %322 = arith.negf %321 : vector<2x32xf32>
    %323 = math.exp %322 : vector<2x32xf32>
    %cst_143 = arith.constant 1.000000e+00 : f32
    %324 = vector.broadcast %cst_143 : f32 to vector<2x32xf32>
    %325 = arith.addf %324, %323 : vector<2x32xf32>
    %326 = arith.divf %324, %325 : vector<2x32xf32>
    %327 = vector.extract_strided_slice %319 {offsets = [0, 32], sizes = [2, 32], strides = [1, 1]} : vector<2x128xf32> to vector<2x32xf32>
    %328 = arith.negf %327 : vector<2x32xf32>
    %329 = math.exp %328 : vector<2x32xf32>
    %cst_144 = arith.constant 1.000000e+00 : f32
    %330 = vector.broadcast %cst_144 : f32 to vector<2x32xf32>
    %331 = arith.addf %330, %329 : vector<2x32xf32>
    %332 = arith.divf %330, %331 : vector<2x32xf32>
    %333 = vector.extract_strided_slice %319 {offsets = [0, 64], sizes = [2, 32], strides = [1, 1]} : vector<2x128xf32> to vector<2x32xf32>
    %334 = math.tanh %333 : vector<2x32xf32>
    %335 = vector.extract_strided_slice %319 {offsets = [0, 96], sizes = [2, 32], strides = [1, 1]} : vector<2x128xf32> to vector<2x32xf32>
    %336 = arith.negf %335 : vector<2x32xf32>
    %337 = math.exp %336 : vector<2x32xf32>
    %cst_145 = arith.constant 1.000000e+00 : f32
    %338 = vector.broadcast %cst_145 : f32 to vector<2x32xf32>
    %339 = arith.addf %338, %337 : vector<2x32xf32>
    %340 = arith.divf %338, %339 : vector<2x32xf32>
    %341 = arith.mulf %332, %320 : vector<2x32xf32>
    %342 = arith.mulf %326, %334 : vector<2x32xf32>
    %343 = arith.addf %341, %342 : vector<2x32xf32>
    %344 = math.tanh %343 : vector<2x32xf32>
    %345 = arith.mulf %340, %344 : vector<2x32xf32>
    %c0_146 = arith.constant 0 : index
    %c0_147 = arith.constant 0 : index
    %346 = vector.load %arg7[%c0_146, %c0_147] : memref<2x32xf32, #tpu.memory_space<vmem>>, vector<2x32xf32>
    tpu.vector_store %arg7[%c0_146, %c0_147], %345 {strides = array<i32>} : memref<2x32xf32, #tpu.memory_space<vmem>>, vector<2x32xf32>,
    %c0_148 = arith.constant 0 : index
    %c0_149 = arith.constant 0 : index
    %347 = vector.load %arg8[%c0_148, %c0_149] : memref<2x32xf32, #tpu.memory_space<vmem>>, vector<2x32xf32>
    tpu.vector_store %arg8[%c0_148, %c0_149], %343 {strides = array<i32>} : memref<2x32xf32, #tpu.memory_space<vmem>>, vector<2x32xf32>,
    %348 = arith.index_cast %c4_i32 : i32 to index
    %c0_150 = arith.constant 0 : index
    %c0_151 = arith.constant 0 : index
    %349 = vector.load %arg5[%348, %c0_150, %c0_151] : memref<8x2x32xf32, #tpu.memory_space<vmem>>, vector<1x2x32xf32>
    %350 = vector.shape_cast %349 : vector<1x2x32xf32> to vector<2x32xf32>
    %351 = vector.shape_cast %345 : vector<2x32xf32> to vector<1x2x32xf32>
    tpu.vector_store %arg5[%348, %c0_150, %c0_151], %351 {strides = array<i32>} : memref<8x2x32xf32, #tpu.memory_space<vmem>>, vector<1x2x32xf32>,
    %352 = arith.index_cast %313 : i32 to index
    %c0_152 = arith.constant 0 : index
    %c0_153 = arith.constant 0 : index
    %353 = vector.load %arg2[%352, %c0_152, %c0_153] : memref<8x2x128xf32, #tpu.memory_space<vmem>>, vector<1x2x128xf32>
    %354 = vector.shape_cast %353 : vector<1x2x128xf32> to vector<2x128xf32>
    %c0_154 = arith.constant 0 : index
    %c0_155 = arith.constant 0 : index
    %355 = vector.load %arg9[%c0_154, %c0_155] : memref<2x32xf32, #tpu.memory_space<vmem>>, vector<2x32xf32>
    %cst_156 = arith.constant dense<0.000000e+00> : vector<2x128xf32>
    %356 = tpu.matmul %355, %4, %cst_156 {dimension_numbers = #tpu.dot_dimension_numbers<[1], [0], [0], [1], [0, 0, 1, 1], [], []>} : vector<2x32xf32>, vector<32x128xf32>, vector<2x128xf32> -> vector<2x128xf32>
    %357 = arith.addf %354, %356 : vector<2x128xf32>
    %c0_157 = arith.constant 0 : index
    %c0_158 = arith.constant 0 : index
    %358 = vector.load %arg10[%c0_157, %c0_158] : memref<2x32xf32, #tpu.memory_space<vmem>>, vector<2x32xf32>
    %359 = vector.extract_strided_slice %357 {offsets = [0, 0], sizes = [2, 32], strides = [1, 1]} : vector<2x128xf32> to vector<2x32xf32>
    %360 = arith.negf %359 : vector<2x32xf32>
    %361 = math.exp %360 : vector<2x32xf32>
    %cst_159 = arith.constant 1.000000e+00 : f32
    %362 = vector.broadcast %cst_159 : f32 to vector<2x32xf32>
    %363 = arith.addf %362, %361 : vector<2x32xf32>
    %364 = arith.divf %362, %363 : vector<2x32xf32>
    %365 = vector.extract_strided_slice %357 {offsets = [0, 32], sizes = [2, 32], strides = [1, 1]} : vector<2x128xf32> to vector<2x32xf32>
    %366 = arith.negf %365 : vector<2x32xf32>
    %367 = math.exp %366 : vector<2x32xf32>
    %cst_160 = arith.constant 1.000000e+00 : f32
    %368 = vector.broadcast %cst_160 : f32 to vector<2x32xf32>
    %369 = arith.addf %368, %367 : vector<2x32xf32>
    %370 = arith.divf %368, %369 : vector<2x32xf32>
    %371 = vector.extract_strided_slice %357 {offsets = [0, 64], sizes = [2, 32], strides = [1, 1]} : vector<2x128xf32> to vector<2x32xf32>
    %372 = math.tanh %371 : vector<2x32xf32>
    %373 = vector.extract_strided_slice %357 {offsets = [0, 96], sizes = [2, 32], strides = [1, 1]} : vector<2x128xf32> to vector<2x32xf32>
    %374 = arith.negf %373 : vector<2x32xf32>
    %375 = math.exp %374 : vector<2x32xf32>
    %cst_161 = arith.constant 1.000000e+00 : f32
    %376 = vector.broadcast %cst_161 : f32 to vector<2x32xf32>
    %377 = arith.addf %376, %375 : vector<2x32xf32>
    %378 = arith.divf %376, %377 : vector<2x32xf32>
    %379 = arith.mulf %370, %358 : vector<2x32xf32>
    %380 = arith.mulf %364, %372 : vector<2x32xf32>
    %381 = arith.addf %379, %380 : vector<2x32xf32>
    %382 = math.tanh %381 : vector<2x32xf32>
    %383 = arith.mulf %378, %382 : vector<2x32xf32>
    %c0_162 = arith.constant 0 : index
    %c0_163 = arith.constant 0 : index
    %384 = vector.load %arg9[%c0_162, %c0_163] : memref<2x32xf32, #tpu.memory_space<vmem>>, vector<2x32xf32>
    tpu.vector_store %arg9[%c0_162, %c0_163], %383 {strides = array<i32>} : memref<2x32xf32, #tpu.memory_space<vmem>>, vector<2x32xf32>,
    %c0_164 = arith.constant 0 : index
    %c0_165 = arith.constant 0 : index
    %385 = vector.load %arg10[%c0_164, %c0_165] : memref<2x32xf32, #tpu.memory_space<vmem>>, vector<2x32xf32>
    tpu.vector_store %arg10[%c0_164, %c0_165], %381 {strides = array<i32>} : memref<2x32xf32, #tpu.memory_space<vmem>>, vector<2x32xf32>,
    %386 = arith.index_cast %313 : i32 to index
    %c0_166 = arith.constant 0 : index
    %c0_167 = arith.constant 0 : index
    %387 = vector.load %arg6[%386, %c0_166, %c0_167] : memref<8x2x32xf32, #tpu.memory_space<vmem>>, vector<1x2x32xf32>
    %388 = vector.shape_cast %387 : vector<1x2x32xf32> to vector<2x32xf32>
    %389 = vector.shape_cast %383 : vector<2x32xf32> to vector<1x2x32xf32>
    tpu.vector_store %arg6[%386, %c0_166, %c0_167], %389 {strides = array<i32>} : memref<8x2x32xf32, #tpu.memory_space<vmem>>, vector<1x2x32xf32>,
    %c5_i32 = arith.constant 5 : i32
    %c7_i32_168 = arith.constant 7 : i32
    %390 = arith.subi %c7_i32_168, %c5_i32 : i32
    %391 = arith.index_cast %c5_i32 : i32 to index
    %c0_169 = arith.constant 0 : index
    %c0_170 = arith.constant 0 : index
    %392 = vector.load %arg1[%391, %c0_169, %c0_170] : memref<8x2x128xf32, #tpu.memory_space<vmem>>, vector<1x2x128xf32>
    %393 = vector.shape_cast %392 : vector<1x2x128xf32> to vector<2x128xf32>
    %c0_171 = arith.constant 0 : index
    %c0_172 = arith.constant 0 : index
    %394 = vector.load %arg7[%c0_171, %c0_172] : memref<2x32xf32, #tpu.memory_space<vmem>>, vector<2x32xf32>
    %cst_173 = arith.constant dense<0.000000e+00> : vector<2x128xf32>
    %395 = tpu.matmul %394, %3, %cst_173 {dimension_numbers = #tpu.dot_dimension_numbers<[1], [0], [0], [1], [0, 0, 1, 1], [], []>} : vector<2x32xf32>, vector<32x128xf32>, vector<2x128xf32> -> vector<2x128xf32>
    %396 = arith.addf %393, %395 : vector<2x128xf32>
    %c0_174 = arith.constant 0 : index
    %c0_175 = arith.constant 0 : index
    %397 = vector.load %arg8[%c0_174, %c0_175] : memref<2x32xf32, #tpu.memory_space<vmem>>, vector<2x32xf32>
    %398 = vector.extract_strided_slice %396 {offsets = [0, 0], sizes = [2, 32], strides = [1, 1]} : vector<2x128xf32> to vector<2x32xf32>
    %399 = arith.negf %398 : vector<2x32xf32>
    %400 = math.exp %399 : vector<2x32xf32>
    %cst_176 = arith.constant 1.000000e+00 : f32
    %401 = vector.broadcast %cst_176 : f32 to vector<2x32xf32>
    %402 = arith.addf %401, %400 : vector<2x32xf32>
    %403 = arith.divf %401, %402 : vector<2x32xf32>
    %404 = vector.extract_strided_slice %396 {offsets = [0, 32], sizes = [2, 32], strides = [1, 1]} : vector<2x128xf32> to vector<2x32xf32>
    %405 = arith.negf %404 : vector<2x32xf32>
    %406 = math.exp %405 : vector<2x32xf32>
    %cst_177 = arith.constant 1.000000e+00 : f32
    %407 = vector.broadcast %cst_177 : f32 to vector<2x32xf32>
    %408 = arith.addf %407, %406 : vector<2x32xf32>
    %409 = arith.divf %407, %408 : vector<2x32xf32>
    %410 = vector.extract_strided_slice %396 {offsets = [0, 64], sizes = [2, 32], strides = [1, 1]} : vector<2x128xf32> to vector<2x32xf32>
    %411 = math.tanh %410 : vector<2x32xf32>
    %412 = vector.extract_strided_slice %396 {offsets = [0, 96], sizes = [2, 32], strides = [1, 1]} : vector<2x128xf32> to vector<2x32xf32>
    %413 = arith.negf %412 : vector<2x32xf32>
    %414 = math.exp %413 : vector<2x32xf32>
    %cst_178 = arith.constant 1.000000e+00 : f32
    %415 = vector.broadcast %cst_178 : f32 to vector<2x32xf32>
    %416 = arith.addf %415, %414 : vector<2x32xf32>
    %417 = arith.divf %415, %416 : vector<2x32xf32>
    %418 = arith.mulf %409, %397 : vector<2x32xf32>
    %419 = arith.mulf %403, %411 : vector<2x32xf32>
    %420 = arith.addf %418, %419 : vector<2x32xf32>
    %421 = math.tanh %420 : vector<2x32xf32>
    %422 = arith.mulf %417, %421 : vector<2x32xf32>
    %c0_179 = arith.constant 0 : index
    %c0_180 = arith.constant 0 : index
    %423 = vector.load %arg7[%c0_179, %c0_180] : memref<2x32xf32, #tpu.memory_space<vmem>>, vector<2x32xf32>
    tpu.vector_store %arg7[%c0_179, %c0_180], %422 {strides = array<i32>} : memref<2x32xf32, #tpu.memory_space<vmem>>, vector<2x32xf32>,
    %c0_181 = arith.constant 0 : index
    %c0_182 = arith.constant 0 : index
    %424 = vector.load %arg8[%c0_181, %c0_182] : memref<2x32xf32, #tpu.memory_space<vmem>>, vector<2x32xf32>
    tpu.vector_store %arg8[%c0_181, %c0_182], %420 {strides = array<i32>} : memref<2x32xf32, #tpu.memory_space<vmem>>, vector<2x32xf32>,
    %425 = arith.index_cast %c5_i32 : i32 to index
    %c0_183 = arith.constant 0 : index
    %c0_184 = arith.constant 0 : index
    %426 = vector.load %arg5[%425, %c0_183, %c0_184] : memref<8x2x32xf32, #tpu.memory_space<vmem>>, vector<1x2x32xf32>
    %427 = vector.shape_cast %426 : vector<1x2x32xf32> to vector<2x32xf32>
    %428 = vector.shape_cast %422 : vector<2x32xf32> to vector<1x2x32xf32>
    tpu.vector_store %arg5[%425, %c0_183, %c0_184], %428 {strides = array<i32>} : memref<8x2x32xf32, #tpu.memory_space<vmem>>, vector<1x2x32xf32>,
    %429 = arith.index_cast %390 : i32 to index
    %c0_185 = arith.constant 0 : index
    %c0_186 = arith.constant 0 : index
    %430 = vector.load %arg2[%429, %c0_185, %c0_186] : memref<8x2x128xf32, #tpu.memory_space<vmem>>, vector<1x2x128xf32>
    %431 = vector.shape_cast %430 : vector<1x2x128xf32> to vector<2x128xf32>
    %c0_187 = arith.constant 0 : index
    %c0_188 = arith.constant 0 : index
    %432 = vector.load %arg9[%c0_187, %c0_188] : memref<2x32xf32, #tpu.memory_space<vmem>>, vector<2x32xf32>
    %cst_189 = arith.constant dense<0.000000e+00> : vector<2x128xf32>
    %433 = tpu.matmul %432, %4, %cst_189 {dimension_numbers = #tpu.dot_dimension_numbers<[1], [0], [0], [1], [0, 0, 1, 1], [], []>} : vector<2x32xf32>, vector<32x128xf32>, vector<2x128xf32> -> vector<2x128xf32>
    %434 = arith.addf %431, %433 : vector<2x128xf32>
    %c0_190 = arith.constant 0 : index
    %c0_191 = arith.constant 0 : index
    %435 = vector.load %arg10[%c0_190, %c0_191] : memref<2x32xf32, #tpu.memory_space<vmem>>, vector<2x32xf32>
    %436 = vector.extract_strided_slice %434 {offsets = [0, 0], sizes = [2, 32], strides = [1, 1]} : vector<2x128xf32> to vector<2x32xf32>
    %437 = arith.negf %436 : vector<2x32xf32>
    %438 = math.exp %437 : vector<2x32xf32>
    %cst_192 = arith.constant 1.000000e+00 : f32
    %439 = vector.broadcast %cst_192 : f32 to vector<2x32xf32>
    %440 = arith.addf %439, %438 : vector<2x32xf32>
    %441 = arith.divf %439, %440 : vector<2x32xf32>
    %442 = vector.extract_strided_slice %434 {offsets = [0, 32], sizes = [2, 32], strides = [1, 1]} : vector<2x128xf32> to vector<2x32xf32>
    %443 = arith.negf %442 : vector<2x32xf32>
    %444 = math.exp %443 : vector<2x32xf32>
    %cst_193 = arith.constant 1.000000e+00 : f32
    %445 = vector.broadcast %cst_193 : f32 to vector<2x32xf32>
    %446 = arith.addf %445, %444 : vector<2x32xf32>
    %447 = arith.divf %445, %446 : vector<2x32xf32>
    %448 = vector.extract_strided_slice %434 {offsets = [0, 64], sizes = [2, 32], strides = [1, 1]} : vector<2x128xf32> to vector<2x32xf32>
    %449 = math.tanh %448 : vector<2x32xf32>
    %450 = vector.extract_strided_slice %434 {offsets = [0, 96], sizes = [2, 32], strides = [1, 1]} : vector<2x128xf32> to vector<2x32xf32>
    %451 = arith.negf %450 : vector<2x32xf32>
    %452 = math.exp %451 : vector<2x32xf32>
    %cst_194 = arith.constant 1.000000e+00 : f32
    %453 = vector.broadcast %cst_194 : f32 to vector<2x32xf32>
    %454 = arith.addf %453, %452 : vector<2x32xf32>
    %455 = arith.divf %453, %454 : vector<2x32xf32>
    %456 = arith.mulf %447, %435 : vector<2x32xf32>
    %457 = arith.mulf %441, %449 : vector<2x32xf32>
    %458 = arith.addf %456, %457 : vector<2x32xf32>
    %459 = math.tanh %458 : vector<2x32xf32>
    %460 = arith.mulf %455, %459 : vector<2x32xf32>
    %c0_195 = arith.constant 0 : index
    %c0_196 = arith.constant 0 : index
    %461 = vector.load %arg9[%c0_195, %c0_196] : memref<2x32xf32, #tpu.memory_space<vmem>>, vector<2x32xf32>
    tpu.vector_store %arg9[%c0_195, %c0_196], %460 {strides = array<i32>} : memref<2x32xf32, #tpu.memory_space<vmem>>, vector<2x32xf32>,
    %c0_197 = arith.constant 0 : index
    %c0_198 = arith.constant 0 : index
    %462 = vector.load %arg10[%c0_197, %c0_198] : memref<2x32xf32, #tpu.memory_space<vmem>>, vector<2x32xf32>
    tpu.vector_store %arg10[%c0_197, %c0_198], %458 {strides = array<i32>} : memref<2x32xf32, #tpu.memory_space<vmem>>, vector<2x32xf32>,
    %463 = arith.index_cast %390 : i32 to index
    %c0_199 = arith.constant 0 : index
    %c0_200 = arith.constant 0 : index
    %464 = vector.load %arg6[%463, %c0_199, %c0_200] : memref<8x2x32xf32, #tpu.memory_space<vmem>>, vector<1x2x32xf32>
    %465 = vector.shape_cast %464 : vector<1x2x32xf32> to vector<2x32xf32>
    %466 = vector.shape_cast %460 : vector<2x32xf32> to vector<1x2x32xf32>
    tpu.vector_store %arg6[%463, %c0_199, %c0_200], %466 {strides = array<i32>} : memref<8x2x32xf32, #tpu.memory_space<vmem>>, vector<1x2x32xf32>,
    %c6_i32 = arith.constant 6 : i32
    %c7_i32_201 = arith.constant 7 : i32
    %467 = arith.subi %c7_i32_201, %c6_i32 : i32
    %468 = arith.index_cast %c6_i32 : i32 to index
    %c0_202 = arith.constant 0 : index
    %c0_203 = arith.constant 0 : index
    %469 = vector.load %arg1[%468, %c0_202, %c0_203] : memref<8x2x128xf32, #tpu.memory_space<vmem>>, vector<1x2x128xf32>
    %470 = vector.shape_cast %469 : vector<1x2x128xf32> to vector<2x128xf32>
    %c0_204 = arith.constant 0 : index
    %c0_205 = arith.constant 0 : index
    %471 = vector.load %arg7[%c0_204, %c0_205] : memref<2x32xf32, #tpu.memory_space<vmem>>, vector<2x32xf32>
    %cst_206 = arith.constant dense<0.000000e+00> : vector<2x128xf32>
    %472 = tpu.matmul %471, %3, %cst_206 {dimension_numbers = #tpu.dot_dimension_numbers<[1], [0], [0], [1], [0, 0, 1, 1], [], []>} : vector<2x32xf32>, vector<32x128xf32>, vector<2x128xf32> -> vector<2x128xf32>
    %473 = arith.addf %470, %472 : vector<2x128xf32>
    %c0_207 = arith.constant 0 : index
    %c0_208 = arith.constant 0 : index
    %474 = vector.load %arg8[%c0_207, %c0_208] : memref<2x32xf32, #tpu.memory_space<vmem>>, vector<2x32xf32>
    %475 = vector.extract_strided_slice %473 {offsets = [0, 0], sizes = [2, 32], strides = [1, 1]} : vector<2x128xf32> to vector<2x32xf32>
    %476 = arith.negf %475 : vector<2x32xf32>
    %477 = math.exp %476 : vector<2x32xf32>
    %cst_209 = arith.constant 1.000000e+00 : f32
    %478 = vector.broadcast %cst_209 : f32 to vector<2x32xf32>
    %479 = arith.addf %478, %477 : vector<2x32xf32>
    %480 = arith.divf %478, %479 : vector<2x32xf32>
    %481 = vector.extract_strided_slice %473 {offsets = [0, 32], sizes = [2, 32], strides = [1, 1]} : vector<2x128xf32> to vector<2x32xf32>
    %482 = arith.negf %481 : vector<2x32xf32>
    %483 = math.exp %482 : vector<2x32xf32>
    %cst_210 = arith.constant 1.000000e+00 : f32
    %484 = vector.broadcast %cst_210 : f32 to vector<2x32xf32>
    %485 = arith.addf %484, %483 : vector<2x32xf32>
    %486 = arith.divf %484, %485 : vector<2x32xf32>
    %487 = vector.extract_strided_slice %473 {offsets = [0, 64], sizes = [2, 32], strides = [1, 1]} : vector<2x128xf32> to vector<2x32xf32>
    %488 = math.tanh %487 : vector<2x32xf32>
    %489 = vector.extract_strided_slice %473 {offsets = [0, 96], sizes = [2, 32], strides = [1, 1]} : vector<2x128xf32> to vector<2x32xf32>
    %490 = arith.negf %489 : vector<2x32xf32>
    %491 = math.exp %490 : vector<2x32xf32>
    %cst_211 = arith.constant 1.000000e+00 : f32
    %492 = vector.broadcast %cst_211 : f32 to vector<2x32xf32>
    %493 = arith.addf %492, %491 : vector<2x32xf32>
    %494 = arith.divf %492, %493 : vector<2x32xf32>
    %495 = arith.mulf %486, %474 : vector<2x32xf32>
    %496 = arith.mulf %480, %488 : vector<2x32xf32>
    %497 = arith.addf %495, %496 : vector<2x32xf32>
    %498 = math.tanh %497 : vector<2x32xf32>
    %499 = arith.mulf %494, %498 : vector<2x32xf32>
    %c0_212 = arith.constant 0 : index
    %c0_213 = arith.constant 0 : index
    %500 = vector.load %arg7[%c0_212, %c0_213] : memref<2x32xf32, #tpu.memory_space<vmem>>, vector<2x32xf32>
    tpu.vector_store %arg7[%c0_212, %c0_213], %499 {strides = array<i32>} : memref<2x32xf32, #tpu.memory_space<vmem>>, vector<2x32xf32>,
    %c0_214 = arith.constant 0 : index
    %c0_215 = arith.constant 0 : index
    %501 = vector.load %arg8[%c0_214, %c0_215] : memref<2x32xf32, #tpu.memory_space<vmem>>, vector<2x32xf32>
    tpu.vector_store %arg8[%c0_214, %c0_215], %497 {strides = array<i32>} : memref<2x32xf32, #tpu.memory_space<vmem>>, vector<2x32xf32>,
    %502 = arith.index_cast %c6_i32 : i32 to index
    %c0_216 = arith.constant 0 : index
    %c0_217 = arith.constant 0 : index
    %503 = vector.load %arg5[%502, %c0_216, %c0_217] : memref<8x2x32xf32, #tpu.memory_space<vmem>>, vector<1x2x32xf32>
    %504 = vector.shape_cast %503 : vector<1x2x32xf32> to vector<2x32xf32>
    %505 = vector.shape_cast %499 : vector<2x32xf32> to vector<1x2x32xf32>
    tpu.vector_store %arg5[%502, %c0_216, %c0_217], %505 {strides = array<i32>} : memref<8x2x32xf32, #tpu.memory_space<vmem>>, vector<1x2x32xf32>,
    %506 = arith.index_cast %467 : i32 to index
    %c0_218 = arith.constant 0 : index
    %c0_219 = arith.constant 0 : index
    %507 = vector.load %arg2[%506, %c0_218, %c0_219] : memref<8x2x128xf32, #tpu.memory_space<vmem>>, vector<1x2x128xf32>
    %508 = vector.shape_cast %507 : vector<1x2x128xf32> to vector<2x128xf32>
    %c0_220 = arith.constant 0 : index
    %c0_221 = arith.constant 0 : index
    %509 = vector.load %arg9[%c0_220, %c0_221] : memref<2x32xf32, #tpu.memory_space<vmem>>, vector<2x32xf32>
    %cst_222 = arith.constant dense<0.000000e+00> : vector<2x128xf32>
    %510 = tpu.matmul %509, %4, %cst_222 {dimension_numbers = #tpu.dot_dimension_numbers<[1], [0], [0], [1], [0, 0, 1, 1], [], []>} : vector<2x32xf32>, vector<32x128xf32>, vector<2x128xf32> -> vector<2x128xf32>
    %511 = arith.addf %508, %510 : vector<2x128xf32>
    %c0_223 = arith.constant 0 : index
    %c0_224 = arith.constant 0 : index
    %512 = vector.load %arg10[%c0_223, %c0_224] : memref<2x32xf32, #tpu.memory_space<vmem>>, vector<2x32xf32>
    %513 = vector.extract_strided_slice %511 {offsets = [0, 0], sizes = [2, 32], strides = [1, 1]} : vector<2x128xf32> to vector<2x32xf32>
    %514 = arith.negf %513 : vector<2x32xf32>
    %515 = math.exp %514 : vector<2x32xf32>
    %cst_225 = arith.constant 1.000000e+00 : f32
    %516 = vector.broadcast %cst_225 : f32 to vector<2x32xf32>
    %517 = arith.addf %516, %515 : vector<2x32xf32>
    %518 = arith.divf %516, %517 : vector<2x32xf32>
    %519 = vector.extract_strided_slice %511 {offsets = [0, 32], sizes = [2, 32], strides = [1, 1]} : vector<2x128xf32> to vector<2x32xf32>
    %520 = arith.negf %519 : vector<2x32xf32>
    %521 = math.exp %520 : vector<2x32xf32>
    %cst_226 = arith.constant 1.000000e+00 : f32
    %522 = vector.broadcast %cst_226 : f32 to vector<2x32xf32>
    %523 = arith.addf %522, %521 : vector<2x32xf32>
    %524 = arith.divf %522, %523 : vector<2x32xf32>
    %525 = vector.extract_strided_slice %511 {offsets = [0, 64], sizes = [2, 32], strides = [1, 1]} : vector<2x128xf32> to vector<2x32xf32>
    %526 = math.tanh %525 : vector<2x32xf32>
    %527 = vector.extract_strided_slice %511 {offsets = [0, 96], sizes = [2, 32], strides = [1, 1]} : vector<2x128xf32> to vector<2x32xf32>
    %528 = arith.negf %527 : vector<2x32xf32>
    %529 = math.exp %528 : vector<2x32xf32>
    %cst_227 = arith.constant 1.000000e+00 : f32
    %530 = vector.broadcast %cst_227 : f32 to vector<2x32xf32>
    %531 = arith.addf %530, %529 : vector<2x32xf32>
    %532 = arith.divf %530, %531 : vector<2x32xf32>
    %533 = arith.mulf %524, %512 : vector<2x32xf32>
    %534 = arith.mulf %518, %526 : vector<2x32xf32>
    %535 = arith.addf %533, %534 : vector<2x32xf32>
    %536 = math.tanh %535 : vector<2x32xf32>
    %537 = arith.mulf %532, %536 : vector<2x32xf32>
    %c0_228 = arith.constant 0 : index
    %c0_229 = arith.constant 0 : index
    %538 = vector.load %arg9[%c0_228, %c0_229] : memref<2x32xf32, #tpu.memory_space<vmem>>, vector<2x32xf32>
    tpu.vector_store %arg9[%c0_228, %c0_229], %537 {strides = array<i32>} : memref<2x32xf32, #tpu.memory_space<vmem>>, vector<2x32xf32>,
    %c0_230 = arith.constant 0 : index
    %c0_231 = arith.constant 0 : index
    %539 = vector.load %arg10[%c0_230, %c0_231] : memref<2x32xf32, #tpu.memory_space<vmem>>, vector<2x32xf32>
    tpu.vector_store %arg10[%c0_230, %c0_231], %535 {strides = array<i32>} : memref<2x32xf32, #tpu.memory_space<vmem>>, vector<2x32xf32>,
    %540 = arith.index_cast %467 : i32 to index
    %c0_232 = arith.constant 0 : index
    %c0_233 = arith.constant 0 : index
    %541 = vector.load %arg6[%540, %c0_232, %c0_233] : memref<8x2x32xf32, #tpu.memory_space<vmem>>, vector<1x2x32xf32>
    %542 = vector.shape_cast %541 : vector<1x2x32xf32> to vector<2x32xf32>
    %543 = vector.shape_cast %537 : vector<2x32xf32> to vector<1x2x32xf32>
    tpu.vector_store %arg6[%540, %c0_232, %c0_233], %543 {strides = array<i32>} : memref<8x2x32xf32, #tpu.memory_space<vmem>>, vector<1x2x32xf32>,
    %c7_i32_234 = arith.constant 7 : i32
    %c7_i32_235 = arith.constant 7 : i32
    %544 = arith.subi %c7_i32_235, %c7_i32_234 : i32
    %545 = arith.index_cast %c7_i32_234 : i32 to index
    %c0_236 = arith.constant 0 : index
    %c0_237 = arith.constant 0 : index
    %546 = vector.load %arg1[%545, %c0_236, %c0_237] : memref<8x2x128xf32, #tpu.memory_space<vmem>>, vector<1x2x128xf32>
    %547 = vector.shape_cast %546 : vector<1x2x128xf32> to vector<2x128xf32>
    %c0_238 = arith.constant 0 : index
    %c0_239 = arith.constant 0 : index
    %548 = vector.load %arg7[%c0_238, %c0_239] : memref<2x32xf32, #tpu.memory_space<vmem>>, vector<2x32xf32>
    %cst_240 = arith.constant dense<0.000000e+00> : vector<2x128xf32>
    %549 = tpu.matmul %548, %3, %cst_240 {dimension_numbers = #tpu.dot_dimension_numbers<[1], [0], [0], [1], [0, 0, 1, 1], [], []>} : vector<2x32xf32>, vector<32x128xf32>, vector<2x128xf32> -> vector<2x128xf32>
    %550 = arith.addf %547, %549 : vector<2x128xf32>
    %c0_241 = arith.constant 0 : index
    %c0_242 = arith.constant 0 : index
    %551 = vector.load %arg8[%c0_241, %c0_242] : memref<2x32xf32, #tpu.memory_space<vmem>>, vector<2x32xf32>
    %552 = vector.extract_strided_slice %550 {offsets = [0, 0], sizes = [2, 32], strides = [1, 1]} : vector<2x128xf32> to vector<2x32xf32>
    %553 = arith.negf %552 : vector<2x32xf32>
    %554 = math.exp %553 : vector<2x32xf32>
    %cst_243 = arith.constant 1.000000e+00 : f32
    %555 = vector.broadcast %cst_243 : f32 to vector<2x32xf32>
    %556 = arith.addf %555, %554 : vector<2x32xf32>
    %557 = arith.divf %555, %556 : vector<2x32xf32>
    %558 = vector.extract_strided_slice %550 {offsets = [0, 32], sizes = [2, 32], strides = [1, 1]} : vector<2x128xf32> to vector<2x32xf32>
    %559 = arith.negf %558 : vector<2x32xf32>
    %560 = math.exp %559 : vector<2x32xf32>
    %cst_244 = arith.constant 1.000000e+00 : f32
    %561 = vector.broadcast %cst_244 : f32 to vector<2x32xf32>
    %562 = arith.addf %561, %560 : vector<2x32xf32>
    %563 = arith.divf %561, %562 : vector<2x32xf32>
    %564 = vector.extract_strided_slice %550 {offsets = [0, 64], sizes = [2, 32], strides = [1, 1]} : vector<2x128xf32> to vector<2x32xf32>
    %565 = math.tanh %564 : vector<2x32xf32>
    %566 = vector.extract_strided_slice %550 {offsets = [0, 96], sizes = [2, 32], strides = [1, 1]} : vector<2x128xf32> to vector<2x32xf32>
    %567 = arith.negf %566 : vector<2x32xf32>
    %568 = math.exp %567 : vector<2x32xf32>
    %cst_245 = arith.constant 1.000000e+00 : f32
    %569 = vector.broadcast %cst_245 : f32 to vector<2x32xf32>
    %570 = arith.addf %569, %568 : vector<2x32xf32>
    %571 = arith.divf %569, %570 : vector<2x32xf32>
    %572 = arith.mulf %563, %551 : vector<2x32xf32>
    %573 = arith.mulf %557, %565 : vector<2x32xf32>
    %574 = arith.addf %572, %573 : vector<2x32xf32>
    %575 = math.tanh %574 : vector<2x32xf32>
    %576 = arith.mulf %571, %575 : vector<2x32xf32>
    %c0_246 = arith.constant 0 : index
    %c0_247 = arith.constant 0 : index
    %577 = vector.load %arg7[%c0_246, %c0_247] : memref<2x32xf32, #tpu.memory_space<vmem>>, vector<2x32xf32>
    tpu.vector_store %arg7[%c0_246, %c0_247], %576 {strides = array<i32>} : memref<2x32xf32, #tpu.memory_space<vmem>>, vector<2x32xf32>,
    %c0_248 = arith.constant 0 : index
    %c0_249 = arith.constant 0 : index
    %578 = vector.load %arg8[%c0_248, %c0_249] : memref<2x32xf32, #tpu.memory_space<vmem>>, vector<2x32xf32>
    tpu.vector_store %arg8[%c0_248, %c0_249], %574 {strides = array<i32>} : memref<2x32xf32, #tpu.memory_space<vmem>>, vector<2x32xf32>,
    %579 = arith.index_cast %c7_i32_234 : i32 to index
    %c0_250 = arith.constant 0 : index
    %c0_251 = arith.constant 0 : index
    %580 = vector.load %arg5[%579, %c0_250, %c0_251] : memref<8x2x32xf32, #tpu.memory_space<vmem>>, vector<1x2x32xf32>
    %581 = vector.shape_cast %580 : vector<1x2x32xf32> to vector<2x32xf32>
    %582 = vector.shape_cast %576 : vector<2x32xf32> to vector<1x2x32xf32>
    tpu.vector_store %arg5[%579, %c0_250, %c0_251], %582 {strides = array<i32>} : memref<8x2x32xf32, #tpu.memory_space<vmem>>, vector<1x2x32xf32>,
    %583 = arith.index_cast %544 : i32 to index
    %c0_252 = arith.constant 0 : index
    %c0_253 = arith.constant 0 : index
    %584 = vector.load %arg2[%583, %c0_252, %c0_253] : memref<8x2x128xf32, #tpu.memory_space<vmem>>, vector<1x2x128xf32>
    %585 = vector.shape_cast %584 : vector<1x2x128xf32> to vector<2x128xf32>
    %c0_254 = arith.constant 0 : index
    %c0_255 = arith.constant 0 : index
    %586 = vector.load %arg9[%c0_254, %c0_255] : memref<2x32xf32, #tpu.memory_space<vmem>>, vector<2x32xf32>
    %cst_256 = arith.constant dense<0.000000e+00> : vector<2x128xf32>
    %587 = tpu.matmul %586, %4, %cst_256 {dimension_numbers = #tpu.dot_dimension_numbers<[1], [0], [0], [1], [0, 0, 1, 1], [], []>} : vector<2x32xf32>, vector<32x128xf32>, vector<2x128xf32> -> vector<2x128xf32>
    %588 = arith.addf %585, %587 : vector<2x128xf32>
    %c0_257 = arith.constant 0 : index
    %c0_258 = arith.constant 0 : index
    %589 = vector.load %arg10[%c0_257, %c0_258] : memref<2x32xf32, #tpu.memory_space<vmem>>, vector<2x32xf32>
    %590 = vector.extract_strided_slice %588 {offsets = [0, 0], sizes = [2, 32], strides = [1, 1]} : vector<2x128xf32> to vector<2x32xf32>
    %591 = arith.negf %590 : vector<2x32xf32>
    %592 = math.exp %591 : vector<2x32xf32>
    %cst_259 = arith.constant 1.000000e+00 : f32
    %593 = vector.broadcast %cst_259 : f32 to vector<2x32xf32>
    %594 = arith.addf %593, %592 : vector<2x32xf32>
    %595 = arith.divf %593, %594 : vector<2x32xf32>
    %596 = vector.extract_strided_slice %588 {offsets = [0, 32], sizes = [2, 32], strides = [1, 1]} : vector<2x128xf32> to vector<2x32xf32>
    %597 = arith.negf %596 : vector<2x32xf32>
    %598 = math.exp %597 : vector<2x32xf32>
    %cst_260 = arith.constant 1.000000e+00 : f32
    %599 = vector.broadcast %cst_260 : f32 to vector<2x32xf32>
    %600 = arith.addf %599, %598 : vector<2x32xf32>
    %601 = arith.divf %599, %600 : vector<2x32xf32>
    %602 = vector.extract_strided_slice %588 {offsets = [0, 64], sizes = [2, 32], strides = [1, 1]} : vector<2x128xf32> to vector<2x32xf32>
    %603 = math.tanh %602 : vector<2x32xf32>
    %604 = vector.extract_strided_slice %588 {offsets = [0, 96], sizes = [2, 32], strides = [1, 1]} : vector<2x128xf32> to vector<2x32xf32>
    %605 = arith.negf %604 : vector<2x32xf32>
    %606 = math.exp %605 : vector<2x32xf32>
    %cst_261 = arith.constant 1.000000e+00 : f32
    %607 = vector.broadcast %cst_261 : f32 to vector<2x32xf32>
    %608 = arith.addf %607, %606 : vector<2x32xf32>
    %609 = arith.divf %607, %608 : vector<2x32xf32>
    %610 = arith.mulf %601, %589 : vector<2x32xf32>
    %611 = arith.mulf %595, %603 : vector<2x32xf32>
    %612 = arith.addf %610, %611 : vector<2x32xf32>
    %613 = math.tanh %612 : vector<2x32xf32>
    %614 = arith.mulf %609, %613 : vector<2x32xf32>
    %c0_262 = arith.constant 0 : index
    %c0_263 = arith.constant 0 : index
    %615 = vector.load %arg9[%c0_262, %c0_263] : memref<2x32xf32, #tpu.memory_space<vmem>>, vector<2x32xf32>
    tpu.vector_store %arg9[%c0_262, %c0_263], %614 {strides = array<i32>} : memref<2x32xf32, #tpu.memory_space<vmem>>, vector<2x32xf32>,
    %c0_264 = arith.constant 0 : index
    %c0_265 = arith.constant 0 : index
    %616 = vector.load %arg10[%c0_264, %c0_265] : memref<2x32xf32, #tpu.memory_space<vmem>>, vector<2x32xf32>
    tpu.vector_store %arg10[%c0_264, %c0_265], %612 {strides = array<i32>} : memref<2x32xf32, #tpu.memory_space<vmem>>, vector<2x32xf32>,
    %617 = arith.index_cast %544 : i32 to index
    %c0_266 = arith.constant 0 : index
    %c0_267 = arith.constant 0 : index
    %618 = vector.load %arg6[%617, %c0_266, %c0_267] : memref<8x2x32xf32, #tpu.memory_space<vmem>>, vector<1x2x32xf32>
    %619 = vector.shape_cast %618 : vector<1x2x32xf32> to vector<2x32xf32>
    %620 = vector.shape_cast %614 : vector<2x32xf32> to vector<1x2x32xf32>
    tpu.vector_store %arg6[%617, %c0_266, %c0_267], %620 {strides = array<i32>} : memref<8x2x32xf32, #tpu.memory_space<vmem>>, vector<1x2x32xf32>,
    %c8_i32 = arith.constant 8 : i32
    return
  }
  func.func @transform_0(%arg0: i32) -> (i32, i32, i32) {
    %c0_i32 = arith.constant 0 : i32
    %c0_i32_0 = arith.constant 0 : i32
    %c0_i32_1 = arith.constant 0 : i32
    return %arg0, %c0_i32, %c0_i32_0 : i32, i32, i32
  }
  func.func @transform_1(%arg0: i32) -> (i32, i32, i32) {
    %c0_i32 = arith.constant 0 : i32
    %0 = arith.subi %c0_i32, %arg0 : i32
    %c0_i32_0 = arith.constant 0 : i32
    %c0_i32_1 = arith.constant 0 : i32
    %c0_i32_2 = arith.constant 0 : i32
    return %0, %c0_i32_0, %c0_i32_1 : i32, i32, i32
  }
  func.func @transform_2(%arg0: i32) -> (i32, i32) {
    %c0_i32 = arith.constant 0 : i32
    %c0_i32_0 = arith.constant 0 : i32
    %c0_i32_1 = arith.constant 0 : i32
    return %c0_i32, %c0_i32_0 : i32, i32
  }
  func.func @transform_3(%arg0: i32) -> (i32, i32) {
    %c0_i32 = arith.constant 0 : i32
    %c0_i32_0 = arith.constant 0 : i32
    %c0_i32_1 = arith.constant 0 : i32
    return %c0_i32, %c0_i32_0 : i32, i32
  }
  func.func @transform_4(%arg0: i32) -> (i32, i32, i32) {
    %c0_i32 = arith.constant 0 : i32
    %c0_i32_0 = arith.constant 0 : i32
    %c0_i32_1 = arith.constant 0 : i32
    return %arg0, %c0_i32, %c0_i32_0 : i32, i32, i32
  }
  func.func @transform_5(%arg0: i32) -> (i32, i32, i32) {
    %c0_i32 = arith.constant 0 : i32
    %0 = arith.subi %c0_i32, %arg0 : i32
    %c0_i32_0 = arith.constant 0 : i32
    %c0_i32_1 = arith.constant 0 : i32
    %c0_i32_2 = arith.constant 0 : i32
    return %0, %c0_i32_0, %c0_i32_1 : i32, i32, i32
  }
}

module attributes {stable_mosaic.version = 11 : i64} {
  func.func @_proj_dual_kernel(%arg0: i32, %arg1: memref<16x32xf32, #tpu.memory_space<vmem>>, %arg2: memref<16x32xf32, #tpu.memory_space<vmem>>, %arg3: memref<32x128xf32, #tpu.memory_space<vmem>>, %arg4: memref<32x128xf32, #tpu.memory_space<vmem>>, %arg5: memref<32x128xf32, #tpu.memory_space<vmem>>, %arg6: memref<32x128xf32, #tpu.memory_space<vmem>>, %arg7: memref<1x128xf32, #tpu.memory_space<vmem>>, %arg8: memref<1x128xf32, #tpu.memory_space<vmem>>, %arg9: memref<16x128xf32, #tpu.memory_space<vmem>>, %arg10: memref<16x128xf32, #tpu.memory_space<vmem>>) attributes {dimension_semantics = [#tpu.dimension_semantics<parallel>], iteration_bounds = array<i64: 1>, scalar_prefetch = 0 : i64, scratch_operands = 0 : i64, tpu.core_type = #tpu.core_type<tc>, window_params = [{transform_indices = @transform_0, window_bounds = array<i64: 16, 32>}, {transform_indices = @transform_1, window_bounds = array<i64: 16, 32>}, {pipeline_mode = #tpu.pipeline_mode<synchronous>, transform_indices = @transform_2, window_bounds = array<i64: 32, 128>}, {pipeline_mode = #tpu.pipeline_mode<synchronous>, transform_indices = @transform_3, window_bounds = array<i64: 32, 128>}, {pipeline_mode = #tpu.pipeline_mode<synchronous>, transform_indices = @transform_4, window_bounds = array<i64: 32, 128>}, {pipeline_mode = #tpu.pipeline_mode<synchronous>, transform_indices = @transform_5, window_bounds = array<i64: 32, 128>}, {pipeline_mode = #tpu.pipeline_mode<synchronous>, transform_indices = @transform_6, window_bounds = array<i64: 1, 128>}, {pipeline_mode = #tpu.pipeline_mode<synchronous>, transform_indices = @transform_7, window_bounds = array<i64: 1, 128>}, {transform_indices = @transform_8, window_bounds = array<i64: 16, 128>}, {transform_indices = @transform_9, window_bounds = array<i64: 16, 128>}]} {
    %c0 = arith.constant 0 : index
    %c0_0 = arith.constant 0 : index
    %0 = vector.load %arg1[%c0, %c0_0] : memref<16x32xf32, #tpu.memory_space<vmem>>, vector<16x32xf32>
    %c0_1 = arith.constant 0 : index
    %c0_2 = arith.constant 0 : index
    %1 = vector.load %arg2[%c0_1, %c0_2] : memref<16x32xf32, #tpu.memory_space<vmem>>, vector<16x32xf32>
    %c0_3 = arith.constant 0 : index
    %c0_4 = arith.constant 0 : index
    %2 = vector.load %arg3[%c0_3, %c0_4] : memref<32x128xf32, #tpu.memory_space<vmem>>, vector<32x128xf32>
    %cst = arith.constant dense<0.000000e+00> : vector<16x128xf32>
    %3 = tpu.matmul %0, %2, %cst {dimension_numbers = #tpu.dot_dimension_numbers<[1], [0], [0], [1], [0, 0, 1, 1], [], []>} : vector<16x32xf32>, vector<32x128xf32>, vector<16x128xf32> -> vector<16x128xf32>
    %c0_5 = arith.constant 0 : index
    %c0_6 = arith.constant 0 : index
    %4 = vector.load %arg4[%c0_5, %c0_6] : memref<32x128xf32, #tpu.memory_space<vmem>>, vector<32x128xf32>
    %cst_7 = arith.constant dense<0.000000e+00> : vector<16x128xf32>
    %5 = tpu.matmul %1, %4, %cst_7 {dimension_numbers = #tpu.dot_dimension_numbers<[1], [0], [0], [1], [0, 0, 1, 1], [], []>} : vector<16x32xf32>, vector<32x128xf32>, vector<16x128xf32> -> vector<16x128xf32>
    %6 = arith.addf %3, %5 : vector<16x128xf32>
    %c0_8 = arith.constant 0 : index
    %c0_9 = arith.constant 0 : index
    %7 = vector.load %arg7[%c0_8, %c0_9] : memref<1x128xf32, #tpu.memory_space<vmem>>, vector<1x128xf32>
    %8 = vector.broadcast %7 : vector<1x128xf32> to vector<16x128xf32>
    %9 = arith.addf %6, %8 : vector<16x128xf32>
    %c0_10 = arith.constant 0 : index
    %c0_11 = arith.constant 0 : index
    %10 = vector.load %arg9[%c0_10, %c0_11] : memref<16x128xf32, #tpu.memory_space<vmem>>, vector<16x128xf32>
    tpu.vector_store %arg9[%c0_10, %c0_11], %9 {strides = array<i32>} : memref<16x128xf32, #tpu.memory_space<vmem>>, vector<16x128xf32>,
    %c0_12 = arith.constant 0 : index
    %c0_13 = arith.constant 0 : index
    %11 = vector.load %arg5[%c0_12, %c0_13] : memref<32x128xf32, #tpu.memory_space<vmem>>, vector<32x128xf32>
    %cst_14 = arith.constant dense<0.000000e+00> : vector<16x128xf32>
    %12 = tpu.matmul %0, %11, %cst_14 {dimension_numbers = #tpu.dot_dimension_numbers<[1], [0], [0], [1], [0, 0, 1, 1], [], []>} : vector<16x32xf32>, vector<32x128xf32>, vector<16x128xf32> -> vector<16x128xf32>
    %c0_15 = arith.constant 0 : index
    %c0_16 = arith.constant 0 : index
    %13 = vector.load %arg6[%c0_15, %c0_16] : memref<32x128xf32, #tpu.memory_space<vmem>>, vector<32x128xf32>
    %cst_17 = arith.constant dense<0.000000e+00> : vector<16x128xf32>
    %14 = tpu.matmul %1, %13, %cst_17 {dimension_numbers = #tpu.dot_dimension_numbers<[1], [0], [0], [1], [0, 0, 1, 1], [], []>} : vector<16x32xf32>, vector<32x128xf32>, vector<16x128xf32> -> vector<16x128xf32>
    %15 = arith.addf %12, %14 : vector<16x128xf32>
    %c0_18 = arith.constant 0 : index
    %c0_19 = arith.constant 0 : index
    %16 = vector.load %arg8[%c0_18, %c0_19] : memref<1x128xf32, #tpu.memory_space<vmem>>, vector<1x128xf32>
    %17 = vector.broadcast %16 : vector<1x128xf32> to vector<16x128xf32>
    %18 = arith.addf %15, %17 : vector<16x128xf32>
    %c0_20 = arith.constant 0 : index
    %c0_21 = arith.constant 0 : index
    %19 = vector.load %arg10[%c0_20, %c0_21] : memref<16x128xf32, #tpu.memory_space<vmem>>, vector<16x128xf32>
    tpu.vector_store %arg10[%c0_20, %c0_21], %18 {strides = array<i32>} : memref<16x128xf32, #tpu.memory_space<vmem>>, vector<16x128xf32>,
    return
  }
  func.func @transform_0(%arg0: i32) -> (i32, i32) {
    %c0_i32 = arith.constant 0 : i32
    %c0_i32_0 = arith.constant 0 : i32
    return %arg0, %c0_i32 : i32, i32
  }
  func.func @transform_1(%arg0: i32) -> (i32, i32) {
    %c0_i32 = arith.constant 0 : i32
    %c0_i32_0 = arith.constant 0 : i32
    return %arg0, %c0_i32 : i32, i32
  }
  func.func @transform_2(%arg0: i32) -> (i32, i32) {
    %c0_i32 = arith.constant 0 : i32
    %c0_i32_0 = arith.constant 0 : i32
    %c0_i32_1 = arith.constant 0 : i32
    return %c0_i32, %c0_i32_0 : i32, i32
  }
  func.func @transform_3(%arg0: i32) -> (i32, i32) {
    %c0_i32 = arith.constant 0 : i32
    %c0_i32_0 = arith.constant 0 : i32
    %c0_i32_1 = arith.constant 0 : i32
    return %c0_i32, %c0_i32_0 : i32, i32
  }
  func.func @transform_4(%arg0: i32) -> (i32, i32) {
    %c0_i32 = arith.constant 0 : i32
    %c0_i32_0 = arith.constant 0 : i32
    %c0_i32_1 = arith.constant 0 : i32
    return %c0_i32, %c0_i32_0 : i32, i32
  }
  func.func @transform_5(%arg0: i32) -> (i32, i32) {
    %c0_i32 = arith.constant 0 : i32
    %c0_i32_0 = arith.constant 0 : i32
    %c0_i32_1 = arith.constant 0 : i32
    return %c0_i32, %c0_i32_0 : i32, i32
  }
  func.func @transform_6(%arg0: i32) -> (i32, i32) {
    %c0_i32 = arith.constant 0 : i32
    %c0_i32_0 = arith.constant 0 : i32
    %c0_i32_1 = arith.constant 0 : i32
    return %c0_i32, %c0_i32_0 : i32, i32
  }
  func.func @transform_7(%arg0: i32) -> (i32, i32) {
    %c0_i32 = arith.constant 0 : i32
    %c0_i32_0 = arith.constant 0 : i32
    %c0_i32_1 = arith.constant 0 : i32
    return %c0_i32, %c0_i32_0 : i32, i32
  }
  func.func @transform_8(%arg0: i32) -> (i32, i32) {
    %c0_i32 = arith.constant 0 : i32
    %c0_i32_0 = arith.constant 0 : i32
    return %arg0, %c0_i32 : i32, i32
  }
  func.func @transform_9(%arg0: i32) -> (i32, i32) {
    %c0_i32 = arith.constant 0 : i32
    %c0_i32_0 = arith.constant 0 : i32
    return %arg0, %c0_i32 : i32, i32
  }
}

module attributes {stable_mosaic.version = 11 : i64} {
  func.func @_fc_dual_kernel(%arg0: i32, %arg1: memref<16x32xf32, #tpu.memory_space<vmem>>, %arg2: memref<16x32xf32, #tpu.memory_space<vmem>>, %arg3: memref<32x16xf32, #tpu.memory_space<vmem>>, %arg4: memref<32x16xf32, #tpu.memory_space<vmem>>, %arg5: memref<1x16xf32, #tpu.memory_space<vmem>>, %arg6: memref<16x16xf32, #tpu.memory_space<vmem>>) attributes {dimension_semantics = [#tpu.dimension_semantics<parallel>], iteration_bounds = array<i64: 1>, scalar_prefetch = 0 : i64, scratch_operands = 0 : i64, tpu.core_type = #tpu.core_type<tc>, window_params = [{transform_indices = @transform_0, window_bounds = array<i64: 16, 32>}, {transform_indices = @transform_1, window_bounds = array<i64: 16, 32>}, {pipeline_mode = #tpu.pipeline_mode<synchronous>, transform_indices = @transform_2, window_bounds = array<i64: 32, 16>}, {pipeline_mode = #tpu.pipeline_mode<synchronous>, transform_indices = @transform_3, window_bounds = array<i64: 32, 16>}, {pipeline_mode = #tpu.pipeline_mode<synchronous>, transform_indices = @transform_4, window_bounds = array<i64: 1, 16>}, {transform_indices = @transform_5, window_bounds = array<i64: 16, 16>}]} {
    %c0 = arith.constant 0 : index
    %c0_0 = arith.constant 0 : index
    %0 = vector.load %arg1[%c0, %c0_0] : memref<16x32xf32, #tpu.memory_space<vmem>>, vector<16x32xf32>
    %c0_1 = arith.constant 0 : index
    %c0_2 = arith.constant 0 : index
    %1 = vector.load %arg3[%c0_1, %c0_2] : memref<32x16xf32, #tpu.memory_space<vmem>>, vector<32x16xf32>
    %cst = arith.constant dense<0.000000e+00> : vector<16x16xf32>
    %2 = tpu.matmul %0, %1, %cst {dimension_numbers = #tpu.dot_dimension_numbers<[1], [0], [0], [1], [0, 0, 1, 1], [], []>} : vector<16x32xf32>, vector<32x16xf32>, vector<16x16xf32> -> vector<16x16xf32>
    %c0_3 = arith.constant 0 : index
    %c0_4 = arith.constant 0 : index
    %3 = vector.load %arg2[%c0_3, %c0_4] : memref<16x32xf32, #tpu.memory_space<vmem>>, vector<16x32xf32>
    %c0_5 = arith.constant 0 : index
    %c0_6 = arith.constant 0 : index
    %4 = vector.load %arg4[%c0_5, %c0_6] : memref<32x16xf32, #tpu.memory_space<vmem>>, vector<32x16xf32>
    %cst_7 = arith.constant dense<0.000000e+00> : vector<16x16xf32>
    %5 = tpu.matmul %3, %4, %cst_7 {dimension_numbers = #tpu.dot_dimension_numbers<[1], [0], [0], [1], [0, 0, 1, 1], [], []>} : vector<16x32xf32>, vector<32x16xf32>, vector<16x16xf32> -> vector<16x16xf32>
    %6 = arith.addf %2, %5 : vector<16x16xf32>
    %c0_8 = arith.constant 0 : index
    %c0_9 = arith.constant 0 : index
    %7 = vector.load %arg5[%c0_8, %c0_9] : memref<1x16xf32, #tpu.memory_space<vmem>>, vector<1x16xf32>
    %8 = vector.broadcast %7 : vector<1x16xf32> to vector<16x16xf32>
    %9 = arith.addf %6, %8 : vector<16x16xf32>
    %c0_10 = arith.constant 0 : index
    %c0_11 = arith.constant 0 : index
    %10 = vector.load %arg6[%c0_10, %c0_11] : memref<16x16xf32, #tpu.memory_space<vmem>>, vector<16x16xf32>
    tpu.vector_store %arg6[%c0_10, %c0_11], %9 {strides = array<i32>} : memref<16x16xf32, #tpu.memory_space<vmem>>, vector<16x16xf32>,
    return
  }
  func.func @transform_0(%arg0: i32) -> (i32, i32) {
    %c0_i32 = arith.constant 0 : i32
    %c0_i32_0 = arith.constant 0 : i32
    return %arg0, %c0_i32 : i32, i32
  }
  func.func @transform_1(%arg0: i32) -> (i32, i32) {
    %c0_i32 = arith.constant 0 : i32
    %c0_i32_0 = arith.constant 0 : i32
    return %arg0, %c0_i32 : i32, i32
  }
  func.func @transform_2(%arg0: i32) -> (i32, i32) {
    %c0_i32 = arith.constant 0 : i32
    %c0_i32_0 = arith.constant 0 : i32
    %c0_i32_1 = arith.constant 0 : i32
    return %c0_i32, %c0_i32_0 : i32, i32
  }
  func.func @transform_3(%arg0: i32) -> (i32, i32) {
    %c0_i32 = arith.constant 0 : i32
    %c0_i32_0 = arith.constant 0 : i32
    %c0_i32_1 = arith.constant 0 : i32
    return %c0_i32, %c0_i32_0 : i32, i32
  }
  func.func @transform_4(%arg0: i32) -> (i32, i32) {
    %c0_i32 = arith.constant 0 : i32
    %c0_i32_0 = arith.constant 0 : i32
    %c0_i32_1 = arith.constant 0 : i32
    return %c0_i32, %c0_i32_0 : i32, i32
  }
  func.func @transform_5(%arg0: i32) -> (i32, i32) {
    %c0_i32 = arith.constant 0 : i32
    %c0_i32_0 = arith.constant 0 : i32
    return %arg0, %c0_i32 : i32, i32
  }
}

</mosaic_0001>

<bundles_post_ra>
// kernel: lstm_backend_forward.5
= control target key start
LH: loop header
LB: loop body
LE: loop exit
PB: predicated region body
PF: predicated region fallthrough
CT: control target
= control target key end

     0   :  { %vm35_vm0 = vcmask 261120   ;;  %s358_s1 = inlined_call_operand.vmem [shape: f32[32,128], index: 1, kind: input, shape index: {}]   ;;  %s359_s2 = inlined_call_operand.vmem [shape: f32[32,128], index: 2, kind: input, shape index: {}]   ;;  %s360_s0 = inlined_call_operand.vmem [shape: f32[16,32], index: 0, kind: input, shape index: {}]   ;;  %s361_s3 = inlined_call_operand.vmem [shape: f32[1,128], index: 3, kind: input, shape index: {}]   ;;  %s362_s4 = inlined_call_operand.vmem [shape: f32[1,128], index: 4, kind: input, shape index: {}]   ;;  %s363_s5 = inlined_call_operand.vmem [shape: f32[16,128], index: 5, kind: output, shape index: {0}]   ;;  %s364_s6 = inlined_call_operand.vmem [shape: f32[16,128], index: 6, kind: output, shape index: {1}]  }
   0x1   :  { %v24_v0 = vld [vmem:[%s358_s1] sm:$0xff]  ;;  %v25_v1 = vld [vmem:[%s358_s1 + $0x8] sm:$0xff]  ;;  %v26_v5 = vld [vmem:[%s358_s1 + $0x10] sm:$0xff] }
   0x2   :  { %v119_v2 = vld [vmem:[%s359_s2] sm:$0xff]  ;;  %v255_v3 = vpack.c.bf16 %v25_v1, %v24_v0  ;;  %v120_v4 = vld [vmem:[%s359_s2 + $0x8] sm:$0xff]  ;;  %v27_v6 = vld [vmem:[%s358_s1 + $0x18] sm:$0xff] }
   0x3   :  { %v263_v7 = vpack.c.bf16 %v120_v4, %v119_v2  ;;  %v259_v8 = vpack.c.bf16 %v27_v6, %v26_v5  ;;  %v121_v9 = vld [vmem:[%s359_s2 + $0x10] sm:$0xff]  ;;  %v122_v10 = vld [vmem:[%s359_s2 + $0x18] sm:$0xff]  ;;  %v22_v11 = vld [vmem:[%s360_s0] sm:$0xff] }
   0x4   :  { %256 = vmatprep.subr.bf16.mxu0 %v255_v3  ;;  %v267_v12 = vpack.c.bf16 %v122_v10, %v121_v9  ;;  %241 = vmatprep.mubr.msk.f32.mxu0 %vm35_vm0, %v22_v11  ;;  %v23_v13 = vld [vmem:[%s360_s0 + $0x8] sm:$0xff]  ;;  %v215_v14 = vld [vmem:[%s361_s3] ss:$0 sm:$0xff] }
   0x5   :  { %264 = vmatprep.subr.bf16.mxu1 %v263_v7  ;;  %258 = vmatpush3.bf16.msra.mxu0 %v255_v3  ;;  %v218_v15 = vld [vmem:[%s362_s4] ss:$0 sm:$0xff] }
   0x6   :  { %266 = vmatpush3.bf16.msra.mxu1 %v263_v7  ;;  %260 = vmatprep.subr.bf16.mxu0 %v259_v8 }
   0x7   :  { %268 = vmatprep.subr.bf16.mxu1 %v267_v12  ;;  %252 = vmatprep.mubr.msk.f32.mxu1 %vm35_vm0, %v22_v11 }
   0x9   :  { %262 = vmatpush3.bf16.msra.mxu0 %v259_v8 }
   0xa   :  { %270 = vmatpush3.bf16.msra.mxu1 %v267_v12 }
   0xc   :  { %242 = vmatmul.mubr.msk.f32.vlgmr.msra.gmra.mrb[0].mxu0 %vm35_vm0, %v23_v13 }
   0xd   :  { %253 = vmatmul.mubr.msk.f32.vlgmr.msra.gmra.mrb[0].mxu1 %vm35_vm0, %v23_v13 }
  0xdf   :  { %v243_v16 = vpop.f32.mrb[0].mxu0 }
  0xe0   :  { %v114_v17 = vadd.f32 %v243_v16, %v215_v14  ;;  %v254_v18 = vpop.f32.mrb[0].mxu1  ;;  %v108_v19 = vpop.f32.mrb[1].mxu0 }
  0xe1   :  { %v202_v20 = vadd.f32 %v254_v18, %v218_v15  ;;  %v109_v21 = vadd.f32 %v215_v14, %v108_v19  ;;  %v196_v22 = vpop.f32.mrb[1].mxu1 }
  0xe2   :  { %118 = vst [vmem:[%s363_s5 + $0x8] sm:$0xff] %v114_v17  ;;  %v197_v23 = vadd.f32 %v218_v15, %v196_v22 }
  0xe3   :  { %206 = vst [vmem:[%s364_s6 + $0x8] sm:$0xff] %v202_v20  ;;  %117 = vst [vmem:[%s363_s5] sm:$0xff] %v109_v21 }
  0xe4   :  { %205 = vst [vmem:[%s364_s6] sm:$0xff] %v197_v23 }

// kernel: lstm_backend_forward.9
= control target key start
LH: loop header
LB: loop body
LE: loop exit
PB: predicated region body
PF: predicated region fallthrough
CT: control target
= control target key end

     0   :  { %vm32_vm0 = vcmask 261120   ;;  %vm204_vm1 = vcmask 130048   ;;  %s347_s3 = inlined_call_operand.vmem [shape: f32[32,16], index: 3, kind: input, shape index: {}]   ;;  %s348_s2 = inlined_call_operand.vmem [shape: f32[32,16], index: 2, kind: input, shape index: {}]   ;;  %s349_s1 = inlined_call_operand.vmem [shape: f32[16,32], index: 1, kind: input, shape index: {}]   ;;  %s350_s0 = inlined_call_operand.vmem [shape: f32[16,32], index: 0, kind: input, shape index: {}]   ;;  %s351_s4 = inlined_call_operand.vmem [shape: f32[1,16], index: 4, kind: input, shape index: {}]   ;;  %s352_s5 = inlined_call_operand.vmem [shape: f32[16,16], index: 5, kind: output, shape index: {}]  }
   0x1   :  { %v28_v0 = vld [vmem:[%s347_s3] sm:$0xff]  ;;  %v29_v1 = vld [vmem:[%s347_s3 + $0x8] sm:$0xff]  ;;  %v30_v5 = vld [vmem:[%s347_s3 + $0x10] sm:$0xff] }
   0x2   :  { %v22_v2 = vld [vmem:[%s348_s2] sm:$0xff]  ;;  %v250_v3 = vpack.c.bf16 %v29_v1, %v28_v0  ;;  %v23_v4 = vld [vmem:[%s348_s2 + $0x8] sm:$0xff]  ;;  %v31_v6 = vld [vmem:[%s347_s3 + $0x18] sm:$0xff] }
   0x3   :  { %v258_v7 = vpack.c.bf16 %v23_v4, %v22_v2  ;;  %v254_v8 = vpack.c.bf16 %v31_v6, %v30_v5  ;;  %v24_v9 = vld [vmem:[%s348_s2 + $0x10] sm:$0xff]  ;;  %v25_v10 = vld [vmem:[%s348_s2 + $0x18] sm:$0xff]  ;;  %v26_v11 = vld [vmem:[%s349_s1] sm:$0xff] }
   0x4   :  { %251 = vmatprep.subr.bf16.mxu1 %v250_v3  ;;  %v262_v12 = vpack.c.bf16 %v25_v10, %v24_v9  ;;  %236 = vmatprep.mubr.msk.f32.mxu1 %vm32_vm0, %v26_v11  ;;  %v20_v13 = vld [vmem:[%s350_s0] sm:$0xff]  ;;  %v27_v14 = vld [vmem:[%s349_s1 + $0x8] sm:$0xff] }
   0x5   :  { %259 = vmatprep.subr.bf16.mxu0 %v258_v7  ;;  %253 = vmatpush3.bf16.msra.mxu1 %v250_v3  ;;  %v21_v15 = vld [vmem:[%s350_s0 + $0x8] sm:$0xff]  ;;  %v215_v18 = vld [vmem:[%s351_s4] ss:$0 sm:$0xff] }
   0x6   :  { %261 = vmatpush3.bf16.msra.mxu0 %v258_v7  ;;  %255 = vmatprep.subr.bf16.mxu1 %v254_v8 }
   0x7   :  { %263 = vmatprep.subr.bf16.mxu0 %v262_v12  ;;  %247 = vmatprep.mubr.msk.f32.mxu0 %vm32_vm0, %v20_v13 }
   0x9   :  { %257 = vmatpush3.bf16.msra.mxu1 %v254_v8 }
   0xa   :  { %265 = vmatpush3.bf16.msra.mxu0 %v262_v12 }
   0xc   :  { %237 = vmatmul.mubr.msk.f32.vlgmr.msra.gmra.mrb[0].mxu1 %vm32_vm0, %v27_v14 }
   0xd   :  { %248 = vmatmul.mubr.msk.f32.vlgmr.msra.gmra.mrb[0].mxu0 %vm32_vm0, %v21_v15 }
  0xdf   :  { %v238_v16 = vpop.f32.mrb[0].mxu1 }
  0xe0   :  { %v249_v17 = vpop.f32.mrb[0].mxu0  ;;  %v105_v19 = vpop.f32.mrb[1].mxu1 }
  0xe1   :  { %v192_v20 = vadd.f32 %v249_v17, %v238_v16  ;;  %v186_v21 = vpop.f32.mrb[1].mxu0 }
  0xe2   :  { %v187_v22 = vadd.f32 %v186_v21, %v105_v19 }
  0xe3   :  { %v203_v23 = vadd.f32 %v215_v18, %v192_v20 }
  0xe4   :  { %v202_v24 = vadd.f32 %v215_v18, %v187_v22 }
  0xe5   :  { %206 = vst.msk [vmem:[%s352_s5 + $0x8] sm:$0xff] %vm204_vm1, %v203_v23 }
  0xe6   :  { %205 = vst.msk [vmem:[%s352_s5] sm:$0xff] %vm204_vm1, %v202_v24 }

// kernel: lstm_backend_forward.7
= control target key start
LH: loop header
LB: loop body
LE: loop exit
PB: predicated region body
PF: predicated region fallthrough
CT: control target
= control target key end

     0   :  { %vm43_vm0 = vcmask 261120   ;;  %s644_s3 = inlined_call_operand.vmem [shape: f32[32,128], index: 3, kind: input, shape index: {}]   ;;  %s645_s5 = inlined_call_operand.vmem [shape: f32[32,128], index: 5, kind: input, shape index: {}]   ;;  %s646_s1 = inlined_call_operand.vmem [shape: f32[16,32], index: 1, kind: input, shape index: {}]   ;;  %s647_s2 = inlined_call_operand.vmem [shape: f32[32,128], index: 2, kind: input, shape index: {}]   ;;  %s648_s4 = inlined_call_operand.vmem [shape: f32[32,128], index: 4, kind: input, shape index: {}]   ;;  %s649_s0 = inlined_call_operand.vmem [shape: f32[16,32], index: 0, kind: input, shape index: {}]   ;;  %s650_s6 = inlined_call_operand.vmem [shape: f32[1,128], index: 6, kind: input, shape index: {}]   ;;  %s651_s7 = inlined_call_operand.vmem [shape: f32[1,128], index: 7, kind: input, shape index: {}]   ;;  %s652_s8 = inlined_call_operand.vmem [shape: f32[16,128], index: 8, kind: output, shape index: {0}]   ;;  %s653_s9 = inlined_call_operand.vmem [shape: f32[16,128], index: 9, kind: output, shape index: {1}]  }
   0x1   :  { %v39_v0 = vld [vmem:[%s644_s3] sm:$0xff]  ;;  %v40_v1 = vld [vmem:[%s644_s3 + $0x8] sm:$0xff]  ;;  %v41_v5 = vld [vmem:[%s644_s3 + $0x10] sm:$0xff] }
   0x2   :  { %v221_v2 = vld [vmem:[%s645_s5] sm:$0xff]  ;;  %v472_v3 = vpack.c.bf16 %v40_v1, %v39_v0  ;;  %v222_v4 = vld [vmem:[%s645_s5 + $0x8] sm:$0xff]  ;;  %v42_v6 = vld [vmem:[%s644_s3 + $0x18] sm:$0xff] }
   0x3   :  { %v488_v7 = vpack.c.bf16 %v222_v4, %v221_v2  ;;  %v476_v8 = vpack.c.bf16 %v42_v6, %v41_v5  ;;  %v223_v9 = vld [vmem:[%s645_s5 + $0x10] sm:$0xff]  ;;  %v224_v10 = vld [vmem:[%s645_s5 + $0x18] sm:$0xff]  ;;  %v33_v11 = vld [vmem:[%s646_s1] sm:$0xff] }
   0x4   :  { %473 = vmatprep.subr.bf16.mxu0 %v472_v3  ;;  %v492_v12 = vpack.c.bf16 %v224_v10, %v223_v9  ;;  %436 = vmatprep.mubr.msk.f32.mxu0 %vm43_vm0, %v33_v11  ;;  %v35_v13 = vld [vmem:[%s647_s2] sm:$0xff]  ;;  %v36_v14 = vld [vmem:[%s647_s2 + $0x8] sm:$0xff]  ;;  %v37_v19 = vld [vmem:[%s647_s2 + $0x10] sm:$0xff] }
   0x5   :  { %489 = vmatprep.subr.bf16.mxu1 %v488_v7  ;;  %475 = vmatpush3.bf16.msra.mxu0 %v472_v3  ;;  %v217_v15 = vld [vmem:[%s648_s4] sm:$0xff]  ;;  %v218_v16 = vld [vmem:[%s648_s4 + $0x8] sm:$0xff]  ;;  %v480_v17 = vpack.c.bf16 %v36_v14, %v35_v13  ;;  %v38_v20 = vld [vmem:[%s647_s2 + $0x18] sm:$0xff] }
   0x6   :  { %491 = vmatpush3.bf16.msra.mxu1 %v488_v7  ;;  %477 = vmatprep.subr.bf16.mxu0 %v476_v8  ;;  %v496_v18 = vpack.c.bf16 %v218_v16, %v217_v15  ;;  %v219_v21 = vld [vmem:[%s648_s4 + $0x10] sm:$0xff]  ;;  %v220_v22 = vld [vmem:[%s648_s4 + $0x18] sm:$0xff]  ;;  %v34_v23 = vld [vmem:[%s646_s1 + $0x8] sm:$0xff]  ;;  %v484_v24 = vpack.c.bf16 %v38_v20, %v37_v19 }
   0x7   :  { %493 = vmatprep.subr.bf16.mxu1 %v492_v12  ;;  %458 = vmatprep.mubr.msk.f32.mxu1 %vm43_vm0, %v33_v11  ;;  %v500_v25 = vpack.c.bf16 %v220_v22, %v219_v21  ;;  %v31_v26 = vld [vmem:[%s649_s0] sm:$0xff]  ;;  %v32_v27 = vld [vmem:[%s649_s0 + $0x8] sm:$0xff] }
   0x8   :  { %v398_v28 = vld [vmem:[%s650_s6] ss:$0 sm:$0xff] }
   0x9   :  { %479 = vmatpush3.bf16.msra.mxu0 %v476_v8  ;;  %v403_v29 = vld [vmem:[%s651_s7] ss:$0 sm:$0xff] }
   0xa   :  { %495 = vmatpush3.bf16.msra.mxu1 %v492_v12  ;;  %481 = vmatprep.subr.bf16.mxu0 %v480_v17 }
   0xb   :  { %497 = vmatprep.subr.bf16.mxu1 %v496_v18 }
   0xc   :  { %437 = vmatmul.mubr.msk.f32.vlgmr.msra.gmra.mrb[0].mxu0 %vm43_vm0, %v34_v23 }
   0xd   :  { %459 = vmatmul.mubr.msk.f32.vlgmr.msra.gmra.mrb[0].mxu1 %vm43_vm0, %v34_v23  ;;  %483 = vmatpush3.bf16.msra.mxu0 %v480_v17 }
   0xe   :  { %499 = vmatpush3.bf16.msra.mxu1 %v496_v18  ;;  %485 = vmatprep.subr.bf16.mxu0 %v484_v24 }
   0xf   :  { %501 = vmatprep.subr.bf16.mxu1 %v500_v25  ;;  %447 = vmatprep.mubr.msk.f32.mxu0 %vm43_vm0, %v31_v26 }
  0x10   :  { %469 = vmatprep.mubr.msk.f32.mxu1 %vm43_vm0, %v31_v26 }
  0x11   :  { %487 = vmatpush3.bf16.msra.mxu0 %v484_v24 }
  0x12   :  { %503 = vmatpush3.bf16.msra.mxu1 %v500_v25 }
  0x14   :  { %448 = vmatmul.mubr.msk.f32.vlgmr.msra.gmra.mrb[0].mxu0 %vm43_vm0, %v32_v27 }
  0x15   :  { %470 = vmatmul.mubr.msk.f32.vlgmr.msra.gmra.mrb[0].mxu1 %vm43_vm0, %v32_v27 }
  0xe7   :  { %v449_v30 = vpop.f32.mrb[0].mxu0 }
  0xe8   :  { %v214_v31 = vadd.f32 %v449_v30, %v398_v28  ;;  %v471_v32 = vpop.f32.mrb[0].mxu1  ;;  %v197_v33 = vpop.f32.mrb[1].mxu0 }
  0xe9   :  { %v383_v34 = vadd.f32 %v471_v32, %v403_v29  ;;  %v213_v35 = vadd.f32 %v398_v28, %v197_v33  ;;  %v366_v36 = vpop.f32.mrb[1].mxu1 }
  0xea   :  { %216 = vst [vmem:[%s652_s8 + $0x8] sm:$0xff] %v214_v31  ;;  %v382_v37 = vadd.f32 %v403_v29, %v366_v36 }
  0xeb   :  { %385 = vst [vmem:[%s653_s9 + $0x8] sm:$0xff] %v383_v34  ;;  %215 = vst [vmem:[%s652_s8] sm:$0xff] %v213_v35 }
  0xec   :  { %384 = vst [vmem:[%s653_s9] sm:$0xff] %v382_v37 }

// kernel: lstm_backend_forward.6
= control target key start
LH: loop header
LB: loop body
LE: loop exit
PB: predicated region body
PF: predicated region fallthrough
CT: control target
= control target key end

     0   :  { %vm59_vm0 = vcmask 254976   ;;  %v2540_v0 = vmov 0.0|0.0   ;;  %v2541_v4 = vmov 0.0   ;;  %vm2542_vm1 = vmmov 0   ;;  %s2544_s12 = smov 64   ;;  %s2545_s13 = smov 96   ;;  %s2968_s2 = inlined_call_operand.vmem [shape: f32[32,128], index: 2, kind: input, shape index: {}]   ;;  %s2969_s3 = inlined_call_operand.vmem [shape: f32[32,128], index: 3, kind: input, shape index: {}]   ;;  %s2970_s0 = inlined_call_operand.vmem [shape: f32[8,2,128], index: 0, kind: input, shape index: {}]   ;;  %s2971_s1 = inlined_call_operand.vmem [shape: f32[8,2,128], index: 1, kind: input, shape index: {}]   ;;  %s2972_s4 = inlined_call_operand.vmem [shape: f32[8,2,32], index: 4, kind: output, shape index: {0}]   ;;  %s2973_s5 = inlined_call_operand.vmem [shape: f32[8,2,32], index: 5, kind: output, shape index: {1}]  }
   0x1   :  { %2310 = vmatprep.subr.bf16.mxu0 %v2540_v0  ;;  %v64_v1 = vld [vmem:[%s2968_s2] sm:$0xff]  ;;  %v65_v2 = vld [vmem:[%s2968_s2 + $0x8] sm:$0xff]  ;;  %2316 = vmatprep.subr.bf16.mxu1 %v2540_v0  ;;  %60 = vst.msk [vmem:[#allocation2] sm:$0x3] %vm59_vm0, %v2541_v4  ;;  %61 = vst.msk [vmem:[#allocation3] sm:$0x3] %vm59_vm0, %v2541_v4 }
   0x2   :  { %v68_v3 = vld [vmem:[%s2969_s3] sm:$0xff]  ;;  %62 = vst.msk [vmem:[#allocation4] sm:$0x3] %vm59_vm0, %v2541_v4  ;;  %63 = vst.msk [vmem:[#allocation5] sm:$0x3] %vm59_vm0, %v2541_v4  ;;  %v2595_v5 = vpack.c.bf16 %v65_v2, %v64_v1  ;;  %v69_v6 = vld [vmem:[%s2969_s3 + $0x8] sm:$0xff]  ;;  %2142 = vmatprep.mubr.msk.f32.mxu0 %vm2542_vm1, %v2541_v4  ;;  %2153 = vmatprep.mubr.msk.f32.mxu1 %vm2542_vm1, %v2541_v4 }
   0x3   :  { %v66_v7 = vld [vmem:[%s2968_s2 + $0x10] sm:$0xff]  ;;  %v67_v8 = vld [vmem:[%s2968_s2 + $0x18] sm:$0xff]  ;;  %v2610_v9 = vpack.c.bf16 %v69_v6, %v68_v3  ;;  %vm74_vm2 = vcmask 261120   ;;  %s2543_s2 = smov 32   ;;  %v72_v18 = vld [vmem:[%s2970_s0] sm:$0x3] }
   0x4   :  { %v70_v10 = vld [vmem:[%s2969_s3 + $0x10] sm:$0xff]  ;;  %v71_v11 = vld [vmem:[%s2969_s3 + $0x18] sm:$0xff]  ;;  %2312 = vmatpush3.bf16.msra.mxu0 %v2595_v5  ;;  %v2619_v12 = vpack.c.bf16 %v67_v8, %v66_v7  ;;  %v1996_v19 = vld [vmem:[%s2971_s1 + $0xe] sm:$0x3] }
   0x5   :  { %2313 = vmatprep.subr.bf16.mxu0 %v2540_v0  ;;  %2318 = vmatpush3.bf16.msra.mxu1 %v2610_v9  ;;  %v2623_v13 = vpack.c.bf16 %v71_v11, %v70_v10  ;;  %v2000_v60 = vld [vmem:[%s2970_s0 + $0x2] sm:$0x3]  ;;  %v2004_v1 = vld [vmem:[%s2971_s1 + $0xc] sm:$0x3] }
   0x6   :  { %2319 = vmatprep.subr.bf16.mxu1 %v2540_v0 }
   0x8   :  { %2315 = vmatpush3.bf16.msra.mxu0 %v2619_v12  ;;  %v73_v14 = vld [vmem:[#allocation2] sm:$0x3]  ;;  %v149_v15 = vld [vmem:[#allocation3] sm:$0x3] }
   0x9   :  { %2321 = vmatpush3.bf16.msra.mxu1 %v2623_v13  ;;  %v192_v16 = vld [vmem:[#allocation4] sm:$0x3]  ;;  %158 = vrot.lane.b32.xlu1 %v149_v15, %s2543_s2  ;;  %v267_v17 = vld [vmem:[#allocation5] sm:$0x3] }
   0xa   :  { %2322 = vmatprep.subr.bf16.mxu0 %v2540_v0  ;;  %2328 = vmatprep.subr.bf16.mxu1 %v2540_v0 }
   0xb   :  { %2143 = vmatmul.mubr.msk.f32.vlgmr.msra.gmra.mrb[0].mxu0 %vm74_vm2, %v73_v14 }
   0xc   :  { %2154 = vmatmul.mubr.msk.f32.vlgmr.msra.gmra.mrb[0].mxu1 %vm74_vm2, %v192_v16  ;;  %2324 = vmatpush3.bf16.msra.mxu0 %v2595_v5 }
   0xd   :  { %276 = vrot.lane.b32.xlu1 %v267_v17, %s2543_s2  ;;  %2325 = vmatprep.subr.bf16.mxu0 %v2540_v0 }
   0xe   :  { %2330 = vmatpush3.bf16.msra.mxu1 %v2610_v9  ;;  %2164 = vmatprep.mubr.msk.f32.mxu0 %vm2542_vm1, %v2541_v4 }
   0xf   :  { %2331 = vmatprep.subr.bf16.mxu1 %v2540_v0  ;;  %2175 = vmatprep.mubr.msk.f32.mxu1 %vm2542_vm1, %v2541_v4 }
  0x10   :  { %2327 = vmatpush3.bf16.msra.mxu0 %v2619_v12 }
  0x11   :  { %2334 = vmatprep.subr.bf16.mxu0 %v2540_v0 }
  0x12   :  { %2333 = vmatpush3.bf16.msra.mxu1 %v2623_v13 }
  0x13   :  { %2340 = vmatprep.subr.bf16.mxu1 %v2540_v0 }
  0x7b   :  { %v159_v40 = vpop.permute.xlu1 %158 }
  0x7f   :  { %v277_v42 = vpop.permute.xlu1 %276 }
  0xde   :  { %v144_v20 = vpop.f32.mrb[0].mxu0 }
  0xdf   :  { %v148_v21 = vadd.f32 %v144_v20, %v72_v18  ;;  %v2144_v22 = vpop.f32.mrb[1].mxu0  ;;  %v262_v23 = vpop.f32.mrb[0].mxu1 }
  0xe0   :  { %v266_v24 = vadd.f32 %v1996_v19, %v262_v23  ;;  %v2155_v25 = vpop.f32.mrb[1].mxu1 }
  0xe1   :  { %2412 = vtanh.f32 %v148_v21  ;;  %v1995_v28 = vmul.f32 -1.442695, %v148_v21 }
  0xe2   :  { %2414 = vtanh.f32 %v266_v24  ;;  %v1998_v29 = vmul.f32 -1.442695, %v266_v24 }
  0xe3   :  { %2416 = vpow2.f32 %v1995_v28 }
  0xe4   :  { %2418 = vpow2.f32 %v1998_v29 }
  0xeb   :  { %v2413_v26 = vpop.eup %2412 }
  0xec   :  { %163 = vrot.lane.b32.xlu0 %v2413_v26, %s2544_s12  ;;  %v2415_v27 = vpop.eup %2414 }
  0xed   :  { %v2417_v30 = vpop.eup %2416 }
  0xee   :  { %v153_v31 = vadd.f32 1.0, %v2417_v30  ;;  %v2419_v32 = vpop.eup %2418 }
  0xef   :  { %v271_v33 = vadd.f32 1.0, %v2419_v32 }
  0xf0   :  { %281 = vrot.lane.b32.xlu0 %v2415_v27, %s2544_s12  ;;  %2420 = vrcp.f32 %v153_v31 }
  0xf1   :  { %2422 = vrcp.f32 %v271_v33 }
  0xfa   :  { %v2421_v34 = vpop.eup %2420 }
  0xfb   :  { %v2423_v37 = vpop.eup %2422  ;;  %v161_v41 = vmul.f32 %v2421_v34, %v159_v40 }
  0xfc   :  { %v279_v45 = vmul.f32 %v2423_v37, %v277_v42 }
 0x15e   :  { %v164_v35 = vpop.permute.xlu0 %163 }
 0x15f   :  { %v166_v36 = vmul.f32 %v2421_v34, %v164_v35 }
 0x161   :  { %168 = vrot.lane.b32.xlu0 %v166_v36, %s2543_s2 }
 0x162   :  { %v282_v38 = vpop.permute.xlu0 %281 }
 0x163   :  { %v284_v39 = vmul.f32 %v2423_v37, %v282_v38 }
 0x165   :  { %286 = vrot.lane.b32.xlu1 %v284_v39, %s2543_s2 }
 0x1d3   :  { %v169_v43 = vpop.permute.xlu0 %168 }
 0x1d4   :  { %v171_v44 = vadd.f32 %v169_v43, %v161_v41 }
 0x1d6   :  { %2424 = vtanh.f32 %v171_v44 }
 0x1d7   :  { %v287_v46 = vpop.permute.xlu1 %286 }
 0x1d8   :  { %v289_v47 = vadd.f32 %v287_v46, %v279_v45  ;;  %v2008_v46 = vld [vmem:[%s2970_s0 + $0x4] sm:$0x3] }
 0x1da   :  { %2426 = vtanh.f32 %v289_v47 }
 0x1e0   :  { %v2425_v48 = vpop.eup %2424 }
 0x1e1   :  { %174 = vrot.lane.b32.xlu0 %v2425_v48, %s2544_s12 }
 0x1e4   :  { %v2427_v49 = vpop.eup %2426 }
 0x1e5   :  { %292 = vrot.lane.b32.xlu1 %v2427_v49, %s2544_s12 }
 0x253   :  { %v175_v50 = vpop.permute.xlu0 %174 }
 0x254   :  { %v177_v51 = vmul.f32 %v2421_v34, %v175_v50  ;;  %v2012_v50 = vld [vmem:[%s2971_s1 + $0xa] sm:$0x3] }
 0x256   :  { %179 = vrot.lane.b32.xlu0 %v177_v51, %s2543_s2 }
 0x257   :  { %v293_v52 = vpop.permute.xlu1 %292 }
 0x258   :  { %v295_v53 = vmul.f32 %v2423_v37, %v293_v52 }
 0x25a   :  { %297 = vrot.lane.b32.xlu1 %v295_v53, %s2543_s2  ;;  %185 = vrot.lane.b32.xlu0 %v171_v44, %s2545_s13 }
 0x25e   :  { %302 = vrot.lane.b32.xlu1 %v289_v47, %s2545_s13 }
 0x2c8   :  { %v180_v54 = vpop.permute.xlu0 %179 }
 0x2c9   :  { %183 = vst.msk [vmem:[#allocation2] sm:$0x3] %vm59_vm0, %v180_v54  ;;  %189 = vst.msk [vmem:[%s2972_s4] sm:$0x3] %vm59_vm0, %v180_v54 }
 0x2cc   :  { %v298_v55 = vpop.permute.xlu1 %297  ;;  %v186_v56 = vpop.permute.xlu0 %185 }
 0x2cd   :  { %300 = vst.msk [vmem:[#allocation4] sm:$0x3] %vm59_vm0, %v298_v55  ;;  %1999 = vst.msk [vmem:[%s2973_s5 + $0xe] sm:$0x3] %vm59_vm0, %v298_v55 }
 0x2ce   :  { %188 = vst.msk [vmem:[#allocation3] sm:$0x3] %vm59_vm0, %v186_v56 }
 0x2d0   :  { %v303_v57 = vpop.permute.xlu1 %302  ;;  %v310_v58 = vld [vmem:[#allocation2] sm:$0x3] }
 0x2d1   :  { %305 = vst.msk [vmem:[#allocation5] sm:$0x3] %vm59_vm0, %v303_v57  ;;  %2165 = vmatmul.mubr.msk.f32.vlgmr.msra.gmra.mrb[2].mxu0 %vm74_vm2, %v310_v58 }
 0x2d2   :  { %2336 = vmatpush3.bf16.msra.mxu0 %v2595_v5  ;;  %2186 = vmatprep.mubr.msk.f32.mxu0 %vm2542_vm1, %v2541_v4 }
 0x2d3   :  { %2337 = vmatprep.subr.bf16.mxu0 %v2540_v0 }
 0x2d4   :  { %v428_v59 = vld [vmem:[#allocation4] sm:$0x3] }
 0x2d5   :  { %2176 = vmatmul.mubr.msk.f32.vlgmr.msra.gmra.mrb[2].mxu1 %vm74_vm2, %v428_v59  ;;  %v385_v10 = vld [vmem:[#allocation3] sm:$0x3] }
 0x2d6   :  { %2339 = vmatpush3.bf16.msra.mxu0 %v2619_v12  ;;  %2342 = vmatpush3.bf16.msra.mxu1 %v2610_v9 }
 0x2d7   :  { %2343 = vmatprep.subr.bf16.mxu1 %v2540_v0  ;;  %2197 = vmatprep.mubr.msk.f32.mxu1 %vm2542_vm1, %v2541_v4 }
 0x2d8   :  { %2346 = vmatprep.subr.bf16.mxu0 %v2540_v0  ;;  %v503_v11 = vld [vmem:[#allocation5] sm:$0x3] }
 0x2da   :  { %2345 = vmatpush3.bf16.msra.mxu1 %v2623_v13 }
 0x2db   :  { %2352 = vmatprep.subr.bf16.mxu1 %v2540_v0 }
 0x3a4   :  { %v380_v61 = vpop.f32.mrb[2].mxu0 }
 0x3a5   :  { %v384_v62 = vadd.f32 %v2000_v60, %v380_v61  ;;  %v2166_v63 = vpop.f32.mrb[3].mxu0 }
 0x3a7   :  { %2428 = vtanh.f32 %v384_v62  ;;  %v2002_v14 = vmul.f32 -1.442695, %v384_v62 }
 0x3a8   :  { %v498_v2 = vpop.f32.mrb[2].mxu1 }
 0x3a9   :  { %v502_v3 = vadd.f32 %v2004_v1, %v498_v2  ;;  %v2177_v6 = vpop.f32.mrb[3].mxu1 }
 0x3ab   :  { %2430 = vtanh.f32 %v502_v3  ;;  %v2006_v15 = vmul.f32 -1.442695, %v502_v3 }
 0x3ac   :  { %2432 = vpow2.f32 %v2002_v14 }
 0x3ad   :  { %2434 = vpow2.f32 %v2006_v15 }
 0x3b1   :  { %v2429_v7 = vpop.eup %2428 }
 0x3b2   :  { %399 = vrot.lane.b32.xlu0 %v2429_v7, %s2544_s12 }
 0x3b5   :  { %v2431_v8 = vpop.eup %2430 }
 0x3b6   :  { %517 = vrot.lane.b32.xlu1 %v2431_v8, %s2544_s12  ;;  %394 = vrot.lane.b32.xlu0 %v385_v10, %s2543_s2  ;;  %v2433_v16 = vpop.eup %2432 }
 0x3b7   :  { %v389_v17 = vadd.f32 1.0, %v2433_v16  ;;  %v2435_v18 = vpop.eup %2434 }
 0x3b8   :  { %v507_v19 = vadd.f32 1.0, %v2435_v18 }
 0x3b9   :  { %2436 = vrcp.f32 %v389_v17 }
 0x3ba   :  { %512 = vrot.lane.b32.xlu1 %v503_v11, %s2543_s2  ;;  %2438 = vrcp.f32 %v507_v19 }
 0x3c3   :  { %v2437_v20 = vpop.eup %2436 }
 0x3c4   :  { %v2439_v23 = vpop.eup %2438 }
 0x424   :  { %v400_v21 = vpop.permute.xlu0 %399 }
 0x425   :  { %v402_v22 = vmul.f32 %v2437_v20, %v400_v21 }
 0x427   :  { %404 = vrot.lane.b32.xlu0 %v402_v22, %s2543_s2 }
 0x428   :  { %v518_v24 = vpop.permute.xlu1 %517  ;;  %v395_v26 = vpop.permute.xlu0 %394 }
 0x429   :  { %v520_v25 = vmul.f32 %v2439_v23, %v518_v24  ;;  %v397_v27 = vmul.f32 %v2437_v20, %v395_v26 }
 0x42b   :  { %522 = vrot.lane.b32.xlu1 %v520_v25, %s2543_s2 }
 0x42c   :  { %v513_v28 = vpop.permute.xlu1 %512 }
 0x42d   :  { %v515_v31 = vmul.f32 %v2439_v23, %v513_v28 }
 0x499   :  { %v405_v29 = vpop.permute.xlu0 %404 }
 0x49a   :  { %v407_v30 = vadd.f32 %v405_v29, %v397_v27 }
 0x49c   :  { %2440 = vtanh.f32 %v407_v30 }
 0x49d   :  { %v523_v32 = vpop.permute.xlu1 %522 }
 0x49e   :  { %v525_v33 = vadd.f32 %v523_v32, %v515_v31  ;;  %v2016_v32 = vld [vmem:[%s2970_s0 + $0x6] sm:$0x3] }
 0x4a0   :  { %2442 = vtanh.f32 %v525_v33 }
 0x4a6   :  { %v2441_v34 = vpop.eup %2440 }
 0x4a7   :  { %410 = vrot.lane.b32.xlu0 %v2441_v34, %s2544_s12 }
 0x4aa   :  { %v2443_v35 = vpop.eup %2442 }
 0x4ab   :  { %528 = vrot.lane.b32.xlu1 %v2443_v35, %s2544_s12 }
 0x519   :  { %v411_v36 = vpop.permute.xlu0 %410 }
 0x51a   :  { %v413_v37 = vmul.f32 %v2437_v20, %v411_v36  ;;  %v2020_v36 = vld [vmem:[%s2971_s1 + $0x8] sm:$0x3] }
 0x51c   :  { %415 = vrot.lane.b32.xlu0 %v413_v37, %s2543_s2 }
 0x51d   :  { %v529_v38 = vpop.permute.xlu1 %528 }
 0x51e   :  { %v531_v39 = vmul.f32 %v2439_v23, %v529_v38 }
 0x520   :  { %533 = vrot.lane.b32.xlu1 %v531_v39, %s2543_s2  ;;  %420 = vrot.lane.b32.xlu0 %v407_v30, %s2545_s13 }
 0x524   :  { %538 = vrot.lane.b32.xlu1 %v525_v33, %s2545_s13 }
 0x58e   :  { %v416_v40 = vpop.permute.xlu0 %415 }
 0x58f   :  { %418 = vst.msk [vmem:[#allocation2] sm:$0x3] %vm59_vm0, %v416_v40  ;;  %2003 = vst.msk [vmem:[%s2972_s4 + $0x2] sm:$0x3] %vm59_vm0, %v416_v40 }
 0x592   :  { %v534_v41 = vpop.permute.xlu1 %533  ;;  %v421_v42 = vpop.permute.xlu0 %420 }
 0x593   :  { %536 = vst.msk [vmem:[#allocation4] sm:$0x3] %vm59_vm0, %v534_v41  ;;  %2007 = vst.msk [vmem:[%s2973_s5 + $0xc] sm:$0x3] %vm59_vm0, %v534_v41 }
 0x594   :  { %423 = vst.msk [vmem:[#allocation3] sm:$0x3] %vm59_vm0, %v421_v42 }
 0x596   :  { %v539_v43 = vpop.permute.xlu1 %538  ;;  %v546_v44 = vld [vmem:[#allocation2] sm:$0x3] }
 0x597   :  { %541 = vst.msk [vmem:[#allocation5] sm:$0x3] %vm59_vm0, %v539_v43  ;;  %2187 = vmatmul.mubr.msk.f32.vlgmr.msra.gmra.mrb[4].mxu0 %vm74_vm2, %v546_v44 }
 0x598   :  { %2348 = vmatpush3.bf16.msra.mxu0 %v2595_v5  ;;  %2208 = vmatprep.mubr.msk.f32.mxu0 %vm2542_vm1, %v2541_v4 }
 0x599   :  { %2349 = vmatprep.subr.bf16.mxu0 %v2540_v0 }
 0x59a   :  { %v664_v45 = vld [vmem:[#allocation4] sm:$0x3] }
 0x59b   :  { %2198 = vmatmul.mubr.msk.f32.vlgmr.msra.gmra.mrb[4].mxu1 %vm74_vm2, %v664_v45  ;;  %v621_v56 = vld [vmem:[#allocation3] sm:$0x3] }
 0x59c   :  { %2351 = vmatpush3.bf16.msra.mxu0 %v2619_v12  ;;  %2354 = vmatpush3.bf16.msra.mxu1 %v2610_v9 }
 0x59d   :  { %2355 = vmatprep.subr.bf16.mxu1 %v2540_v0  ;;  %2219 = vmatprep.mubr.msk.f32.mxu1 %vm2542_vm1, %v2541_v4 }
 0x59e   :  { %2358 = vmatprep.subr.bf16.mxu0 %v2540_v0  ;;  %v739_v57 = vld [vmem:[#allocation5] sm:$0x3] }
 0x5a0   :  { %2357 = vmatpush3.bf16.msra.mxu1 %v2623_v13 }
 0x5a1   :  { %2364 = vmatprep.subr.bf16.mxu1 %v2540_v0 }
 0x66a   :  { %v616_v47 = vpop.f32.mrb[4].mxu0 }
 0x66b   :  { %v620_v48 = vadd.f32 %v2008_v46, %v616_v47  ;;  %v2188_v49 = vpop.f32.mrb[5].mxu0 }
 0x66d   :  { %2444 = vtanh.f32 %v620_v48  ;;  %v2010_v58 = vmul.f32 -1.442695, %v620_v48 }
 0x66e   :  { %v734_v51 = vpop.f32.mrb[4].mxu1 }
 0x66f   :  { %v738_v52 = vadd.f32 %v2012_v50, %v734_v51  ;;  %v2199_v53 = vpop.f32.mrb[5].mxu1 }
 0x671   :  { %2446 = vtanh.f32 %v738_v52  ;;  %v2014_v59 = vmul.f32 -1.442695, %v738_v52 }
 0x672   :  { %2448 = vpow2.f32 %v2010_v58 }
 0x673   :  { %2450 = vpow2.f32 %v2014_v59 }
 0x677   :  { %v2445_v54 = vpop.eup %2444 }
 0x678   :  { %635 = vrot.lane.b32.xlu0 %v2445_v54, %s2544_s12 }
 0x67b   :  { %v2447_v55 = vpop.eup %2446 }
 0x67c   :  { %753 = vrot.lane.b32.xlu1 %v2447_v55, %s2544_s12  ;;  %630 = vrot.lane.b32.xlu0 %v621_v56, %s2543_s2  ;;  %v2449_v60 = vpop.eup %2448 }
 0x67d   :  { %v625_v61 = vadd.f32 1.0, %v2449_v60  ;;  %v2451_v62 = vpop.eup %2450 }
 0x67e   :  { %v743_v63 = vadd.f32 1.0, %v2451_v62 }
 0x67f   :  { %2452 = vrcp.f32 %v625_v61 }
 0x680   :  { %748 = vrot.lane.b32.xlu1 %v739_v57, %s2543_s2  ;;  %2454 = vrcp.f32 %v743_v63 }
 0x689   :  { %v2453_v1 = vpop.eup %2452 }
 0x68a   :  { %v2455_v6 = vpop.eup %2454 }
 0x6ea   :  { %v636_v2 = vpop.permute.xlu0 %635 }
 0x6eb   :  { %v638_v3 = vmul.f32 %v2453_v1, %v636_v2 }
 0x6ed   :  { %640 = vrot.lane.b32.xlu0 %v638_v3, %s2543_s2 }
 0x6ee   :  { %v754_v7 = vpop.permute.xlu1 %753  ;;  %v631_v10 = vpop.permute.xlu0 %630 }
 0x6ef   :  { %v756_v8 = vmul.f32 %v2455_v6, %v754_v7  ;;  %v633_v11 = vmul.f32 %v2453_v1, %v631_v10 }
 0x6f1   :  { %758 = vrot.lane.b32.xlu1 %v756_v8, %s2543_s2 }
 0x6f2   :  { %v749_v14 = vpop.permute.xlu1 %748 }
 0x6f3   :  { %v751_v17 = vmul.f32 %v2455_v6, %v749_v14 }
 0x75f   :  { %v641_v15 = vpop.permute.xlu0 %640 }
 0x760   :  { %v643_v16 = vadd.f32 %v641_v15, %v633_v11 }
 0x762   :  { %2456 = vtanh.f32 %v643_v16 }
 0x763   :  { %v759_v18 = vpop.permute.xlu1 %758 }
 0x764   :  { %v761_v19 = vadd.f32 %v759_v18, %v751_v17  ;;  %v2024_v18 = vld [vmem:[%s2970_s0 + $0x8] sm:$0x3] }
 0x766   :  { %2458 = vtanh.f32 %v761_v19 }
 0x76c   :  { %v2457_v20 = vpop.eup %2456 }
 0x76d   :  { %646 = vrot.lane.b32.xlu0 %v2457_v20, %s2544_s12 }
 0x770   :  { %v2459_v21 = vpop.eup %2458 }
 0x771   :  { %764 = vrot.lane.b32.xlu1 %v2459_v21, %s2544_s12 }
 0x7df   :  { %v647_v22 = vpop.permute.xlu0 %646 }
 0x7e0   :  { %v649_v23 = vmul.f32 %v2453_v1, %v647_v22  ;;  %v2028_v22 = vld [vmem:[%s2971_s1 + $0x6] sm:$0x3] }
 0x7e2   :  { %651 = vrot.lane.b32.xlu0 %v649_v23, %s2543_s2 }
 0x7e3   :  { %v765_v24 = vpop.permute.xlu1 %764 }
 0x7e4   :  { %v767_v25 = vmul.f32 %v2455_v6, %v765_v24 }
 0x7e6   :  { %769 = vrot.lane.b32.xlu1 %v767_v25, %s2543_s2  ;;  %656 = vrot.lane.b32.xlu0 %v643_v16, %s2545_s13 }
 0x7ea   :  { %774 = vrot.lane.b32.xlu1 %v761_v19, %s2545_s13 }
 0x854   :  { %v652_v26 = vpop.permute.xlu0 %651 }
 0x855   :  { %654 = vst.msk [vmem:[#allocation2] sm:$0x3] %vm59_vm0, %v652_v26  ;;  %2011 = vst.msk [vmem:[%s2972_s4 + $0x4] sm:$0x3] %vm59_vm0, %v652_v26 }
 0x858   :  { %v770_v27 = vpop.permute.xlu1 %769  ;;  %v657_v28 = vpop.permute.xlu0 %656 }
 0x859   :  { %772 = vst.msk [vmem:[#allocation4] sm:$0x3] %vm59_vm0, %v770_v27  ;;  %2015 = vst.msk [vmem:[%s2973_s5 + $0xa] sm:$0x3] %vm59_vm0, %v770_v27 }
 0x85a   :  { %659 = vst.msk [vmem:[#allocation3] sm:$0x3] %vm59_vm0, %v657_v28 }
 0x85c   :  { %v775_v29 = vpop.permute.xlu1 %774  ;;  %v782_v30 = vld [vmem:[#allocation2] sm:$0x3] }
 0x85d   :  { %777 = vst.msk [vmem:[#allocation5] sm:$0x3] %vm59_vm0, %v775_v29  ;;  %2209 = vmatmul.mubr.msk.f32.vlgmr.msra.gmra.mrb[6].mxu0 %vm74_vm2, %v782_v30 }
 0x85e   :  { %2360 = vmatpush3.bf16.msra.mxu0 %v2595_v5  ;;  %2230 = vmatprep.mubr.msk.f32.mxu0 %vm2542_vm1, %v2541_v4 }
 0x85f   :  { %2361 = vmatprep.subr.bf16.mxu0 %v2540_v0 }
 0x860   :  { %v900_v31 = vld [vmem:[#allocation4] sm:$0x3] }
 0x861   :  { %2220 = vmatmul.mubr.msk.f32.vlgmr.msra.gmra.mrb[6].mxu1 %vm74_vm2, %v900_v31  ;;  %v857_v42 = vld [vmem:[#allocation3] sm:$0x3] }
 0x862   :  { %2363 = vmatpush3.bf16.msra.mxu0 %v2619_v12  ;;  %2366 = vmatpush3.bf16.msra.mxu1 %v2610_v9 }
 0x863   :  { %2367 = vmatprep.subr.bf16.mxu1 %v2540_v0  ;;  %2241 = vmatprep.mubr.msk.f32.mxu1 %vm2542_vm1, %v2541_v4 }
 0x864   :  { %2370 = vmatprep.subr.bf16.mxu0 %v2540_v0  ;;  %v975_v43 = vld [vmem:[#allocation5] sm:$0x3] }
 0x866   :  { %2369 = vmatpush3.bf16.msra.mxu1 %v2623_v13 }
 0x867   :  { %2376 = vmatprep.subr.bf16.mxu1 %v2540_v0 }
 0x930   :  { %v852_v33 = vpop.f32.mrb[6].mxu0 }
 0x931   :  { %v856_v34 = vadd.f32 %v2016_v32, %v852_v33  ;;  %v2210_v35 = vpop.f32.mrb[7].mxu0 }
 0x933   :  { %2460 = vtanh.f32 %v856_v34  ;;  %v2018_v44 = vmul.f32 -1.442695, %v856_v34 }
 0x934   :  { %v970_v37 = vpop.f32.mrb[6].mxu1 }
 0x935   :  { %v974_v38 = vadd.f32 %v2020_v36, %v970_v37  ;;  %v2221_v39 = vpop.f32.mrb[7].mxu1 }
 0x937   :  { %2462 = vtanh.f32 %v974_v38  ;;  %v2022_v45 = vmul.f32 -1.442695, %v974_v38 }
 0x938   :  { %2464 = vpow2.f32 %v2018_v44 }
 0x939   :  { %2466 = vpow2.f32 %v2022_v45 }
 0x93d   :  { %v2461_v40 = vpop.eup %2460 }
 0x93e   :  { %871 = vrot.lane.b32.xlu0 %v2461_v40, %s2544_s12 }
 0x941   :  { %v2463_v41 = vpop.eup %2462 }
 0x942   :  { %989 = vrot.lane.b32.xlu1 %v2463_v41, %s2544_s12  ;;  %866 = vrot.lane.b32.xlu0 %v857_v42, %s2543_s2  ;;  %v2465_v46 = vpop.eup %2464 }
 0x943   :  { %v861_v47 = vadd.f32 1.0, %v2465_v46  ;;  %v2467_v48 = vpop.eup %2466 }
 0x944   :  { %v979_v49 = vadd.f32 1.0, %v2467_v48 }
 0x945   :  { %2468 = vrcp.f32 %v861_v47 }
 0x946   :  { %984 = vrot.lane.b32.xlu1 %v975_v43, %s2543_s2  ;;  %2470 = vrcp.f32 %v979_v49 }
 0x94f   :  { %v2469_v50 = vpop.eup %2468 }
 0x950   :  { %v2471_v53 = vpop.eup %2470 }
 0x9b0   :  { %v872_v51 = vpop.permute.xlu0 %871 }
 0x9b1   :  { %v874_v52 = vmul.f32 %v2469_v50, %v872_v51 }
 0x9b3   :  { %876 = vrot.lane.b32.xlu0 %v874_v52, %s2543_s2 }
 0x9b4   :  { %v990_v54 = vpop.permute.xlu1 %989  ;;  %v867_v56 = vpop.permute.xlu0 %866 }
 0x9b5   :  { %v992_v55 = vmul.f32 %v2471_v53, %v990_v54  ;;  %v869_v57 = vmul.f32 %v2469_v50, %v867_v56 }
 0x9b7   :  { %994 = vrot.lane.b32.xlu1 %v992_v55, %s2543_s2 }
 0x9b8   :  { %v985_v58 = vpop.permute.xlu1 %984 }
 0x9b9   :  { %v987_v61 = vmul.f32 %v2471_v53, %v985_v58 }
 0xa25   :  { %v877_v59 = vpop.permute.xlu0 %876 }
 0xa26   :  { %v879_v60 = vadd.f32 %v877_v59, %v869_v57 }
 0xa28   :  { %2472 = vtanh.f32 %v879_v60 }
 0xa29   :  { %v995_v62 = vpop.permute.xlu1 %994 }
 0xa2a   :  { %v997_v63 = vadd.f32 %v995_v62, %v987_v61  ;;  %v2032_v62 = vld [vmem:[%s2970_s0 + $0xa] sm:$0x3] }
 0xa2c   :  { %2474 = vtanh.f32 %v997_v63 }
 0xa32   :  { %v2473_v1 = vpop.eup %2472 }
 0xa33   :  { %882 = vrot.lane.b32.xlu0 %v2473_v1, %s2544_s12 }
 0xa36   :  { %v2475_v2 = vpop.eup %2474 }
 0xa37   :  { %1000 = vrot.lane.b32.xlu1 %v2475_v2, %s2544_s12 }
 0xaa5   :  { %v883_v3 = vpop.permute.xlu0 %882 }
 0xaa6   :  { %v885_v6 = vmul.f32 %v2469_v50, %v883_v3  ;;  %v2036_v3 = vld [vmem:[%s2971_s1 + $0x4] sm:$0x3] }
 0xaa8   :  { %887 = vrot.lane.b32.xlu0 %v885_v6, %s2543_s2 }
 0xaa9   :  { %v1001_v7 = vpop.permute.xlu1 %1000 }
 0xaaa   :  { %v1003_v8 = vmul.f32 %v2471_v53, %v1001_v7 }
 0xaac   :  { %1005 = vrot.lane.b32.xlu1 %v1003_v8, %s2543_s2  ;;  %892 = vrot.lane.b32.xlu0 %v879_v60, %s2545_s13 }
 0xab0   :  { %1010 = vrot.lane.b32.xlu1 %v997_v63, %s2545_s13 }
 0xb1a   :  { %v888_v10 = vpop.permute.xlu0 %887 }
 0xb1b   :  { %890 = vst.msk [vmem:[#allocation2] sm:$0x3] %vm59_vm0, %v888_v10  ;;  %2019 = vst.msk [vmem:[%s2972_s4 + $0x6] sm:$0x3] %vm59_vm0, %v888_v10 }
 0xb1e   :  { %v1006_v11 = vpop.permute.xlu1 %1005  ;;  %v893_v14 = vpop.permute.xlu0 %892 }
 0xb1f   :  { %1008 = vst.msk [vmem:[#allocation4] sm:$0x3] %vm59_vm0, %v1006_v11  ;;  %2023 = vst.msk [vmem:[%s2973_s5 + $0x8] sm:$0x3] %vm59_vm0, %v1006_v11 }
 0xb20   :  { %895 = vst.msk [vmem:[#allocation3] sm:$0x3] %vm59_vm0, %v893_v14 }
 0xb22   :  { %v1011_v15 = vpop.permute.xlu1 %1010  ;;  %v1018_v16 = vld [vmem:[#allocation2] sm:$0x3] }
 0xb23   :  { %1013 = vst.msk [vmem:[#allocation5] sm:$0x3] %vm59_vm0, %v1011_v15  ;;  %2231 = vmatmul.mubr.msk.f32.vlgmr.msra.gmra.mrb[8].mxu0 %vm74_vm2, %v1018_v16 }
 0xb24   :  { %2372 = vmatpush3.bf16.msra.mxu0 %v2595_v5  ;;  %2252 = vmatprep.mubr.msk.f32.mxu0 %vm2542_vm1, %v2541_v4 }
 0xb25   :  { %2373 = vmatprep.subr.bf16.mxu0 %v2540_v0 }
 0xb26   :  { %v1136_v17 = vld [vmem:[#allocation4] sm:$0x3] }
 0xb27   :  { %2242 = vmatmul.mubr.msk.f32.vlgmr.msra.gmra.mrb[8].mxu1 %vm74_vm2, %v1136_v17  ;;  %v1093_v28 = vld [vmem:[#allocation3] sm:$0x3] }
 0xb28   :  { %2375 = vmatpush3.bf16.msra.mxu0 %v2619_v12  ;;  %2378 = vmatpush3.bf16.msra.mxu1 %v2610_v9 }
 0xb29   :  { %2379 = vmatprep.subr.bf16.mxu1 %v2540_v0  ;;  %2263 = vmatprep.mubr.msk.f32.mxu1 %vm2542_vm1, %v2541_v4 }
 0xb2a   :  { %2382 = vmatprep.subr.bf16.mxu0 %v2540_v0  ;;  %v1211_v29 = vld [vmem:[#allocation5] sm:$0x3] }
 0xb2c   :  { %2381 = vmatpush3.bf16.msra.mxu1 %v2623_v13 }
 0xb2d   :  { %2388 = vmatprep.subr.bf16.mxu1 %v2540_v0 }
 0xbf6   :  { %v1088_v19 = vpop.f32.mrb[8].mxu0 }
 0xbf7   :  { %v1092_v20 = vadd.f32 %v2024_v18, %v1088_v19  ;;  %v2232_v21 = vpop.f32.mrb[9].mxu0 }
 0xbf9   :  { %2476 = vtanh.f32 %v1092_v20  ;;  %v2026_v30 = vmul.f32 -1.442695, %v1092_v20 }
 0xbfa   :  { %v1206_v23 = vpop.f32.mrb[8].mxu1 }
 0xbfb   :  { %v1210_v24 = vadd.f32 %v2028_v22, %v1206_v23  ;;  %v2243_v25 = vpop.f32.mrb[9].mxu1 }
 0xbfd   :  { %2478 = vtanh.f32 %v1210_v24  ;;  %v2030_v31 = vmul.f32 -1.442695, %v1210_v24 }
 0xbfe   :  { %2480 = vpow2.f32 %v2026_v30 }
 0xbff   :  { %2482 = vpow2.f32 %v2030_v31 }
 0xc03   :  { %v2477_v26 = vpop.eup %2476 }
 0xc04   :  { %1107 = vrot.lane.b32.xlu0 %v2477_v26, %s2544_s12 }
 0xc07   :  { %v2479_v27 = vpop.eup %2478 }
 0xc08   :  { %1225 = vrot.lane.b32.xlu1 %v2479_v27, %s2544_s12  ;;  %1102 = vrot.lane.b32.xlu0 %v1093_v28, %s2543_s2  ;;  %v2481_v32 = vpop.eup %2480 }
 0xc09   :  { %v1097_v33 = vadd.f32 1.0, %v2481_v32  ;;  %v2483_v34 = vpop.eup %2482 }
 0xc0a   :  { %v1215_v35 = vadd.f32 1.0, %v2483_v34 }
 0xc0b   :  { %2484 = vrcp.f32 %v1097_v33 }
 0xc0c   :  { %1220 = vrot.lane.b32.xlu1 %v1211_v29, %s2543_s2  ;;  %2486 = vrcp.f32 %v1215_v35 }
 0xc15   :  { %v2485_v36 = vpop.eup %2484 }
 0xc16   :  { %v2487_v39 = vpop.eup %2486 }
 0xc76   :  { %v1108_v37 = vpop.permute.xlu0 %1107 }
 0xc77   :  { %v1110_v38 = vmul.f32 %v2485_v36, %v1108_v37 }
 0xc79   :  { %1112 = vrot.lane.b32.xlu0 %v1110_v38, %s2543_s2 }
 0xc7a   :  { %v1226_v40 = vpop.permute.xlu1 %1225  ;;  %v1103_v42 = vpop.permute.xlu0 %1102 }
 0xc7b   :  { %v1228_v41 = vmul.f32 %v2487_v39, %v1226_v40  ;;  %v1105_v43 = vmul.f32 %v2485_v36, %v1103_v42 }
 0xc7d   :  { %1230 = vrot.lane.b32.xlu1 %v1228_v41, %s2543_s2 }
 0xc7e   :  { %v1221_v44 = vpop.permute.xlu1 %1220 }
 0xc7f   :  { %v1223_v47 = vmul.f32 %v2487_v39, %v1221_v44 }
 0xceb   :  { %v1113_v45 = vpop.permute.xlu0 %1112 }
 0xcec   :  { %v1115_v46 = vadd.f32 %v1113_v45, %v1105_v43 }
 0xcee   :  { %2488 = vtanh.f32 %v1115_v46 }
 0xcef   :  { %v1231_v48 = vpop.permute.xlu1 %1230 }
 0xcf0   :  { %v1233_v49 = vadd.f32 %v1231_v48, %v1223_v47 }
 0xcf2   :  { %2490 = vtanh.f32 %v1233_v49 }
 0xcf8   :  { %v2489_v50 = vpop.eup %2488 }
 0xcf9   :  { %1118 = vrot.lane.b32.xlu0 %v2489_v50, %s2544_s12 }
 0xcfc   :  { %v2491_v51 = vpop.eup %2490 }
 0xcfd   :  { %1236 = vrot.lane.b32.xlu1 %v2491_v51, %s2544_s12 }
 0xd6b   :  { %v1119_v52 = vpop.permute.xlu0 %1118 }
 0xd6c   :  { %v1121_v53 = vmul.f32 %v2485_v36, %v1119_v52 }
 0xd6e   :  { %1123 = vrot.lane.b32.xlu0 %v1121_v53, %s2543_s2 }
 0xd6f   :  { %v1237_v54 = vpop.permute.xlu1 %1236 }
 0xd70   :  { %v1239_v55 = vmul.f32 %v2487_v39, %v1237_v54 }
 0xd72   :  { %1241 = vrot.lane.b32.xlu1 %v1239_v55, %s2543_s2  ;;  %1128 = vrot.lane.b32.xlu0 %v1115_v46, %s2545_s13 }
 0xd76   :  { %1246 = vrot.lane.b32.xlu1 %v1233_v49, %s2545_s13 }
 0xde0   :  { %v1124_v56 = vpop.permute.xlu0 %1123 }
 0xde1   :  { %1126 = vst.msk [vmem:[#allocation2] sm:$0x3] %vm59_vm0, %v1124_v56  ;;  %2027 = vst.msk [vmem:[%s2972_s4 + $0x8] sm:$0x3] %vm59_vm0, %v1124_v56 }
 0xde4   :  { %v1242_v57 = vpop.permute.xlu1 %1241  ;;  %v1129_v58 = vpop.permute.xlu0 %1128 }
 0xde5   :  { %1244 = vst.msk [vmem:[#allocation4] sm:$0x3] %vm59_vm0, %v1242_v57  ;;  %2031 = vst.msk [vmem:[%s2973_s5 + $0x6] sm:$0x3] %vm59_vm0, %v1242_v57 }
 0xde6   :  { %1131 = vst.msk [vmem:[#allocation3] sm:$0x3] %vm59_vm0, %v1129_v58 }
 0xde8   :  { %v1247_v59 = vpop.permute.xlu1 %1246  ;;  %v1254_v60 = vld [vmem:[#allocation2] sm:$0x3] }
 0xde9   :  { %1249 = vst.msk [vmem:[#allocation5] sm:$0x3] %vm59_vm0, %v1247_v59  ;;  %2253 = vmatmul.mubr.msk.f32.vlgmr.msra.gmra.mrb[10].mxu0 %vm74_vm2, %v1254_v60 }
 0xdea   :  { %2384 = vmatpush3.bf16.msra.mxu0 %v2595_v5  ;;  %2274 = vmatprep.mubr.msk.f32.mxu0 %vm2542_vm1, %v2541_v4 }
 0xdeb   :  { %2385 = vmatprep.subr.bf16.mxu0 %v2540_v0 }
 0xdec   :  { %v1372_v61 = vld [vmem:[#allocation4] sm:$0x3] }
 0xded   :  { %2264 = vmatmul.mubr.msk.f32.vlgmr.msra.gmra.mrb[10].mxu1 %vm74_vm2, %v1372_v61  ;;  %v1329_v14 = vld [vmem:[#allocation3] sm:$0x3] }
 0xdee   :  { %2387 = vmatpush3.bf16.msra.mxu0 %v2619_v12  ;;  %2390 = vmatpush3.bf16.msra.mxu1 %v2610_v9 }
 0xdef   :  { %2391 = vmatprep.subr.bf16.mxu1 %v2540_v0  ;;  %2285 = vmatprep.mubr.msk.f32.mxu1 %vm2542_vm1, %v2541_v4 }
 0xdf0   :  { %2394 = vmatprep.subr.bf16.mxu0 %v2540_v0  ;;  %v1447_v15 = vld [vmem:[#allocation5] sm:$0x3] }
 0xdf2   :  { %2393 = vmatpush3.bf16.msra.mxu1 %v2623_v13 }
 0xdf3   :  { %2400 = vmatprep.subr.bf16.mxu1 %v2540_v0 }
 0xebc   :  { %v1324_v63 = vpop.f32.mrb[10].mxu0 }
 0xebd   :  { %v1328_v1 = vadd.f32 %v2032_v62, %v1324_v63  ;;  %v2254_v2 = vpop.f32.mrb[11].mxu0 }
 0xebf   :  { %2492 = vtanh.f32 %v1328_v1  ;;  %v2034_v16 = vmul.f32 -1.442695, %v1328_v1 }
 0xec0   :  { %v1442_v6 = vpop.f32.mrb[10].mxu1 }
 0xec1   :  { %v1446_v7 = vadd.f32 %v2036_v3, %v1442_v6  ;;  %v2265_v8 = vpop.f32.mrb[11].mxu1 }
 0xec3   :  { %2494 = vtanh.f32 %v1446_v7  ;;  %v2038_v17 = vmul.f32 -1.442695, %v1446_v7 }
 0xec4   :  { %2496 = vpow2.f32 %v2034_v16 }
 0xec5   :  { %2498 = vpow2.f32 %v2038_v17 }
 0xec9   :  { %v2493_v10 = vpop.eup %2492 }
 0xeca   :  { %1343 = vrot.lane.b32.xlu0 %v2493_v10, %s2544_s12 }
 0xecd   :  { %v2495_v11 = vpop.eup %2494 }
 0xece   :  { %1461 = vrot.lane.b32.xlu1 %v2495_v11, %s2544_s12  ;;  %1338 = vrot.lane.b32.xlu0 %v1329_v14, %s2543_s2  ;;  %v2497_v18 = vpop.eup %2496 }
 0xecf   :  { %v1333_v19 = vadd.f32 1.0, %v2497_v18  ;;  %v2499_v20 = vpop.eup %2498 }
 0xed0   :  { %v1451_v21 = vadd.f32 1.0, %v2499_v20 }
 0xed1   :  { %2500 = vrcp.f32 %v1333_v19 }
 0xed2   :  { %1456 = vrot.lane.b32.xlu1 %v1447_v15, %s2543_s2  ;;  %2502 = vrcp.f32 %v1451_v21 }
 0xedb   :  { %v2501_v22 = vpop.eup %2500 }
 0xedc   :  { %v2503_v25 = vpop.eup %2502 }
 0xf3c   :  { %v1344_v23 = vpop.permute.xlu0 %1343 }
 0xf3d   :  { %v1346_v24 = vmul.f32 %v2501_v22, %v1344_v23 }
 0xf3f   :  { %1348 = vrot.lane.b32.xlu0 %v1346_v24, %s2543_s2 }
 0xf40   :  { %v1462_v26 = vpop.permute.xlu1 %1461  ;;  %v1339_v28 = vpop.permute.xlu0 %1338 }
 0xf41   :  { %v1464_v27 = vmul.f32 %v2503_v25, %v1462_v26  ;;  %v1341_v29 = vmul.f32 %v2501_v22, %v1339_v28  ;;  %v2048_v28 = vld [vmem:[%s2970_s0 + $0xe] sm:$0x3] }
 0xf43   :  { %1466 = vrot.lane.b32.xlu1 %v1464_v27, %s2543_s2 }
 0xf44   :  { %v1457_v30 = vpop.permute.xlu1 %1456 }
 0xf45   :  { %v1459_v33 = vmul.f32 %v2503_v25, %v1457_v30 }
 0xfb1   :  { %v1349_v31 = vpop.permute.xlu0 %1348 }
 0xfb2   :  { %v1351_v32 = vadd.f32 %v1349_v31, %v1341_v29 }
 0xfb4   :  { %2504 = vtanh.f32 %v1351_v32 }
 0xfb5   :  { %v1467_v34 = vpop.permute.xlu1 %1466 }
 0xfb6   :  { %v1469_v35 = vadd.f32 %v1467_v34, %v1459_v33 }
 0xfb8   :  { %2506 = vtanh.f32 %v1469_v35 }
 0xfbe   :  { %v2505_v36 = vpop.eup %2504 }
 0xfbf   :  { %1354 = vrot.lane.b32.xlu0 %v2505_v36, %s2544_s12 }
 0xfc2   :  { %v2507_v37 = vpop.eup %2506 }
 0xfc3   :  { %1472 = vrot.lane.b32.xlu1 %v2507_v37, %s2544_s12 }
0x1031   :  { %v1355_v38 = vpop.permute.xlu0 %1354 }
0x1032   :  { %v1357_v39 = vmul.f32 %v2501_v22, %v1355_v38 }
0x1034   :  { %1359 = vrot.lane.b32.xlu0 %v1357_v39, %s2543_s2 }
0x1035   :  { %v1473_v40 = vpop.permute.xlu1 %1472 }
0x1036   :  { %v1475_v41 = vmul.f32 %v2503_v25, %v1473_v40 }
0x1038   :  { %1477 = vrot.lane.b32.xlu1 %v1475_v41, %s2543_s2  ;;  %1364 = vrot.lane.b32.xlu0 %v1351_v32, %s2545_s13  ;;  %v1842_v32 = vld [vmem:[%s2971_s1] sm:$0x3] }
0x103c   :  { %1482 = vrot.lane.b32.xlu1 %v1469_v35, %s2545_s13 }
0x10a6   :  { %v1360_v42 = vpop.permute.xlu0 %1359 }
0x10a7   :  { %1362 = vst.msk [vmem:[#allocation2] sm:$0x3] %vm59_vm0, %v1360_v42  ;;  %2035 = vst.msk [vmem:[%s2972_s4 + $0xa] sm:$0x3] %vm59_vm0, %v1360_v42 }
0x10aa   :  { %v1478_v43 = vpop.permute.xlu1 %1477  ;;  %v1365_v44 = vpop.permute.xlu0 %1364 }
0x10ab   :  { %1480 = vst.msk [vmem:[#allocation4] sm:$0x3] %vm59_vm0, %v1478_v43  ;;  %2039 = vst.msk [vmem:[%s2973_s5 + $0x4] sm:$0x3] %vm59_vm0, %v1478_v43 }
0x10ac   :  { %1367 = vst.msk [vmem:[#allocation3] sm:$0x3] %vm59_vm0, %v1365_v44 }
0x10ae   :  { %v1483_v45 = vpop.permute.xlu1 %1482  ;;  %v1490_v46 = vld [vmem:[#allocation2] sm:$0x3] }
0x10af   :  { %1485 = vst.msk [vmem:[#allocation5] sm:$0x3] %vm59_vm0, %v1483_v45  ;;  %2275 = vmatmul.mubr.msk.f32.vlgmr.msra.gmra.mrb[12].mxu0 %vm74_vm2, %v1490_v46 }
0x10b0   :  { %2396 = vmatpush3.bf16.msra.mxu0 %v2595_v5  ;;  %2296 = vmatprep.mubr.msk.f32.mxu0 %vm2542_vm1, %v2541_v4  ;;  %v2040_v5 = vld [vmem:[%s2970_s0 + $0xc] sm:$0x3] }
0x10b1   :  { %2397 = vmatprep.subr.bf16.mxu0 %v2540_v0 }
0x10b2   :  { %v1608_v47 = vld [vmem:[#allocation4] sm:$0x3] }
0x10b3   :  { %2286 = vmatmul.mubr.msk.f32.vlgmr.msra.gmra.mrb[12].mxu1 %vm74_vm2, %v1608_v47 }
0x10b4   :  { %2399 = vmatpush3.bf16.msra.mxu0 %v2619_v12  ;;  %2402 = vmatpush3.bf16.msra.mxu1 %v2610_v9  ;;  %v2044_v12 = vld [vmem:[%s2971_s1 + $0x2] sm:$0x3] }
0x10b5   :  { %2403 = vmatprep.subr.bf16.mxu1 %v2540_v0  ;;  %2307 = vmatprep.mubr.msk.f32.mxu1 %vm2542_vm1, %v2541_v4 }
0x10b6   :  { %v1683_v53 = vld [vmem:[#allocation5] sm:$0x3] }
0x10b8   :  { %2405 = vmatpush3.bf16.msra.mxu1 %v2623_v13  ;;  %v1565_v13 = vld [vmem:[#allocation3] sm:$0x3] }
0x1182   :  { %v1560_v48 = vpop.f32.mrb[12].mxu0 }
0x1183   :  { %v1564_v49 = vadd.f32 %v2040_v5, %v1560_v48  ;;  %v2276_v50 = vpop.f32.mrb[13].mxu0 }
0x1185   :  { %2508 = vtanh.f32 %v1564_v49  ;;  %v2042_v54 = vmul.f32 -1.442695, %v1564_v49 }
0x1186   :  { %v1678_v9 = vpop.f32.mrb[12].mxu1 }
0x1187   :  { %v1682_v51 = vadd.f32 %v2044_v12, %v1678_v9  ;;  %v2287_v0 = vpop.f32.mrb[13].mxu1 }
0x1189   :  { %2510 = vtanh.f32 %v1682_v51  ;;  %v2046_v55 = vmul.f32 -1.442695, %v1682_v51 }
0x118a   :  { %2512 = vpow2.f32 %v2042_v54 }
0x118b   :  { %2514 = vpow2.f32 %v2046_v55 }
0x118f   :  { %v2509_v52 = vpop.eup %2508 }
0x1190   :  { %1579 = vrot.lane.b32.xlu0 %v2509_v52, %s2544_s12 }
0x1193   :  { %v2511_v4 = vpop.eup %2510 }
0x1194   :  { %1697 = vrot.lane.b32.xlu1 %v2511_v4, %s2544_s12  ;;  %1574 = vrot.lane.b32.xlu0 %v1565_v13, %s2543_s2  ;;  %v2513_v56 = vpop.eup %2512 }
0x1195   :  { %v1569_v57 = vadd.f32 1.0, %v2513_v56  ;;  %v2515_v58 = vpop.eup %2514 }
0x1196   :  { %v1687_v59 = vadd.f32 1.0, %v2515_v58 }
0x1197   :  { %2516 = vrcp.f32 %v1569_v57 }
0x1198   :  { %1692 = vrot.lane.b32.xlu1 %v1683_v53, %s2543_s2  ;;  %2518 = vrcp.f32 %v1687_v59 }
0x11a1   :  { %v2517_v60 = vpop.eup %2516 }
0x11a2   :  { %v2519_v63 = vpop.eup %2518 }
0x1202   :  { %v1580_v61 = vpop.permute.xlu0 %1579 }
0x1203   :  { %v1582_v62 = vmul.f32 %v2517_v60, %v1580_v61 }
0x1205   :  { %1584 = vrot.lane.b32.xlu0 %v1582_v62, %s2543_s2 }
0x1206   :  { %v1698_v1 = vpop.permute.xlu1 %1697  ;;  %v1575_v3 = vpop.permute.xlu0 %1574 }
0x1207   :  { %v1700_v2 = vmul.f32 %v2519_v63, %v1698_v1  ;;  %v1577_v6 = vmul.f32 %v2517_v60, %v1575_v3 }
0x1209   :  { %1702 = vrot.lane.b32.xlu1 %v1700_v2, %s2543_s2 }
0x120a   :  { %v1693_v7 = vpop.permute.xlu1 %1692 }
0x120b   :  { %v1695_v11 = vmul.f32 %v2519_v63, %v1693_v7 }
0x1277   :  { %v1585_v8 = vpop.permute.xlu0 %1584 }
0x1278   :  { %v1587_v10 = vadd.f32 %v1585_v8, %v1577_v6 }
0x127a   :  { %2520 = vtanh.f32 %v1587_v10 }
0x127b   :  { %v1703_v14 = vpop.permute.xlu1 %1702 }
0x127c   :  { %v1705_v15 = vadd.f32 %v1703_v14, %v1695_v11 }
0x127e   :  { %2522 = vtanh.f32 %v1705_v15 }
0x1284   :  { %v2521_v16 = vpop.eup %2520 }
0x1285   :  { %1590 = vrot.lane.b32.xlu0 %v2521_v16, %s2544_s12 }
0x1288   :  { %v2523_v17 = vpop.eup %2522 }
0x1289   :  { %1708 = vrot.lane.b32.xlu1 %v2523_v17, %s2544_s12 }
0x12f7   :  { %v1591_v18 = vpop.permute.xlu0 %1590 }
0x12f8   :  { %v1593_v19 = vmul.f32 %v2517_v60, %v1591_v18 }
0x12fa   :  { %1595 = vrot.lane.b32.xlu0 %v1593_v19, %s2543_s2 }
0x12fb   :  { %v1709_v20 = vpop.permute.xlu1 %1708 }
0x12fc   :  { %v1711_v21 = vmul.f32 %v2519_v63, %v1709_v20 }
0x12fe   :  { %1713 = vrot.lane.b32.xlu1 %v1711_v21, %s2543_s2  ;;  %1600 = vrot.lane.b32.xlu0 %v1587_v10, %s2545_s13 }
0x1302   :  { %1718 = vrot.lane.b32.xlu1 %v1705_v15, %s2545_s13 }
0x136c   :  { %v1596_v22 = vpop.permute.xlu0 %1595 }
0x136d   :  { %1598 = vst.msk [vmem:[#allocation2] sm:$0x3] %vm59_vm0, %v1596_v22  ;;  %2043 = vst.msk [vmem:[%s2972_s4 + $0xc] sm:$0x3] %vm59_vm0, %v1596_v22 }
0x1370   :  { %v1714_v23 = vpop.permute.xlu1 %1713  ;;  %v1601_v24 = vpop.permute.xlu0 %1600 }
0x1371   :  { %1716 = vst.msk [vmem:[#allocation4] sm:$0x3] %vm59_vm0, %v1714_v23  ;;  %2047 = vst.msk [vmem:[%s2973_s5 + $0x2] sm:$0x3] %vm59_vm0, %v1714_v23 }
0x1372   :  { %1603 = vst.msk [vmem:[#allocation3] sm:$0x3] %vm59_vm0, %v1601_v24 }
0x1374   :  { %v1719_v25 = vpop.permute.xlu1 %1718  ;;  %v1726_v26 = vld [vmem:[#allocation2] sm:$0x3] }
0x1375   :  { %1721 = vst.msk [vmem:[#allocation5] sm:$0x3] %vm59_vm0, %v1719_v25  ;;  %2297 = vmatmul.mubr.msk.f32.vlgmr.msra.gmra.mrb[14].mxu0 %vm74_vm2, %v1726_v26 }
0x1378   :  { %v1843_v27 = vld [vmem:[#allocation4] sm:$0x3] }
0x1379   :  { %2308 = vmatmul.mubr.msk.f32.vlgmr.msra.gmra.mrb[14].mxu1 %vm74_vm2, %v1843_v27  ;;  %v1801_v38 = vld [vmem:[#allocation3] sm:$0x3] }
0x137c   :  { %v1918_v39 = vld [vmem:[#allocation5] sm:$0x3] }
0x1448   :  { %v1796_v29 = vpop.f32.mrb[14].mxu0 }
0x1449   :  { %v1800_v30 = vadd.f32 %v2048_v28, %v1796_v29  ;;  %v2298_v31 = vpop.f32.mrb[15].mxu0 }
0x144b   :  { %2524 = vtanh.f32 %v1800_v30  ;;  %v2050_v40 = vmul.f32 -1.442695, %v1800_v30 }
0x144c   :  { %v1913_v33 = vpop.f32.mrb[14].mxu1 }
0x144d   :  { %v1917_v34 = vadd.f32 %v1913_v33, %v1842_v32  ;;  %v2309_v35 = vpop.f32.mrb[15].mxu1 }
0x144f   :  { %2526 = vtanh.f32 %v1917_v34  ;;  %v2053_v41 = vmul.f32 -1.442695, %v1917_v34 }
0x1450   :  { %2528 = vpow2.f32 %v2050_v40 }
0x1451   :  { %2530 = vpow2.f32 %v2053_v41 }
0x1455   :  { %v2525_v36 = vpop.eup %2524 }
0x1456   :  { %1815 = vrot.lane.b32.xlu0 %v2525_v36, %s2544_s12 }
0x1459   :  { %v2527_v37 = vpop.eup %2526 }
0x145a   :  { %1932 = vrot.lane.b32.xlu1 %v2527_v37, %s2544_s12  ;;  %1810 = vrot.lane.b32.xlu0 %v1801_v38, %s2543_s2  ;;  %v2529_v42 = vpop.eup %2528 }
0x145b   :  { %v1805_v43 = vadd.f32 1.0, %v2529_v42  ;;  %v2531_v44 = vpop.eup %2530 }
0x145c   :  { %v1922_v45 = vadd.f32 1.0, %v2531_v44 }
0x145d   :  { %2532 = vrcp.f32 %v1805_v43 }
0x145e   :  { %1927 = vrot.lane.b32.xlu1 %v1918_v39, %s2543_s2  ;;  %2534 = vrcp.f32 %v1922_v45 }
0x1467   :  { %v2533_v46 = vpop.eup %2532 }
0x1468   :  { %v2535_v48 = vpop.eup %2534 }
0x14c8   :  { %v1816_v47 = vpop.permute.xlu0 %1815 }
0x14c9   :  { %v1818_v5 = vmul.f32 %v2533_v46, %v1816_v47 }
0x14cb   :  { %1820 = vrot.lane.b32.xlu0 %v1818_v5, %s2543_s2 }
0x14cc   :  { %v1933_v49 = vpop.permute.xlu1 %1932  ;;  %v1811_v12 = vpop.permute.xlu0 %1810 }
0x14cd   :  { %v1935_v50 = vmul.f32 %v2535_v48, %v1933_v49  ;;  %v1813_v9 = vmul.f32 %v2533_v46, %v1811_v12 }
0x14cf   :  { %1937 = vrot.lane.b32.xlu1 %v1935_v50, %s2543_s2 }
0x14d0   :  { %v1928_v51 = vpop.permute.xlu1 %1927 }
0x14d1   :  { %v1930_v4 = vmul.f32 %v2535_v48, %v1928_v51 }
0x153d   :  { %v1821_v0 = vpop.permute.xlu0 %1820 }
0x153e   :  { %v1823_v52 = vadd.f32 %v1821_v0, %v1813_v9 }
0x1540   :  { %2536 = vtanh.f32 %v1823_v52 }
0x1541   :  { %v1938_v13 = vpop.permute.xlu1 %1937 }
0x1542   :  { %v1940_v53 = vadd.f32 %v1938_v13, %v1930_v4 }
0x1544   :  { %2538 = vtanh.f32 %v1940_v53 }
0x154a   :  { %v2537_v54 = vpop.eup %2536 }
0x154b   :  { %1826 = vrot.lane.b32.xlu0 %v2537_v54, %s2544_s12 }
0x154e   :  { %v2539_v55 = vpop.eup %2538 }
0x154f   :  { %1943 = vrot.lane.b32.xlu1 %v2539_v55, %s2544_s12 }
0x1553   :  { %1836 = vrot.lane.b32.xlu1 %v1823_v52, %s2545_s13 }
0x1557   :  { %1953 = vrot.lane.b32.xlu1 %v1940_v53, %s2545_s13 }
0x15bd   :  { %v1827_v56 = vpop.permute.xlu0 %1826 }
0x15be   :  { %v1829_v57 = vmul.f32 %v2533_v46, %v1827_v56 }
0x15c0   :  { %1831 = vrot.lane.b32.xlu0 %v1829_v57, %s2543_s2 }
0x15c1   :  { %v1944_v58 = vpop.permute.xlu1 %1943 }
0x15c2   :  { %v1946_v59 = vmul.f32 %v2535_v48, %v1944_v58 }
0x15c4   :  { %1948 = vrot.lane.b32.xlu0 %v1946_v59, %s2543_s2 }
0x15c5   :  { %v1837_v60 = vpop.permute.xlu1 %1836 }
0x15c6   :  { %1839 = vst.msk [vmem:[#allocation3] sm:$0x3] %vm59_vm0, %v1837_v60 }
0x15c9   :  { %v1954_v61 = vpop.permute.xlu1 %1953 }
0x15ca   :  { %1956 = vst.msk [vmem:[#allocation5] sm:$0x3] %vm59_vm0, %v1954_v61 }
0x1632   :  { %v1832_v62 = vpop.permute.xlu0 %1831 }
0x1633   :  { %1834 = vst.msk [vmem:[#allocation2] sm:$0x3] %vm59_vm0, %v1832_v62  ;;  %2051 = vst.msk [vmem:[%s2972_s4 + $0xe] sm:$0x3] %vm59_vm0, %v1832_v62 }
0x1636   :  { %v1949_v63 = vpop.permute.xlu0 %1948 }
0x1637   :  { %1951 = vst.msk [vmem:[#allocation4] sm:$0x3] %vm59_vm0, %v1949_v63  ;;  %1957 = vst.msk [vmem:[%s2973_s5] sm:$0x3] %vm59_vm0, %v1949_v63 }

</bundles_post_ra>
